<compile_context>
chip_gen: v6e
topology: v6e:2x2x1
jax: 0.10.0
libtpu: 0.0.40
codegen_flags: <defaults>
</compile_context>

<pallas_src>
import math

import jax
import jax.numpy as jnp
import numpy as np
from jax.experimental import pallas as pl
from jax.experimental.pallas import tpu as pltpu

# ------------------------- problem sizes (small) ---------------------------
B = 2      # batch
S = 128    # sequence length
H = 32     # hidden size (768 in the real model)
C = 256    # one-hot num_classes / max cells (hard-coded 256 in forward)
H3 = 3 * H
HP = 128   # padded width for the 3H=96 combined-MLP path

_GELU_C = math.sqrt(2.0 / math.pi)


def _gelu(x):
    # identical formula to the PyTorch module's gelu()
    return 0.5 * x * (1.0 + jnp.tanh(_GELU_C * (x + 0.044715 * x * x * x)))


# ------------------------------- kernel ------------------------------------
def heads_kernel(ids_ref, seq_ref, wm_ref, wv_ref, sb_ref, out_ref):
    f32 = jnp.float32
    ids = ids_ref[0]              # (3, S) int32: [input_ids, column_ids, row_ids]
    inp = ids[0:1, :]             # (1, S)
    col_ids = ids[1:2, :]         # (1, S)
    row_ids = ids[2:3, :]         # (1, S)
    seq = seq_ref[0]              # (S, H) f32

    iota_c = jax.lax.broadcasted_iota(jnp.int32, (C, S), 0)   # (C, S)

    colhead = jnp.logical_and(inp == 2, row_ids == 0)          # (1, S) bool
    tokmask = inp > 2                                          # (1, S) bool

    w_cell = wm_ref[0, :H, :]     # (H, 128): [W_hc | W_htc | W_hr | 0]
    b_cell = wv_ref[0:1, :]       # (1, 128): [b_hc | b_htc | b_hr | 0]

    # ---- column path: scatter (mask folded into the one-hot) ---------------
    eq_col = iota_c == col_ids                                           # (C, S)
    col_cell = jnp.dot((eq_col & colhead).astype(f32), seq,
                       preferred_element_type=f32)                       # (C, H)
    col_all = _gelu(jnp.dot(col_cell, w_cell, preferred_element_type=f32)
                    + b_cell)                                            # (C, 128)
    # prediction_column directly as a lane-dense (1, C) row
    pred_col = jax.lax.dot_general(
        wv_ref[4:5, :], col_all, (((1,), (1,)), ((), ())),
        preferred_element_type=f32) + sb_ref[0]                          # (1, C)
    out_ref[0, 0:1, :] = pred_col
    # gather back to the sequence (col_hidden lives in lanes 32:64)
    col_seq = jax.lax.dot_general(eq_col.astype(f32), col_all,
                                  (((0,), (0,)), ((), ())),
                                  preferred_element_type=f32)            # (S, 128)

    # ---- row path -----------------------------------------------------------
    eq_row = iota_c == row_ids
    row_cell = jnp.dot((eq_row & tokmask).astype(f32), seq,
                       preferred_element_type=f32)                       # (C, H)
    row_all = _gelu(jnp.dot(row_cell, w_cell, preferred_element_type=f32)
                    + b_cell)                                            # (C, 128)
    row_seq = jax.lax.dot_general(eq_row.astype(f32), row_all,
                                  (((0,), (0,)), ((), ())),
                                  preferred_element_type=f32)            # (S, 128)

    # merge the two gathers: lanes [32:64)=col_hidden, [64:96)=row_hidden,
    # the remaining lanes are dead (killed by zero rows of W1ab).
    lane = jax.lax.broadcasted_iota(jnp.int32, (S, HP), 1)
    comb = jnp.where(lane < 2 * H, col_seq, row_seq)                     # (S, 128)

    # ---- combined MLP (96 -> 128-lane padded, concat replaced by split dots)
    h = _gelu(jnp.dot(comb, wm_ref[1], preferred_element_type=f32)
              + jnp.dot(seq, wm_ref[2, :H, :], preferred_element_type=f32)
              + wv_ref[1:2, :])
    h = _gelu(jnp.dot(h, wm_ref[3], preferred_element_type=f32) + wv_ref[2:3, :])
    h = _gelu(jnp.dot(h, wm_ref[4], preferred_element_type=f32) + wv_ref[3:4, :])  # (S,128)

    # class-1 logit row and 2-class softmax as sigmoid of the logit difference
    preds1 = jax.lax.dot_general(wv_ref[6:7, :], h, (((1,), (1,)), ((), ())),
                                 preferred_element_type=f32) + sb_ref[1]   # (1, S)
    diff = jax.lax.dot_general(wv_ref[5:6, :], h, (((1,), (1,)), ((), ())),
                               preferred_element_type=f32) + sb_ref[2]     # (1, S)
    ptok = 1.0 / (1.0 + jnp.exp(-diff))                                    # (1, S)
    out_ref[0, 2:3, 0:S] = ptok
    out_ref[0, 2:3, S:C] = jnp.zeros((1, C - S), f32)

    # prediction_row: recompute the row one-hot (kept out of the MLP live range)
    eq_row2 = (iota_c == row_ids).astype(f32)                              # (C, S)
    pred_row = jax.lax.dot_general(preds1, eq_row2, (((1,), (1,)), ((), ())),
                                   preferred_element_type=f32)             # (1, C)
    out_ref[0, 1:2, :] = pred_row


# --------------------------- host-side packing ------------------------------
def pack_params(params):
    (W_agg, b_agg, W_ca, b_ca, W_hc, b_hc, W_cc, b_cc, W_htc, b_htc,
     W_hr, b_hr, W1, b1, W2, b2, W3, b3, Wc, bc) = [
        jnp.asarray(p, jnp.float32) for p in params]

    def zmat():
        return jnp.zeros((HP, HP), jnp.float32)

    # fused cell projection: [W_hc | W_htc | W_hr | 0]
    w_cell = (zmat().at[:H, 0:H].set(W_hc)
                    .at[:H, H:2 * H].set(W_htc)
                    .at[:H, 2 * H:3 * H].set(W_hr))
    # W1 split for the (col_hidden, row_hidden) merged input (lanes 32:96)
    w1ab = (zmat().at[H:2 * H, 0:H3].set(W1[0:H, :])
                  .at[2 * H:3 * H, 0:H3].set(W1[H:2 * H, :]))
    # W1 block that multiplies the raw sequence (K = H)
    w1c = zmat().at[:H, 0:H3].set(W1[2 * H:3 * H, :])
    w2e = zmat().at[0:H3, 0:H3].set(W2)
    w3e = zmat().at[0:H3, 0:H3].set(W3)
    wmats = jnp.stack([w_cell, w1ab, w1c, w2e, w3e], axis=0)      # (5, 128, 128)

    wv = jnp.zeros((8, HP), jnp.float32)
    wv = (wv.at[0, 0:H].set(b_hc[0])
            .at[0, H:2 * H].set(b_htc[0])
            .at[0, 2 * H:3 * H].set(b_hr[0])
            .at[1, 0:H3].set(b1[0])
            .at[2, 0:H3].set(b2[0])
            .at[3, 0:H3].set(b3[0])
            .at[4, 0:H].set(W_cc[:, 0])               # classifier_column row
            .at[5, 0:H3].set(Wc[:, 1] - Wc[:, 0])     # logit-difference row
            .at[6, 0:H3].set(Wc[:, 1]))               # class-1 logit row

    sbias = jnp.array([b_cc[0, 0], bc[0, 1], bc[0, 1] - bc[0, 0], 0.0],
                      jnp.float32)
    return wmats, wv, sbias


# ------------------------------ wrapper -------------------------------------
def qa_heads_forward(input_ids, token_type_ids, sequence_output, pooled_output, params):
    """params: ordered list of 20 weight/bias arrays (same order as v1)."""
    W_agg, b_agg, W_ca, b_ca = params[0:4]
    wmats, wvecs, sbias = pack_params(params)

    column_ids = token_type_ids[:, :, 1].astype(jnp.int32)
    row_ids = token_type_ids[:, :, 2].astype(jnp.int32)
    ids = jnp.stack([input_ids.astype(jnp.int32), column_ids, row_ids], axis=1)  # (B,3,S)

    out = pl.pallas_call(
        heads_kernel,
        out_shape=jax.ShapeDtypeStruct((B, 3, C), jnp.float32),
        grid=(B,),
        in_specs=[
            pl.BlockSpec((1, 3, S), lambda b: (b, 0, 0)),       # ids (lane orientation)
            pl.BlockSpec((1, S, H), lambda b: (b, 0, 0)),       # sequence_output
            pl.BlockSpec((5, HP, HP), lambda b: (0, 0, 0)),     # packed weight matrices
            pl.BlockSpec((8, HP), lambda b: (0, 0)),            # packed biases / row vectors
            pl.BlockSpec(memory_space=pltpu.MemorySpace.SMEM),  # scalar biases
        ],
        out_specs=pl.BlockSpec((1, 3, C), lambda b: (b, 0, 0)),  # merged lane-dense output
        compiler_params=pltpu.CompilerParams(dimension_semantics=("parallel",)),
    )(ids, sequence_output, wmats, wvecs, sbias)

    pred_col = out[:, 0, :]          # (B, 256)
    pred_row = out[:, 1, :]          # (B, 256)
    ptok = out[:, 2, :S]             # (B, S)

    # aggregation head on the pooled output: hoisted to plain XLA (perf review)
    pred_agg = _gelu(pooled_output @ W_agg + b_agg) @ W_ca + b_ca   # (B, 6)
    return pred_col, pred_row, ptok, pred_agg


# --------------------------- plain-JAX reference ----------------------------
def reference_forward(input_ids, token_type_ids, sequence_output, pooled_output, params):
    (W_agg, b_agg, W_ca, b_ca, W_hc, b_hc, W_cc, b_cc, W_htc, b_htc,
     W_hr, b_hr, W1, b1, W2, b2, W3, b3, Wc, bc) = params
    f32 = jnp.float32
    column_ids = token_type_ids[:, :, 1]
    row_ids = token_type_ids[:, :, 2]
    seq = sequence_output

    token_mask = (input_ids > 2).astype(f32)[:, :, None]
    col_mask = (input_ids == 2).astype(f32)[:, :, None]
    head_mask = (row_ids == 0).astype(f32)[:, :, None]

    pooled = _gelu(pooled_output @ W_agg + b_agg)
    pred_agg = pooled @ W_ca + b_ca

    oh_col = jax.nn.one_hot(column_ids, C, dtype=f32)          # (B, S, C)
    ohT_col = jnp.swapaxes(oh_col, 1, 2)                       # (B, C, S)
    col_cell = ohT_col @ (seq * col_mask * head_mask)          # (B, C, H)
    pred_col = (_gelu(col_cell @ W_hc + b_hc) @ W_cc + b_cc)[..., 0]

    col_hidden = oh_col @ _gelu(col_cell @ W_htc + b_htc)      # (B, S, H)

    oh_row = jax.nn.one_hot(row_ids, C, dtype=f32)
    ohT_row = jnp.swapaxes(oh_row, 1, 2)
    row_cell = ohT_row @ (seq * token_mask)
    row_hidden = oh_row @ _gelu(row_cell @ W_hr + b_hr)

    hidden = jnp.concatenate([col_hidden, row_hidden, seq], axis=-1)
    hidden = _gelu(hidden @ W1 + b1)
    hidden = _gelu(hidden @ W2 + b2)
    hidden = _gelu(hidden @ W3 + b3)
    preds = hidden @ Wc + bc                                   # (B, S, 2)
    pred_row = (ohT_row @ preds)[:, :, 1]
    soft = jax.nn.softmax(preds, axis=-1)[:, :, 1]
    return pred_col, pred_row, soft, pred_agg


# ------------------------------- main ---------------------------------------
if __name__ == "__main__":
    key = jax.random.PRNGKey(0)
    keys = jax.random.split(key, 40)

    # deterministic synthetic parameters (PyTorch Linear y = x @ W.T + b is
    # represented directly in (in, out) layout). Non-zero biases so the packed
    # bias plumbing is actually exercised by the check.
    std = 0.02

    def nrm(k, shape):
        return (std * jax.random.normal(k, shape)).astype(jnp.float32)

    params = [
        nrm(keys[0], (H, H)),    nrm(keys[20], (1, H)),    # hidden_agg
        nrm(keys[1], (H, 6)),    nrm(keys[21], (1, 6)),    # classifier_agg
        nrm(keys[2], (H, H)),    nrm(keys[22], (1, H)),    # hidden_column
        nrm(keys[3], (H, 1)),    nrm(keys[23], (1, 1)),    # classifier_column
        nrm(keys[4], (H, H)),    nrm(keys[24], (1, H)),    # hidden_token_column
        nrm(keys[5], (H, H)),    nrm(keys[25], (1, H)),    # hidden_row
        nrm(keys[6], (H3, H3)),  nrm(keys[26], (1, H3)),   # hidden_combined1
        nrm(keys[7], (H3, H3)),  nrm(keys[27], (1, H3)),   # hidden_combined2
        nrm(keys[8], (H3, H3)),  nrm(keys[28], (1, H3)),   # hidden_combined3
        nrm(keys[9], (H3, 2)),   nrm(keys[29], (1, 2)),    # classifier_combined
    ]

    # deterministic synthetic inputs
    input_ids = jax.random.randint(keys[10], (B, S), 0, 30, dtype=jnp.int32)
    tt = jnp.zeros((B, S, 7), jnp.int32)
    tt = tt.at[:, :, 1].set(jax.random.randint(keys[11], (B, S), 0, 8, dtype=jnp.int32))
    tt = tt.at[:, :, 2].set(jax.random.randint(keys[12], (B, S), 0, 16, dtype=jnp.int32))
    sequence_output = jax.random.normal(keys[13], (B, S, H), jnp.float32)
    pooled_output = jax.random.normal(keys[14], (B, H), jnp.float32)

    outs = qa_heads_forward(input_ids, tt, sequence_output, pooled_output, params)
    outs = jax.block_until_ready(outs)

    refs = reference_forward(input_ids, tt, sequence_output, pooled_output, params)
    for o, r in zip(outs, refs):
        np.testing.assert_allclose(np.asarray(o), np.asarray(r), rtol=1e-4, atol=1e-4)

    print("KERNEL_OK")
</pallas_src>

<mosaic_0001>
module attributes {stable_mosaic.version = 11 : i64} {
  func.func @heads_kernel(%arg0: i32, %arg1: memref<1x3x128xi32, #tpu.memory_space<vmem>>, %arg2: memref<1x128x32xf32, #tpu.memory_space<vmem>>, %arg3: memref<5x128x128xf32, #tpu.memory_space<vmem>>, %arg4: memref<8x128xf32, #tpu.memory_space<vmem>>, %arg5: memref<4xf32, #tpu.memory_space<smem>>, %arg6: memref<1x3x256xf32, #tpu.memory_space<vmem>>) attributes {dimension_semantics = [#tpu.dimension_semantics<parallel>], iteration_bounds = array<i64: 2>, scalar_prefetch = 0 : i64, scratch_operands = 0 : i64, tpu.core_type = #tpu.core_type<tc>, window_params = [{transform_indices = @transform_0, window_bounds = array<i64: 1, 3, 128>}, {transform_indices = @transform_1, window_bounds = array<i64: 1, 128, 32>}, {pipeline_mode = #tpu.pipeline_mode<synchronous>, transform_indices = @transform_2, window_bounds = array<i64: 5, 128, 128>}, {pipeline_mode = #tpu.pipeline_mode<synchronous>, transform_indices = @transform_3, window_bounds = array<i64: 8, 128>}, {transform_indices = @transform_4, window_bounds = array<i64: 4>}, {transform_indices = @transform_5, window_bounds = array<i64: 1, 3, 256>}]} {
    %c0 = arith.constant 0 : index
    %c0_0 = arith.constant 0 : index
    %c0_1 = arith.constant 0 : index
    %0 = vector.load %arg1[%c0, %c0_0, %c0_1] : memref<1x3x128xi32, #tpu.memory_space<vmem>>, vector<1x3x128xi32>
    %1 = vector.shape_cast %0 : vector<1x3x128xi32> to vector<3x128xi32>
    %2 = vector.extract_strided_slice %1 {offsets = [0, 0], sizes = [1, 128], strides = [1, 1]} : vector<3x128xi32> to vector<1x128xi32>
    %3 = vector.extract_strided_slice %1 {offsets = [1, 0], sizes = [1, 128], strides = [1, 1]} : vector<3x128xi32> to vector<1x128xi32>
    %4 = vector.extract_strided_slice %1 {offsets = [2, 0], sizes = [1, 128], strides = [1, 1]} : vector<3x128xi32> to vector<1x128xi32>
    %c0_2 = arith.constant 0 : index
    %c0_3 = arith.constant 0 : index
    %c0_4 = arith.constant 0 : index
    %5 = vector.load %arg2[%c0_2, %c0_3, %c0_4] : memref<1x128x32xf32, #tpu.memory_space<vmem>>, vector<1x128x32xf32>
    %6 = vector.shape_cast %5 : vector<1x128x32xf32> to vector<128x32xf32>
    %7 = tpu.iota {dimensions = array<i32: 0>} : vector<256x128xi32>
    %c2_i32 = arith.constant 2 : i32
    %8 = vector.broadcast %c2_i32 : i32 to vector<1x128xi32>
    %9 = arith.cmpi eq, %2, %8 : vector<1x128xi32>
    %c0_i32 = arith.constant 0 : i32
    %10 = vector.broadcast %c0_i32 : i32 to vector<1x128xi32>
    %11 = arith.cmpi eq, %4, %10 : vector<1x128xi32>
    %12 = arith.andi %9, %11 : vector<1x128xi1>
    %c2_i32_5 = arith.constant 2 : i32
    %13 = vector.broadcast %c2_i32_5 : i32 to vector<1x128xi32>
    %14 = arith.cmpi sgt, %2, %13 : vector<1x128xi32>
    %c0_6 = arith.constant 0 : index
    %c0_7 = arith.constant 0 : index
    %c0_8 = arith.constant 0 : index
    %15 = vector.load %arg3[%c0_6, %c0_7, %c0_8] : memref<5x128x128xf32, #tpu.memory_space<vmem>>, vector<1x32x128xf32>
    %16 = vector.shape_cast %15 : vector<1x32x128xf32> to vector<32x128xf32>
    %c0_9 = arith.constant 0 : index
    %c0_10 = arith.constant 0 : index
    %17 = vector.load %arg4[%c0_9, %c0_10] : memref<8x128xf32, #tpu.memory_space<vmem>>, vector<1x128xf32>
    %18 = vector.broadcast %3 : vector<1x128xi32> to vector<256x128xi32>
    %19 = arith.cmpi eq, %7, %18 : vector<256x128xi32>
    %20 = vector.broadcast %12 : vector<1x128xi1> to vector<256x128xi1>
    %21 = arith.andi %19, %20 : vector<256x128xi1>
    %22 = arith.extui %21 : vector<256x128xi1> to vector<256x128xi32>
    %23 = arith.sitofp %22 : vector<256x128xi32> to vector<256x128xf32>
    %cst = arith.constant dense<0.000000e+00> : vector<256x32xf32>
    %24 = tpu.matmul %23, %6, %cst {dimension_numbers = #tpu.dot_dimension_numbers<[1], [0], [0], [1], [0, 0, 1, 1], [], []>} : vector<256x128xf32>, vector<128x32xf32>, vector<256x32xf32> -> vector<256x32xf32>
    %cst_11 = arith.constant dense<0.000000e+00> : vector<256x128xf32>
    %25 = tpu.matmul %24, %16, %cst_11 {dimension_numbers = #tpu.dot_dimension_numbers<[1], [0], [0], [1], [0, 0, 1, 1], [], []>} : vector<256x32xf32>, vector<32x128xf32>, vector<256x128xf32> -> vector<256x128xf32>
    %26 = vector.broadcast %17 : vector<1x128xf32> to vector<256x128xf32>
    %27 = arith.addf %25, %26 : vector<256x128xf32>
    %cst_12 = arith.constant 5.000000e-01 : f32
    %28 = vector.broadcast %cst_12 : f32 to vector<256x128xf32>
    %29 = arith.mulf %28, %27 : vector<256x128xf32>
    %cst_13 = arith.constant 4.471500e-02 : f32
    %30 = vector.broadcast %cst_13 : f32 to vector<256x128xf32>
    %31 = arith.mulf %30, %27 : vector<256x128xf32>
    %32 = arith.mulf %31, %27 : vector<256x128xf32>
    %33 = arith.mulf %32, %27 : vector<256x128xf32>
    %34 = arith.addf %27, %33 : vector<256x128xf32>
    %cst_14 = arith.constant 0.797884583 : f32
    %35 = vector.broadcast %cst_14 : f32 to vector<256x128xf32>
    %36 = arith.mulf %35, %34 : vector<256x128xf32>
    %37 = math.tanh %36 : vector<256x128xf32>
    %cst_15 = arith.constant 1.000000e+00 : f32
    %38 = vector.broadcast %cst_15 : f32 to vector<256x128xf32>
    %39 = arith.addf %38, %37 : vector<256x128xf32>
    %40 = arith.mulf %29, %39 : vector<256x128xf32>
    %c4 = arith.constant 4 : index
    %c0_16 = arith.constant 0 : index
    %41 = vector.load %arg4[%c4, %c0_16] : memref<8x128xf32, #tpu.memory_space<vmem>>, vector<1x128xf32>
    %cst_17 = arith.constant dense<0.000000e+00> : vector<1x256xf32>
    %42 = tpu.matmul %41, %40, %cst_17 {dimension_numbers = #tpu.dot_dimension_numbers<[1], [1], [0], [0], [0, 0, 1, 0], [], []>} : vector<1x128xf32>, vector<256x128xf32>, vector<1x256xf32> -> vector<1x256xf32>
    %c0_18 = arith.constant 0 : index
    %43 = memref.load %arg5[%c0_18] : memref<4xf32, #tpu.memory_space<smem>>
    %44 = vector.broadcast %43 : f32 to vector<1x256xf32>
    %45 = arith.addf %42, %44 : vector<1x256xf32>
    %c0_19 = arith.constant 0 : index
    %c0_20 = arith.constant 0 : index
    %c0_21 = arith.constant 0 : index
    %46 = vector.load %arg6[%c0_19, %c0_20, %c0_21] : memref<1x3x256xf32, #tpu.memory_space<vmem>>, vector<1x1x256xf32>
    %47 = vector.shape_cast %46 : vector<1x1x256xf32> to vector<1x256xf32>
    %48 = vector.shape_cast %45 : vector<1x256xf32> to vector<1x1x256xf32>
    tpu.vector_store %arg6[%c0_19, %c0_20, %c0_21], %48 {strides = array<i32>} : memref<1x3x256xf32, #tpu.memory_space<vmem>>, vector<1x1x256xf32>,
    %49 = arith.extui %19 : vector<256x128xi1> to vector<256x128xi32>
    %50 = arith.sitofp %49 : vector<256x128xi32> to vector<256x128xf32>
    %cst_22 = arith.constant dense<0.000000e+00> : vector<128x128xf32>
    %51 = tpu.matmul %50, %40, %cst_22 {dimension_numbers = #tpu.dot_dimension_numbers<[0], [0], [1], [1], [0, 1, 1, 1], [], []>} : vector<256x128xf32>, vector<256x128xf32>, vector<128x128xf32> -> vector<128x128xf32>
    %52 = vector.broadcast %4 : vector<1x128xi32> to vector<256x128xi32>
    %53 = arith.cmpi eq, %7, %52 : vector<256x128xi32>
    %54 = vector.broadcast %14 : vector<1x128xi1> to vector<256x128xi1>
    %55 = arith.andi %53, %54 : vector<256x128xi1>
    %56 = arith.extui %55 : vector<256x128xi1> to vector<256x128xi32>
    %57 = arith.sitofp %56 : vector<256x128xi32> to vector<256x128xf32>
    %cst_23 = arith.constant dense<0.000000e+00> : vector<256x32xf32>
    %58 = tpu.matmul %57, %6, %cst_23 {dimension_numbers = #tpu.dot_dimension_numbers<[1], [0], [0], [1], [0, 0, 1, 1], [], []>} : vector<256x128xf32>, vector<128x32xf32>, vector<256x32xf32> -> vector<256x32xf32>
    %cst_24 = arith.constant dense<0.000000e+00> : vector<256x128xf32>
    %59 = tpu.matmul %58, %16, %cst_24 {dimension_numbers = #tpu.dot_dimension_numbers<[1], [0], [0], [1], [0, 0, 1, 1], [], []>} : vector<256x32xf32>, vector<32x128xf32>, vector<256x128xf32> -> vector<256x128xf32>
    %60 = vector.broadcast %17 : vector<1x128xf32> to vector<256x128xf32>
    %61 = arith.addf %59, %60 : vector<256x128xf32>
    %cst_25 = arith.constant 5.000000e-01 : f32
    %62 = vector.broadcast %cst_25 : f32 to vector<256x128xf32>
    %63 = arith.mulf %62, %61 : vector<256x128xf32>
    %cst_26 = arith.constant 4.471500e-02 : f32
    %64 = vector.broadcast %cst_26 : f32 to vector<256x128xf32>
    %65 = arith.mulf %64, %61 : vector<256x128xf32>
    %66 = arith.mulf %65, %61 : vector<256x128xf32>
    %67 = arith.mulf %66, %61 : vector<256x128xf32>
    %68 = arith.addf %61, %67 : vector<256x128xf32>
    %cst_27 = arith.constant 0.797884583 : f32
    %69 = vector.broadcast %cst_27 : f32 to vector<256x128xf32>
    %70 = arith.mulf %69, %68 : vector<256x128xf32>
    %71 = math.tanh %70 : vector<256x128xf32>
    %cst_28 = arith.constant 1.000000e+00 : f32
    %72 = vector.broadcast %cst_28 : f32 to vector<256x128xf32>
    %73 = arith.addf %72, %71 : vector<256x128xf32>
    %74 = arith.mulf %63, %73 : vector<256x128xf32>
    %75 = arith.extui %53 : vector<256x128xi1> to vector<256x128xi32>
    %76 = arith.sitofp %75 : vector<256x128xi32> to vector<256x128xf32>
    %cst_29 = arith.constant dense<0.000000e+00> : vector<128x128xf32>
    %77 = tpu.matmul %76, %74, %cst_29 {dimension_numbers = #tpu.dot_dimension_numbers<[0], [0], [1], [1], [0, 1, 1, 1], [], []>} : vector<256x128xf32>, vector<256x128xf32>, vector<128x128xf32> -> vector<128x128xf32>
    %78 = tpu.iota {dimensions = array<i32: 1>} : vector<128x128xi32>
    %c64_i32 = arith.constant 64 : i32
    %79 = vector.broadcast %c64_i32 : i32 to vector<128x128xi32>
    %80 = arith.cmpi slt, %78, %79 : vector<128x128xi32>
    %81 = arith.select %80, %51, %77 : vector<128x128xi1>, vector<128x128xf32>
    %c1 = arith.constant 1 : index
    %c0_30 = arith.constant 0 : index
    %c0_31 = arith.constant 0 : index
    %82 = vector.load %arg3[%c1, %c0_30, %c0_31] : memref<5x128x128xf32, #tpu.memory_space<vmem>>, vector<1x128x128xf32>
    %83 = vector.shape_cast %82 : vector<1x128x128xf32> to vector<128x128xf32>
    %cst_32 = arith.constant dense<0.000000e+00> : vector<128x128xf32>
    %84 = tpu.matmul %81, %83, %cst_32 {dimension_numbers = #tpu.dot_dimension_numbers<[1], [0], [0], [1], [0, 0, 1, 1], [], []>} : vector<128x128xf32>, vector<128x128xf32>, vector<128x128xf32> -> vector<128x128xf32>
    %c2 = arith.constant 2 : index
    %c0_33 = arith.constant 0 : index
    %c0_34 = arith.constant 0 : index
    %85 = vector.load %arg3[%c2, %c0_33, %c0_34] : memref<5x128x128xf32, #tpu.memory_space<vmem>>, vector<1x32x128xf32>
    %86 = vector.shape_cast %85 : vector<1x32x128xf32> to vector<32x128xf32>
    %cst_35 = arith.constant dense<0.000000e+00> : vector<128x128xf32>
    %87 = tpu.matmul %6, %86, %cst_35 {dimension_numbers = #tpu.dot_dimension_numbers<[1], [0], [0], [1], [0, 0, 1, 1], [], []>} : vector<128x32xf32>, vector<32x128xf32>, vector<128x128xf32> -> vector<128x128xf32>
    %88 = arith.addf %84, %87 : vector<128x128xf32>
    %c1_36 = arith.constant 1 : index
    %c0_37 = arith.constant 0 : index
    %89 = vector.load %arg4[%c1_36, %c0_37] : memref<8x128xf32, #tpu.memory_space<vmem>>, vector<1x128xf32>
    %90 = vector.broadcast %89 : vector<1x128xf32> to vector<128x128xf32>
    %91 = arith.addf %88, %90 : vector<128x128xf32>
    %cst_38 = arith.constant 5.000000e-01 : f32
    %92 = vector.broadcast %cst_38 : f32 to vector<128x128xf32>
    %93 = arith.mulf %92, %91 : vector<128x128xf32>
    %cst_39 = arith.constant 4.471500e-02 : f32
    %94 = vector.broadcast %cst_39 : f32 to vector<128x128xf32>
    %95 = arith.mulf %94, %91 : vector<128x128xf32>
    %96 = arith.mulf %95, %91 : vector<128x128xf32>
    %97 = arith.mulf %96, %91 : vector<128x128xf32>
    %98 = arith.addf %91, %97 : vector<128x128xf32>
    %cst_40 = arith.constant 0.797884583 : f32
    %99 = vector.broadcast %cst_40 : f32 to vector<128x128xf32>
    %100 = arith.mulf %99, %98 : vector<128x128xf32>
    %101 = math.tanh %100 : vector<128x128xf32>
    %cst_41 = arith.constant 1.000000e+00 : f32
    %102 = vector.broadcast %cst_41 : f32 to vector<128x128xf32>
    %103 = arith.addf %102, %101 : vector<128x128xf32>
    %104 = arith.mulf %93, %103 : vector<128x128xf32>
    %c3 = arith.constant 3 : index
    %c0_42 = arith.constant 0 : index
    %c0_43 = arith.constant 0 : index
    %105 = vector.load %arg3[%c3, %c0_42, %c0_43] : memref<5x128x128xf32, #tpu.memory_space<vmem>>, vector<1x128x128xf32>
    %106 = vector.shape_cast %105 : vector<1x128x128xf32> to vector<128x128xf32>
    %cst_44 = arith.constant dense<0.000000e+00> : vector<128x128xf32>
    %107 = tpu.matmul %104, %106, %cst_44 {dimension_numbers = #tpu.dot_dimension_numbers<[1], [0], [0], [1], [0, 0, 1, 1], [], []>} : vector<128x128xf32>, vector<128x128xf32>, vector<128x128xf32> -> vector<128x128xf32>
    %c2_45 = arith.constant 2 : index
    %c0_46 = arith.constant 0 : index
    %108 = vector.load %arg4[%c2_45, %c0_46] : memref<8x128xf32, #tpu.memory_space<vmem>>, vector<1x128xf32>
    %109 = vector.broadcast %108 : vector<1x128xf32> to vector<128x128xf32>
    %110 = arith.addf %107, %109 : vector<128x128xf32>
    %cst_47 = arith.constant 5.000000e-01 : f32
    %111 = vector.broadcast %cst_47 : f32 to vector<128x128xf32>
    %112 = arith.mulf %111, %110 : vector<128x128xf32>
    %cst_48 = arith.constant 4.471500e-02 : f32
    %113 = vector.broadcast %cst_48 : f32 to vector<128x128xf32>
    %114 = arith.mulf %113, %110 : vector<128x128xf32>
    %115 = arith.mulf %114, %110 : vector<128x128xf32>
    %116 = arith.mulf %115, %110 : vector<128x128xf32>
    %117 = arith.addf %110, %116 : vector<128x128xf32>
    %cst_49 = arith.constant 0.797884583 : f32
    %118 = vector.broadcast %cst_49 : f32 to vector<128x128xf32>
    %119 = arith.mulf %118, %117 : vector<128x128xf32>
    %120 = math.tanh %119 : vector<128x128xf32>
    %cst_50 = arith.constant 1.000000e+00 : f32
    %121 = vector.broadcast %cst_50 : f32 to vector<128x128xf32>
    %122 = arith.addf %121, %120 : vector<128x128xf32>
    %123 = arith.mulf %112, %122 : vector<128x128xf32>
    %c4_51 = arith.constant 4 : index
    %c0_52 = arith.constant 0 : index
    %c0_53 = arith.constant 0 : index
    %124 = vector.load %arg3[%c4_51, %c0_52, %c0_53] : memref<5x128x128xf32, #tpu.memory_space<vmem>>, vector<1x128x128xf32>
    %125 = vector.shape_cast %124 : vector<1x128x128xf32> to vector<128x128xf32>
    %cst_54 = arith.constant dense<0.000000e+00> : vector<128x128xf32>
    %126 = tpu.matmul %123, %125, %cst_54 {dimension_numbers = #tpu.dot_dimension_numbers<[1], [0], [0], [1], [0, 0, 1, 1], [], []>} : vector<128x128xf32>, vector<128x128xf32>, vector<128x128xf32> -> vector<128x128xf32>
    %c3_55 = arith.constant 3 : index
    %c0_56 = arith.constant 0 : index
    %127 = vector.load %arg4[%c3_55, %c0_56] : memref<8x128xf32, #tpu.memory_space<vmem>>, vector<1x128xf32>
    %128 = vector.broadcast %127 : vector<1x128xf32> to vector<128x128xf32>
    %129 = arith.addf %126, %128 : vector<128x128xf32>
    %cst_57 = arith.constant 5.000000e-01 : f32
    %130 = vector.broadcast %cst_57 : f32 to vector<128x128xf32>
    %131 = arith.mulf %130, %129 : vector<128x128xf32>
    %cst_58 = arith.constant 4.471500e-02 : f32
    %132 = vector.broadcast %cst_58 : f32 to vector<128x128xf32>
    %133 = arith.mulf %132, %129 : vector<128x128xf32>
    %134 = arith.mulf %133, %129 : vector<128x128xf32>
    %135 = arith.mulf %134, %129 : vector<128x128xf32>
    %136 = arith.addf %129, %135 : vector<128x128xf32>
    %cst_59 = arith.constant 0.797884583 : f32
    %137 = vector.broadcast %cst_59 : f32 to vector<128x128xf32>
    %138 = arith.mulf %137, %136 : vector<128x128xf32>
    %139 = math.tanh %138 : vector<128x128xf32>
    %cst_60 = arith.constant 1.000000e+00 : f32
    %140 = vector.broadcast %cst_60 : f32 to vector<128x128xf32>
    %141 = arith.addf %140, %139 : vector<128x128xf32>
    %142 = arith.mulf %131, %141 : vector<128x128xf32>
    %c6 = arith.constant 6 : index
    %c0_61 = arith.constant 0 : index
    %143 = vector.load %arg4[%c6, %c0_61] : memref<8x128xf32, #tpu.memory_space<vmem>>, vector<1x128xf32>
    %cst_62 = arith.constant dense<0.000000e+00> : vector<1x128xf32>
    %144 = tpu.matmul %143, %142, %cst_62 {dimension_numbers = #tpu.dot_dimension_numbers<[1], [1], [0], [0], [0, 0, 1, 0], [], []>} : vector<1x128xf32>, vector<128x128xf32>, vector<1x128xf32> -> vector<1x128xf32>
    %c1_63 = arith.constant 1 : index
    %145 = memref.load %arg5[%c1_63] : memref<4xf32, #tpu.memory_space<smem>>
    %146 = vector.broadcast %145 : f32 to vector<1x128xf32>
    %147 = arith.addf %144, %146 : vector<1x128xf32>
    %c5 = arith.constant 5 : index
    %c0_64 = arith.constant 0 : index
    %148 = vector.load %arg4[%c5, %c0_64] : memref<8x128xf32, #tpu.memory_space<vmem>>, vector<1x128xf32>
    %cst_65 = arith.constant dense<0.000000e+00> : vector<1x128xf32>
    %149 = tpu.matmul %148, %142, %cst_65 {dimension_numbers = #tpu.dot_dimension_numbers<[1], [1], [0], [0], [0, 0, 1, 0], [], []>} : vector<1x128xf32>, vector<128x128xf32>, vector<1x128xf32> -> vector<1x128xf32>
    %c2_66 = arith.constant 2 : index
    %150 = memref.load %arg5[%c2_66] : memref<4xf32, #tpu.memory_space<smem>>
    %151 = vector.broadcast %150 : f32 to vector<1x128xf32>
    %152 = arith.addf %149, %151 : vector<1x128xf32>
    %cst_67 = arith.constant 0.000000e+00 : f32
    %153 = vector.broadcast %cst_67 : f32 to vector<1x128xf32>
    %154 = arith.subf %153, %152 : vector<1x128xf32>
    %155 = math.exp %154 : vector<1x128xf32>
    %cst_68 = arith.constant 1.000000e+00 : f32
    %156 = vector.broadcast %cst_68 : f32 to vector<1x128xf32>
    %157 = arith.addf %156, %155 : vector<1x128xf32>
    %cst_69 = arith.constant 1.000000e+00 : f32
    %158 = vector.broadcast %cst_69 : f32 to vector<1x128xf32>
    %159 = arith.divf %158, %157 : vector<1x128xf32>
    %c0_70 = arith.constant 0 : index
    %c2_71 = arith.constant 2 : index
    %c0_72 = arith.constant 0 : index
    %160 = vector.load %arg6[%c0_70, %c2_71, %c0_72] : memref<1x3x256xf32, #tpu.memory_space<vmem>>, vector<1x1x128xf32>
    %161 = vector.shape_cast %160 : vector<1x1x128xf32> to vector<1x128xf32>
    %162 = vector.shape_cast %159 : vector<1x128xf32> to vector<1x1x128xf32>
    tpu.vector_store %arg6[%c0_70, %c2_71, %c0_72], %162 {strides = array<i32>} : memref<1x3x256xf32, #tpu.memory_space<vmem>>, vector<1x1x128xf32>,
    %cst_73 = arith.constant 0.000000e+00 : f32
    %163 = vector.broadcast %cst_73 : f32 to vector<1x128xf32>
    %c0_74 = arith.constant 0 : index
    %c2_75 = arith.constant 2 : index
    %c128 = arith.constant 128 : index
    %164 = vector.load %arg6[%c0_74, %c2_75, %c128] : memref<1x3x256xf32, #tpu.memory_space<vmem>>, vector<1x1x128xf32>
    %165 = vector.shape_cast %164 : vector<1x1x128xf32> to vector<1x128xf32>
    %166 = vector.shape_cast %163 : vector<1x128xf32> to vector<1x1x128xf32>
    tpu.vector_store %arg6[%c0_74, %c2_75, %c128], %166 {strides = array<i32>} : memref<1x3x256xf32, #tpu.memory_space<vmem>>, vector<1x1x128xf32>,
    %167 = vector.broadcast %4 : vector<1x128xi32> to vector<256x128xi32>
    %168 = arith.cmpi eq, %7, %167 : vector<256x128xi32>
    %169 = arith.extui %168 : vector<256x128xi1> to vector<256x128xi32>
    %170 = arith.sitofp %169 : vector<256x128xi32> to vector<256x128xf32>
    %cst_76 = arith.constant dense<0.000000e+00> : vector<1x256xf32>
    %171 = tpu.matmul %147, %170, %cst_76 {dimension_numbers = #tpu.dot_dimension_numbers<[1], [1], [0], [0], [0, 0, 1, 0], [], []>} : vector<1x128xf32>, vector<256x128xf32>, vector<1x256xf32> -> vector<1x256xf32>
    %c0_77 = arith.constant 0 : index
    %c1_78 = arith.constant 1 : index
    %c0_79 = arith.constant 0 : index
    %172 = vector.load %arg6[%c0_77, %c1_78, %c0_79] : memref<1x3x256xf32, #tpu.memory_space<vmem>>, vector<1x1x256xf32>
    %173 = vector.shape_cast %172 : vector<1x1x256xf32> to vector<1x256xf32>
    %174 = vector.shape_cast %171 : vector<1x256xf32> to vector<1x1x256xf32>
    tpu.vector_store %arg6[%c0_77, %c1_78, %c0_79], %174 {strides = array<i32>} : memref<1x3x256xf32, #tpu.memory_space<vmem>>, vector<1x1x256xf32>,
    return
  }
  func.func @transform_0(%arg0: i32) -> (i32, i32, i32) {
    %c0_i32 = arith.constant 0 : i32
    %c0_i32_0 = arith.constant 0 : i32
    %c0_i32_1 = arith.constant 0 : i32
    return %arg0, %c0_i32, %c0_i32_0 : i32, i32, i32
  }
  func.func @transform_1(%arg0: i32) -> (i32, i32, i32) {
    %c0_i32 = arith.constant 0 : i32
    %c0_i32_0 = arith.constant 0 : i32
    %c0_i32_1 = arith.constant 0 : i32
    return %arg0, %c0_i32, %c0_i32_0 : i32, i32, i32
  }
  func.func @transform_2(%arg0: i32) -> (i32, i32, i32) {
    %c0_i32 = arith.constant 0 : i32
    %c0_i32_0 = arith.constant 0 : i32
    %c0_i32_1 = arith.constant 0 : i32
    %c0_i32_2 = arith.constant 0 : i32
    return %c0_i32, %c0_i32_0, %c0_i32_1 : i32, i32, i32
  }
  func.func @transform_3(%arg0: i32) -> (i32, i32) {
    %c0_i32 = arith.constant 0 : i32
    %c0_i32_0 = arith.constant 0 : i32
    %c0_i32_1 = arith.constant 0 : i32
    return %c0_i32, %c0_i32_0 : i32, i32
  }
  func.func @transform_4(%arg0: i32) -> i32 {
    %c0_i32 = arith.constant 0 : i32
    %c0_i32_0 = arith.constant 0 : i32
    return %c0_i32 : i32
  }
  func.func @transform_5(%arg0: i32) -> (i32, i32, i32) {
    %c0_i32 = arith.constant 0 : i32
    %c0_i32_0 = arith.constant 0 : i32
    %c0_i32_1 = arith.constant 0 : i32
    return %arg0, %c0_i32, %c0_i32_0 : i32, i32, i32
  }
}

</mosaic_0001>

<bundles_post_ra>
// kernel: tpu_custom_call.1
= control target key start
LH: loop header
LB: loop body
LE: loop exit
PB: predicated region body
PF: predicated region fallthrough
CT: control target
= control target key end

     0   :  { %10 = vsyncpa [#allocation3], 0  ;;  %s9022_s0 = inlined_call_operand.vmem [shape: s32[2,3,128], index: 0, kind: input, shape index: {}]   ;;  %s9023_s1 = inlined_call_operand.vmem [shape: f32[2,128,32], index: 1, kind: input, shape index: {}]   ;;  %s9024_s2 = inlined_call_operand.hbm [shape: f32[5,128,128], index: 2, kind: input, shape index: {}]   ;;  %s9025_s3 = inlined_call_operand.vmem [shape: f32[8,128], index: 3, kind: input, shape index: {}]   ;;  %s9026_s4 = inlined_call_operand.vmem [shape: f32[4], index: 4, kind: input, shape index: {}]   ;;  %s9027_s5 = inlined_call_operand.vmem [shape: f32[2,3,256], index: 5, kind: output, shape index: {}]  }
   0x1   :  { %11 = vsyncpa [#allocation4], 0  ;;  %s6466_s18 = smov 0  }
   0x2 LB: > { %s6472_s19 = sadd.s32 4294967295, %s6425_s18   ;;  %p4429_p0 = scmp.ge.s32.totalorder %s6425_s18, 1  ;;  %s6425_s18 = sphi %s6466_s18, %s17_s18  }
   0x3   : > { %p163_p1 = scmp.lt.s32.totalorder %s6425_s18, 3  ;;  %s6427_s20 = smov [#allocation2]  }
   0x4   : > { %s175_s21 = sshll.u32 %s6427_s20, 4  ;;  %p5859_p3 = scmp.eq.s32.totalorder %s6472_s19, 0  ;;  %s176_s21 = int_to_ptr.vmem [resolvable:$true] %s175_s21 }
   0x5   : > { %p6476_p2 = pnand %p4429_p0, %p163_p1  ;;  %s192_s25 = sshll.u32 %s9026_s4, 4  ;;  %s193_s25 = int_to_ptr.vmem [resolvable:$true] %s192_s25 }
   0x6   : > { %s6381_s27 = scalar_lea.vmem %s176_s21, 10240  ;;  %p6389_p10 = scmp.lt.s32.totalorder %s176_s21, %s176_s21 }
   0x7   : > { %p5852_p4 = pneg %p6476_p2  ;;  %p6382_p7 = scmp.ne.s32.totalorder %s176_s21, %s6381_s27 }
   0x8   : > { %p6390_p11 = scmp.lt.s32.totalorder %s6381_s27, %s6381_s27 }
   0x9   : > { %p6488_p5 = pnand %p5859_p3, %p5852_p4 }
   0xa   : > { %p6391_p12 = por %p6390_p11, %p6389_p10 }
   0xb   : > { %p6372_p6 = pneg %p6488_p5 }
   0xd   : > { %p6384_p8 = pnand %p6382_p7, %p6372_p6 }
   0xf   : > { %p6385_p9 = pneg %p6384_p8 }
  0x11   : > { %p6392_p13 = pnand %p6391_p12, %p6385_p9 }
  0x13   : > { %6395 = shalt.err (!%p6392_p13)
}
  0x14   : > { %s6428_s28 = smov 128   ;;  %s6429_s29 = smov 8  }
  0x15   : > { %5855 = dma.hbm_to_vmem [thread:$0]  (!%p6488_p5), %s9024_s2, 10240, %s176_s21, [#allocation3], %s6428_s28, %s6428_s28, %s6429_s29  }
  0x16   : > { %s6396_s7 = scalar_lea.vmem %s193_s25, 16  ;;  %p6404_p7 = scmp.lt.s32.totalorder %s193_s25, %s193_s25 }
  0x17   : > { %p6397_p0 = scmp.ne.s32.totalorder %s193_s25, %s6396_s7  ;;  %p6405_p8 = scmp.lt.s32.totalorder %s6396_s7, %s6396_s7 }
  0x19   : > { %p6399_p1 = pnand %p6397_p0, %p6372_p6  ;;  %p6406_p10 = por %p6405_p8, %p6404_p7 }
  0x1b   : > { %p6400_p4 = pneg %p6399_p1 }
  0x1d   : > { %p6407_p9 = pnand %p6406_p10, %p6400_p4 }
  0x1f   : > { %6410 = shalt.err (!%p6407_p9)
}
  0x20   : > { %s6430_s8 = smov [#allocation5]   ;;  %220 = sbr.rel (%p6476_p2) target bundleno = 2562 (0xa02), region = 40 }
  0x21   : > { %5858 = dma.vmem_to_smem (!%p6488_p5), %s193_s25, 16, %s6430_s8, [#allocation4]  }
  0x25   : > { %6416 = dma.done.wait (%p5859_p3), [#allocation3], 10240  }
  0x26   : > { %6418 = vsyncadd (%p5859_p3), [#allocation3], 4294957056 }
  0x27   : > { %6420 = dma.done.wait (%p5859_p3), [#allocation4], 16  }
  0x28   : > { %6422 = vsyncadd (%p5859_p3), [#allocation4], 4294967280 }
  0x29   : > { %230 = sfence }
  0x2a   : > { %p257_p6 = scmp.lt.s32.totalorder %s6472_s19, 1  ;;  %v9049_v0 = vlaneseq  ;;  %v331_v1 = vld [vmem:[#allocation2 + $0x18] sm:$0xff]  ;;  %v330_v2 = vld [vmem:[#allocation2 + $0x10] sm:$0xff]  ;;  %v6431_v9 = vmov 0   ;;  %v9051_v23 = vmov 1.0   ;;  %v329_v63 = vld [vmem:[#allocation2 + $0x8] sm:$0xff] }
  0x2b   : > { %5382 = vmatprep.subr.mxu1 %v331_v1  ;;  %s1311_s27 = sld [smem:[#allocation5]] }
  0x2c   : > { %s9470_s19 = smov (!%p257_p6, %s6472_s19), 1  ;;  %v6522_v3 = vshrl.u32 %v9049_v0, 7  ;;  %5383 = vmatpush3.msra.mxu1 %v331_v1  ;;  %v328_v1 = vld [vmem:[#allocation2] sm:$0xff]  ;;  %s4717_s14 = sld [smem:[#allocation5 + $0x1]] }
  0x2d   : > { %5384 = vmatprep.subr.mxu1 %v330_v2  ;;  %s4436_s9 = sshll.u32 %s9470_s19, 2  ;;  %s4754_s10 = sshll.u32 %s9470_s19, 7 }
  0x2e   : > { %9191 = vst [vmem:[#allocation8_spill] sm:$0xff] %v6522_v3  ;;  %5385 = vmatpush3.msra.mxu1 %v330_v2  ;;  %s6529_s13 = scalar_lea.vmem %s9022_s0, %s4436_s9  ;;  %s6534_s16 = scalar_lea.vmem %s9023_s1, %s4754_s10  ;;  %v335_v6 = vsub.s32 1, %v6522_v3  ;;  %v372_v8 = vsub.s32 0, %v6522_v3  ;;  %v6568_v29 = vadd.s32 8, %v6522_v3  ;;  %v6572_v31 = vadd.s32 16, %v6522_v3 }
  0x2f   : > { %v271_v4 = vld [vmem:[%s6529_s13] sm:$0x7]  ;;  %v287_v5 = vld [vmem:[%s6534_s16 + $0x78] sm:$0xff]  ;;  %v286_v7 = vld [vmem:[%s6534_s16 + $0x70] sm:$0xff]  ;;  %v6578_v33 = vadd.s32 24, %v6522_v3  ;;  %v6584_v35 = vadd.s32 32, %v6522_v3  ;;  %5386 = vmatprep.subr.mxu1 %v329_v63 }
  0x30   : > { %vm322_vm0 = vcmp.eq.s32.totalorder %v271_v4, 0  ;;  %vm327_vm1 = vcmp.gt.s32.totalorder %v271_v4, 2  ;;  %5302 = vmatprep.subr.mxu0 %v287_v5  ;;  %v285_v12 = vld [vmem:[%s6534_s16 + $0x68] sm:$0xff]  ;;  %vm321_vm2 = vcmp.eq.s32.totalorder %v271_v4, 2  ;;  %v6544_v15 = vrot.slane %v271_v4, %v335_v6  ;;  %v284_v16 = vld [vmem:[%s6534_s16 + $0x60] sm:$0xff]  ;;  %v283_v17 = vld [vmem:[%s6534_s16 + $0x58] sm:$0xff]  ;;  %5387 = vmatpush3.msra.mxu1 %v329_v63 }
  0x31   : > { %v323_v10 = vsel %vm322_vm0, 1, %v6431_v9  ;;  %v1716_v11 = vsel %vm327_vm1, 1, %v6431_v9  ;;  %5303 = vmatpush3.msra.mxu0 %v287_v5  ;;  %v282_v20 = vld [vmem:[%s6534_s16 + $0x50] sm:$0xff]  ;;  %v281_v21 = vld [vmem:[%s6534_s16 + $0x48] sm:$0xff]  ;;  %v280_v22 = vld [vmem:[%s6534_s16 + $0x40] sm:$0xff]  ;;  %9193 = vst [vmem:[#allocation10_spill] sm:$0xff] %v6568_v29  ;;  %5388 = vmatprep.subr.mxu1 %v328_v1 }
  0x32   : > { %v324_v13 = vrot.slane %v323_v10, 2  ;;  %v6542_v14 = vrot.slane %v1716_v11, %v372_v8  ;;  %5304 = vmatprep.subr.mxu0 %v286_v7  ;;  %vm337_vm5 = vcmp.eq.s32.totalorder %v6522_v3, %v6544_v15  ;;  %v279_v24 = vld [vmem:[%s6534_s16 + $0x38] sm:$0xff]  ;;  %v278_v25 = vld [vmem:[%s6534_s16 + $0x30] sm:$0xff]  ;;  %v277_v26 = vld [vmem:[%s6534_s16 + $0x28] sm:$0xff]  ;;  %9194 = vst [vmem:[#allocation11_spill] sm:$0xff] %v6572_v31  ;;  %vm338_vm8 = vcmp.eq.s32.totalorder %v6568_v29, %v6544_v15  ;;  %s4755_s23 = sshll.u32 %s9470_s19, 3 }
  0x33   : > { %5305 = vmatpush3.msra.mxu0 %v286_v7  ;;  %v276_v27 = vld [vmem:[%s6534_s16 + $0x20] sm:$0xff]  ;;  %v275_v28 = vld [vmem:[%s6534_s16 + $0x18] sm:$0xff]  ;;  %v274_v30 = vld [vmem:[%s6534_s16 + $0x10] sm:$0xff]  ;;  %9195 = vst [vmem:[#allocation12_spill] sm:$0xff] %v6578_v33  ;;  %vm339_vm9 = vcmp.eq.s32.totalorder %v6572_v31, %v6544_v15  ;;  %vm340_vm12 = vcmp.eq.s32.totalorder %v6578_v33, %v6544_v15  ;;  %v6599_v36 = vadd.s32 40, %v6522_v3  ;;  %vm9040_vm13 = vcmp.eq.s32.totalorder %v6584_v35, %v6544_v15  ;;  %s7762_s26 = scalar_lea.vmem %s9027_s5, %s4755_s23  ;;  %s4718_s15 = sld [smem:[#allocation5 + $0x2]] }
  0x34   : > { %9192 = vst [vmem:[#allocation9_spill] sm:$0xff] %v6542_v14  ;;  %vm325_vm3 = vcmp.ne.s32.totalorder %v324_v13, 0  ;;  %5306 = vmatprep.subr.mxu0 %v285_v12  ;;  %v273_v32 = vld [vmem:[%s6534_s16 + $0x8] sm:$0xff]  ;;  %v272_v34 = vld [vmem:[%s6534_s16] sm:$0xff]  ;;  %9196 = vst [vmem:[#allocation13_spill] sm:$0xff] %v6584_v35  ;;  %v6604_v37 = vadd.s32 48, %v6522_v3  ;;  %5389 = vmatpush3.msra.mxu1 %v328_v1 }
  0x35   : > { %vm326_vm4 = vmand %vm321_vm2, %vm325_vm3  ;;  %5307 = vmatpush3.msra.mxu0 %v285_v12  ;;  %9197 = vst [vmem:[#allocation14_spill] sm:$0xff] %v6599_v36  ;;  %vm9038_vm0 = vcmp.eq.s32.totalorder %v6599_v36, %v6544_v15  ;;  %v6621_v38 = vadd.s32 56, %v6522_v3  ;;  %v6626_v39 = vadd.s32 64, %v6522_v3  ;;  %v6643_v40 = vadd.s32 72, %v6522_v3 }
  0x36   : > { %v369_v18 = vsel %vm326_vm4, 1, %v6431_v9  ;;  %5308 = vmatprep.subr.mxu0 %v284_v16  ;;  %9198 = vst [vmem:[#allocation15_spill] sm:$0xff] %v6604_v37  ;;  %vm9037_vm1 = vcmp.eq.s32.totalorder %v6604_v37, %v6544_v15  ;;  %v6648_v41 = vadd.s32 80, %v6522_v3  ;;  %v6665_v42 = vadd.s32 88, %v6522_v3 }
  0x37   : > { %v6548_v19 = vrot.slane %v369_v18, %v372_v8  ;;  %5309 = vmatpush3.msra.mxu0 %v284_v16  ;;  %9199 = vst [vmem:[#allocation16_spill] sm:$0xff] %v6621_v38  ;;  %9200 = vst [vmem:[#allocation17_spill] sm:$0xff] %v6626_v39  ;;  %vm9036_vm4 = vcmp.eq.s32.totalorder %v6621_v38, %v6544_v15  ;;  %v6670_v43 = vadd.s32 96, %v6522_v3  ;;  %v6687_v44 = vadd.s32 104, %v6522_v3 }
  0x38   : > { %5310 = vmatprep.subr.mxu0 %v283_v17  ;;  %9201 = vst [vmem:[#allocation18_spill] sm:$0xff] %v6643_v40  ;;  %9202 = vst [vmem:[#allocation19_spill] sm:$0xff] %v6648_v41  ;;  %v6692_v45 = vadd.s32 112, %v6522_v3  ;;  %v6709_v46 = vadd.s32 120, %v6522_v3  ;;  %v6714_v47 = vadd.s32 128, %v6522_v3  ;;  %v6731_v48 = vadd.s32 136, %v6522_v3 }
  0x39   : > { %vm374_vm6 = vcmp.eq.s32.totalorder %v6548_v19, 1  ;;  %5311 = vmatpush3.msra.mxu0 %v283_v17  ;;  %9203 = vst [vmem:[#allocation20_spill] sm:$0xff] %v6665_v42  ;;  %9204 = vst [vmem:[#allocation21_spill] sm:$0xff] %v6670_v43  ;;  %v6736_v49 = vadd.s32 144, %v6522_v3  ;;  %v6753_v50 = vadd.s32 152, %v6522_v3  ;;  %v6758_v51 = vadd.s32 160, %v6522_v3 }
  0x3a   : > { %5312 = vmatprep.subr.mxu0 %v282_v20  ;;  %vm375_vm7 = vmand %vm337_vm5, %vm374_vm6  ;;  %9205 = vst [vmem:[#allocation22_spill] sm:$0xff] %v6687_v44  ;;  %v6775_v52 = vadd.s32 168, %v6522_v3  ;;  %v6780_v53 = vadd.s32 176, %v6522_v3  ;;  %v6797_v54 = vadd.s32 184, %v6522_v3  ;;  %v6802_v55 = vadd.s32 192, %v6522_v3 }
  0x3b   : > { %5313 = vmatpush3.msra.mxu0 %v282_v20  ;;  %5334 = vmatprep.mubr.msk.f32.mxu0 %vm375_vm7, %v9051_v23  ;;  %vm376_vm10 = vmand %vm338_vm8, %vm374_vm6  ;;  %vm9028_vm7 = vcmp.eq.s32.totalorder %v6626_v39, %v6544_v15  ;;  %9206 = vst [vmem:[#allocation23_spill] sm:$0xff] %v6692_v45  ;;  %v6819_v56 = vadd.s32 200, %v6522_v3  ;;  %v6824_v57 = vadd.s32 208, %v6522_v3  ;;  %v6841_v58 = vadd.s32 216, %v6522_v3 }
  0x3c   : > { %5314 = vmatprep.subr.mxu0 %v281_v21  ;;  %vm377_vm11 = vmand %vm339_vm9, %vm374_vm6  ;;  %9207 = vst [vmem:[#allocation24_spill] sm:$0xff] %v6709_v46  ;;  %v6846_v59 = vadd.s32 224, %v6522_v3  ;;  %v6863_v60 = vadd.s32 232, %v6522_v3  ;;  %v6868_v61 = vadd.s32 240, %v6522_v3  ;;  %v6885_v62 = vadd.s32 248, %v6522_v3 }
  0x3d   : > { %5315 = vmatpush3.msra.mxu0 %v281_v21  ;;  %vm378_vm14 = vmand %vm340_vm12, %vm374_vm6  ;;  %9208 = vst [vmem:[#allocation25_spill] sm:$0xff] %v6714_v47 }
  0x3e   : > { %5316 = vmatprep.subr.mxu0 %v280_v22  ;;  %vm379_vm15 = vmand %vm9040_vm13, %vm374_vm6  ;;  %9209 = vst [vmem:[#allocation26_spill] sm:$0xff] %v6731_v48  ;;  %vm9044_vm13 = vcmp.eq.s32.totalorder %v6797_v54, %v6544_v15 }
  0x3f   : > { %5317 = vmatpush3.msra.mxu0 %v280_v22  ;;  %vm380_vm2 = vmand %vm9038_vm0, %vm374_vm6  ;;  %9210 = vst [vmem:[#allocation27_spill] sm:$0xff] %v6736_v49  ;;  %vm9042_vm0 = vcmp.eq.s32.totalorder %v6775_v52, %v6544_v15 }
  0x40   : > { %5318 = vmatprep.subr.mxu0 %v279_v24  ;;  %vm381_vm3 = vmand %vm9037_vm1, %vm374_vm6  ;;  %9211 = vst [vmem:[#allocation28_spill] sm:$0xff] %v6753_v50 }
  0x41   : > { %5319 = vmatpush3.msra.mxu0 %v279_v24  ;;  %9212 = vst [vmem:[#allocation29_spill] sm:$0xff] %v6758_v51  ;;  %9213 = vst [vmem:[#allocation30_spill] sm:$0xff] %v6775_v52 }
  0x42   : > { %5320 = vmatprep.subr.mxu0 %v278_v25  ;;  %9214 = vst [vmem:[#allocation31_spill] sm:$0xff] %v6780_v53  ;;  %9215 = vst [vmem:[#allocation32_spill] sm:$0xff] %v6797_v54 }
  0x43   : > { %5321 = vmatpush3.msra.mxu0 %v278_v25  ;;  %9216 = vst [vmem:[#allocation33_spill] sm:$0xff] %v6802_v55  ;;  %9217 = vst [vmem:[#allocation34_spill] sm:$0xff] %v6819_v56 }
  0x44   : > { %5322 = vmatprep.subr.mxu0 %v277_v26  ;;  %9218 = vst [vmem:[#allocation35_spill] sm:$0xff] %v6824_v57  ;;  %9219 = vst [vmem:[#allocation36_spill] sm:$0xff] %v6841_v58 }
  0x45   : > { %5323 = vmatpush3.msra.mxu0 %v277_v26  ;;  %9220 = vst [vmem:[#allocation37_spill] sm:$0xff] %v6846_v59  ;;  %9221 = vst [vmem:[#allocation38_spill] sm:$0xff] %v6863_v60 }
  0x46   : > { %5324 = vmatprep.subr.mxu0 %v276_v27  ;;  %9222 = vst [vmem:[#allocation39_spill] sm:$0xff] %v6868_v61  ;;  %9223 = vst [vmem:[#allocation40_spill] sm:$0xff] %v6885_v62 }
  0x47   : > { %5325 = vmatpush3.msra.mxu0 %v276_v27 }
  0x48   : > { %5326 = vmatprep.subr.mxu0 %v275_v28 }
  0x49   : > { %5327 = vmatpush3.msra.mxu0 %v275_v28 }
  0x4a   : > { %5328 = vmatprep.subr.mxu0 %v274_v30 }
  0x4b   : > { %5329 = vmatpush3.msra.mxu0 %v274_v30 }
  0x4c   : > { %5330 = vmatprep.subr.mxu0 %v273_v32 }
  0x4d   : > { %5331 = vmatpush3.msra.mxu0 %v273_v32 }
  0x4e   : > { %5332 = vmatprep.subr.mxu0 %v272_v34 }
  0x4f   : > { %5333 = vmatpush3.msra.mxu0 %v272_v34 }
  0x50   : > { %5335 = vmatmul.mubr.msk.f32.vlgmr.msra.gmra.mxu0 %vm376_vm10, %v9051_v23  ;;  %vm382_vm10 = vmand %vm9036_vm4, %vm374_vm6  ;;  %vm356_vm4 = vcmp.eq.s32.totalorder %v6753_v50, %v6544_v15 }
  0x51   : > { %5337 = vmatprep.mubr.msk.f32.mxu0 %vm377_vm11, %v9051_v23  ;;  %vm383_vm11 = vmand %vm9028_vm7, %vm374_vm6  ;;  %vm9032_vm7 = vcmp.eq.s32.totalorder %v6665_v42, %v6544_v15 }
  0x54   : > { %5338 = vmatmul.mubr.msk.f32.gmra.mxu0 %vm378_vm14, %v9051_v23  ;;  %vm9030_vm14 = vcmp.eq.s32.totalorder %v6643_v40, %v6544_v15 }
  0x55   : > { %5340 = vmatprep.mubr.msk.f32.mxu0 %vm379_vm15, %v9051_v23  ;;  %vm9029_vm15 = vcmp.eq.s32.totalorder %v6648_v41, %v6544_v15 }
  0x58   : > { %5341 = vmatmul.mubr.msk.f32.gmra.mxu0 %vm380_vm2, %v9051_v23  ;;  %vm384_vm2 = vmand %vm9030_vm14, %vm374_vm6  ;;  %vm9034_vm14 = vcmp.eq.s32.totalorder %v6687_v44, %v6544_v15 }
  0x59   : > { %5343 = vmatprep.mubr.msk.f32.mxu0 %vm381_vm3, %v9051_v23  ;;  %vm385_vm3 = vmand %vm9029_vm15, %vm374_vm6 }
  0x5c   : > { %5344 = vmatmul.mubr.msk.f32.gmra.mxu0 %vm382_vm10, %v9051_v23  ;;  %vm9031_vm10 = vcmp.eq.s32.totalorder %v6670_v43, %v6544_v15 }
  0x5d   : > { %5346 = vmatprep.mubr.msk.f32.mxu0 %vm383_vm11, %v9051_v23  ;;  %vm386_vm11 = vmand %vm9032_vm7, %vm374_vm6  ;;  %vm9035_vm7 = vcmp.eq.s32.totalorder %v6709_v46, %v6544_v15 }
  0x5e   : > { %vm387_vm15 = vmand %vm9031_vm10, %vm374_vm6 }
  0x60   : > { %5347 = vmatmul.mubr.msk.f32.gmra.mxu0 %vm384_vm2, %v9051_v23  ;;  %vm9033_vm2 = vcmp.eq.s32.totalorder %v6692_v45, %v6544_v15 }
  0x61   : > { %5349 = vmatprep.mubr.msk.f32.mxu0 %vm385_vm3, %v9051_v23  ;;  %vm388_vm3 = vmand %vm9034_vm14, %vm374_vm6  ;;  %vm354_vm14 = vcmp.eq.s32.totalorder %v6731_v48, %v6544_v15 }
  0x62   : > { %vm389_vm10 = vmand %vm9033_vm2, %vm374_vm6 }
  0x64   : > { %5350 = vmatmul.mubr.msk.f32.gmra.mxu0 %vm386_vm11, %v9051_v23  ;;  %vm390_vm11 = vmand %vm9035_vm7, %vm374_vm6 }
  0x65   : > { %5352 = vmatprep.mubr.msk.f32.mxu0 %vm387_vm15, %v9051_v23  ;;  %vm353_vm15 = vcmp.eq.s32.totalorder %v6714_v47, %v6544_v15 }
  0x66   : > { %vm391_vm2 = vmand %vm353_vm15, %vm374_vm6 }
  0x68   : > { %5353 = vmatmul.mubr.msk.f32.gmra.mxu0 %vm388_vm3, %v9051_v23  ;;  %vm392_vm3 = vmand %vm354_vm14, %vm374_vm6 }
  0x69   : > { %5355 = vmatprep.mubr.msk.f32.mxu0 %vm389_vm10, %v9051_v23  ;;  %vm355_vm10 = vcmp.eq.s32.totalorder %v6736_v49, %v6544_v15 }
  0x6a   : > { %vm393_vm7 = vmand %vm355_vm10, %vm374_vm6 }
  0x6c   : > { %5356 = vmatmul.mubr.msk.f32.gmra.mxu0 %vm390_vm11, %v9051_v23  ;;  %vm394_vm11 = vmand %vm356_vm4, %vm374_vm6 }
  0x6d   : > { %5358 = vmatprep.mubr.msk.f32.mxu0 %vm391_vm2, %v9051_v23  ;;  %vm9039_vm2 = vcmp.eq.s32.totalorder %v6758_v51, %v6544_v15 }
  0x6e   : > { %vm395_vm1 = vmand %vm9039_vm2, %vm374_vm6 }
  0x70   : > { %5359 = vmatmul.mubr.msk.f32.gmra.mxu0 %vm392_vm3, %v9051_v23  ;;  %vm396_vm3 = vmand %vm9042_vm0, %vm374_vm6  ;;  %vm9046_vm0 = vcmp.eq.s32.totalorder %v6819_v56, %v6544_v15 }
  0x71   : > { %5361 = vmatprep.mubr.msk.f32.mxu0 %vm393_vm7, %v9051_v23  ;;  %vm9041_vm7 = vcmp.eq.s32.totalorder %v6780_v53, %v6544_v15 }
  0x72   : > { %vm397_vm2 = vmand %vm9041_vm7, %vm374_vm6 }
  0x74   : > { %5362 = vmatmul.mubr.msk.f32.gmra.mxu0 %vm394_vm11, %v9051_v23  ;;  %vm398_vm11 = vmand %vm9044_vm13, %vm374_vm6  ;;  %vm9048_vm13 = vcmp.eq.s32.totalorder %v6841_v58, %v6544_v15 }
  0x75   : > { %5364 = vmatprep.mubr.msk.f32.mxu0 %vm395_vm1, %v9051_v23  ;;  %vm9043_vm1 = vcmp.eq.s32.totalorder %v6802_v55, %v6544_v15 }
  0x76   : > { %vm399_vm7 = vmand %vm9043_vm1, %vm374_vm6 }
  0x78   : > { %5365 = vmatmul.mubr.msk.f32.gmra.mxu0 %vm396_vm3, %v9051_v23  ;;  %vm400_vm3 = vmand %vm9046_vm0, %vm374_vm6  ;;  %vm366_vm0 = vcmp.eq.s32.totalorder %v6863_v60, %v6544_v15 }
  0x79   : > { %5367 = vmatprep.mubr.msk.f32.mxu0 %vm397_vm2, %v9051_v23  ;;  %vm9045_vm2 = vcmp.eq.s32.totalorder %v6824_v57, %v6544_v15 }
  0x7a   : > { %vm401_vm1 = vmand %vm9045_vm2, %vm374_vm6 }
  0x7c   : > { %5368 = vmatmul.mubr.msk.f32.gmra.mxu0 %vm398_vm11, %v9051_v23  ;;  %vm402_vm11 = vmand %vm9048_vm13, %vm374_vm6  ;;  %vm368_vm13 = vcmp.eq.s32.totalorder %v6885_v62, %v6544_v15 }
  0x7d   : > { %5370 = vmatprep.mubr.msk.f32.mxu0 %vm399_vm7, %v9051_v23  ;;  %vm9047_vm7 = vcmp.eq.s32.totalorder %v6846_v59, %v6544_v15 }
  0x7e   : > { %vm403_vm2 = vmand %vm9047_vm7, %vm374_vm6 }
  0x80   : > { %5371 = vmatmul.mubr.msk.f32.gmra.mxu0 %vm400_vm3, %v9051_v23  ;;  %vm404_vm3 = vmand %vm366_vm0, %vm374_vm6 }
  0x81   : > { %5373 = vmatprep.mubr.msk.f32.mxu0 %vm401_vm1, %v9051_v23  ;;  %vm367_vm1 = vcmp.eq.s32.totalorder %v6868_v61, %v6544_v15 }
  0x82   : > { %vm405_vm7 = vmand %vm367_vm1, %vm374_vm6 }
  0x84   : > { %5374 = vmatmul.mubr.msk.f32.gmra.mxu0 %vm402_vm11, %v9051_v23  ;;  %vm700_vm11 = vcmask 261120  }
  0x85   : > { %5376 = vmatprep.mubr.msk.f32.mxu0 %vm403_vm2, %v9051_v23  ;;  %vm406_vm2 = vmand %vm368_vm13, %vm374_vm6  ;;  %vm9245_vm6 = vcmp.eq.s32.totalorder %v6758_v51, %v6544_v15 }
  0x88   : > { %5377 = vmatmul.mubr.msk.f32.gmra.mxu0 %vm404_vm3, %v9051_v23 }
  0x89   : > { %5379 = vmatprep.mubr.msk.f32.mxu0 %vm405_vm7, %v9051_v23 }
  0x8c   : > { %5380 = vmatmul.mubr.msk.f32.gmra.mxu0 %vm406_vm2, %v9051_v23 }
 0x110   : > { %v5336_v2 = vpop.f32.mrf.mxu0 }
 0x112   : > { %v537_v4 = vpop.f32.mrf.mxu0 }
 0x113   : > { %5390 = vmatprep.mubr.msk.f32.mxu1 %vm700_vm11, %v537_v4 }
 0x114   : > { %v5339_v5 = vpop.f32.mrf.mxu0  ;;  %5391 = vmatmul.mubr.msk.f32.vlgmr.msra.gmra.mxu1 %vm700_vm11, %v5336_v2 }
 0x116   : > { %v547_v6 = vpop.f32.mrf.mxu0 }
 0x117   : > { %5393 = vmatprep.mubr.msk.f32.mxu1 %vm700_vm11, %v547_v6 }
 0x118   : > { %v5342_v7 = vpop.f32.mrf.mxu0  ;;  %5394 = vmatmul.mubr.msk.f32.gmra.mxu1 %vm700_vm11, %v5339_v5 }
 0x11a   : > { %v557_v8 = vpop.f32.mrf.mxu0 }
 0x11b   : > { %5396 = vmatprep.mubr.msk.f32.mxu1 %vm700_vm11, %v557_v8 }
 0x11c   : > { %v5345_v9 = vpop.f32.mrf.mxu0  ;;  %5397 = vmatmul.mubr.msk.f32.gmra.mxu1 %vm700_vm11, %v5342_v7 }
 0x11e   : > { %v567_v10 = vpop.f32.mrf.mxu0 }
 0x11f   : > { %5399 = vmatprep.mubr.msk.f32.mxu1 %vm700_vm11, %v567_v10 }
 0x120   : > { %v5348_v11 = vpop.f32.mrf.mxu0  ;;  %5400 = vmatmul.mubr.msk.f32.gmra.mxu1 %vm700_vm11, %v5345_v9 }
 0x122   : > { %v577_v12 = vpop.f32.mrf.mxu0 }
 0x123   : > { %5402 = vmatprep.mubr.msk.f32.mxu1 %vm700_vm11, %v577_v12 }
 0x124   : > { %v5351_v13 = vpop.f32.mrf.mxu0  ;;  %5403 = vmatmul.mubr.msk.f32.gmra.mxu1 %vm700_vm11, %v5348_v11 }
 0x126   : > { %v587_v16 = vpop.f32.mrf.mxu0 }
 0x127   : > { %5405 = vmatprep.mubr.msk.f32.mxu1 %vm700_vm11, %v587_v16 }
 0x128   : > { %v5354_v17 = vpop.f32.mrf.mxu0  ;;  %5406 = vmatmul.mubr.msk.f32.gmra.mxu1 %vm700_vm11, %v5351_v13 }
 0x12a   : > { %v597_v18 = vpop.f32.mrf.mxu0 }
 0x12b   : > { %5408 = vmatprep.mubr.msk.f32.mxu1 %vm700_vm11, %v597_v18  ;;  %v6946_v18 = vld [vmem:[%s9025_s3] ss:$0 sm:$0xff] }
 0x12c   : > { %v5357_v19 = vpop.f32.mrf.mxu0  ;;  %5409 = vmatmul.mubr.msk.f32.gmra.mxu1 %vm700_vm11, %v5354_v17 }
 0x12e   : > { %v607_v20 = vpop.f32.mrf.mxu0 }
 0x12f   : > { %5411 = vmatprep.mubr.msk.f32.mxu1 %vm700_vm11, %v607_v20 }
 0x130   : > { %v5360_v21 = vpop.f32.mrf.mxu0  ;;  %5412 = vmatmul.mubr.msk.f32.gmra.mxu1 %vm700_vm11, %v5357_v19 }
 0x132   : > { %v617_v22 = vpop.f32.mrf.mxu0 }
 0x133   : > { %5414 = vmatprep.mubr.msk.f32.mxu1 %vm700_vm11, %v617_v22 }
 0x134   : > { %v5363_v24 = vpop.f32.mrf.mxu0  ;;  %5415 = vmatmul.mubr.msk.f32.gmra.mxu1 %vm700_vm11, %v5360_v21 }
 0x136   : > { %v627_v25 = vpop.f32.mrf.mxu0 }
 0x137   : > { %5417 = vmatprep.mubr.msk.f32.mxu1 %vm700_vm11, %v627_v25 }
 0x138   : > { %v5366_v26 = vpop.f32.mrf.mxu0  ;;  %5418 = vmatmul.mubr.msk.f32.gmra.mxu1 %vm700_vm11, %v5363_v24 }
 0x13a   : > { %v637_v27 = vpop.f32.mrf.mxu0 }
 0x13b   : > { %5420 = vmatprep.mubr.msk.f32.mxu1 %vm700_vm11, %v637_v27  ;;  %v6960_v27 = vld [vmem:[%s9025_s3 + $0x4] sm:$0x1] }
 0x13c   : > { %v5369_v28 = vpop.f32.mrf.mxu0  ;;  %5421 = vmatmul.mubr.msk.f32.gmra.mxu1 %vm700_vm11, %v5366_v26  ;;  %9227 = vst [vmem:[#allocation44_spill] sm:$0xff] %v6960_v27 }
 0x13e   : > { %v647_v30 = vpop.f32.mrf.mxu0 }
 0x13f   : > { %5423 = vmatprep.mubr.msk.f32.mxu1 %vm700_vm11, %v647_v30 }
 0x140   : > { %v5372_v32 = vpop.f32.mrf.mxu0  ;;  %5424 = vmatmul.mubr.msk.f32.gmra.mxu1 %vm700_vm11, %v5369_v28 }
 0x142   : > { %v657_v34 = vpop.f32.mrf.mxu0 }
 0x143   : > { %5426 = vmatprep.mubr.msk.f32.mxu1 %vm700_vm11, %v657_v34 }
 0x144   : > { %v5375_v63 = vpop.f32.mrf.mxu0  ;;  %5427 = vmatmul.mubr.msk.f32.gmra.mxu1 %vm700_vm11, %v5372_v32 }
 0x146   : > { %v667_v1 = vpop.f32.mrf.mxu0 }
 0x147   : > { %5429 = vmatprep.mubr.msk.f32.mxu1 %vm700_vm11, %v667_v1 }
 0x148   : > { %v5378_v2 = vpop.f32.mrf.mxu0  ;;  %5430 = vmatmul.mubr.msk.f32.gmra.mxu1 %vm700_vm11, %v5375_v63 }
 0x14a   : > { %v677_v4 = vpop.f32.mrf.mxu0 }
 0x14b   : > { %5432 = vmatprep.mubr.msk.f32.mxu1 %vm700_vm11, %v677_v4 }
 0x14c   : > { %v5381_v5 = vpop.f32.mrf.mxu0  ;;  %5433 = vmatmul.mubr.msk.f32.gmra.mxu1 %vm700_vm11, %v5378_v2 }
 0x14e   : > { %v687_v6 = vpop.f32.mrf.mxu0 }
 0x14f   : > { %5435 = vmatprep.mubr.msk.f32.mxu1 %vm700_vm11, %v687_v6 }
 0x150   : > { %5436 = vmatmul.mubr.msk.f32.gmra.mxu1 %vm700_vm11, %v5381_v5 }
 0x151   : > { %4872 = vmatprep.mubr.f32.mxu1 %v6960_v27 }
 0x1d4   : > { %v5392_v7 = vpop.f32.mrf.mxu1 }
 0x1d5   : > { %v6949_v21 = vadd.f32 %v5392_v7, %v6946_v18 }
 0x1d6   : > { %v863_v8 = vpop.f32.mrf.mxu1 }
 0x1d7   : > { %9224 = vst [vmem:[#allocation41_spill] sm:$0xff] %v6949_v21  ;;  %v1055_v28 = vmul.f32 0.044715, %v6949_v21  ;;  %v6977_v6 = vadd.f32 %v6946_v18, %v863_v8 }
 0x1d8   : > { %v5395_v9 = vpop.f32.mrf.mxu1 }
 0x1d9   : > { %v6952_v24 = vadd.f32 %v5395_v9, %v6946_v18  ;;  %v1087_v5 = vmul.f32 %v1055_v28, %v6949_v21  ;;  %9231 = vst [vmem:[#allocation48_spill] sm:$0xff] %v6977_v6  ;;  %v1054_v27 = vmul.f32 0.044715, %v6977_v6 }
 0x1da   : > { %v873_v10 = vpop.f32.mrf.mxu1 }
 0x1db   : > { %9225 = vst [vmem:[#allocation42_spill] sm:$0xff] %v6952_v24  ;;  %v6955_v25 = vadd.f32 %v6946_v18, %v873_v10  ;;  %v1057_v34 = vmul.f32 0.044715, %v6952_v24  ;;  %v1086_v44 = vmul.f32 %v1054_v27, %v6977_v6 }
 0x1dc   : > { %v5398_v11 = vpop.f32.mrf.mxu1 }
 0x1dd   : > { %9226 = vst [vmem:[#allocation43_spill] sm:$0xff] %v6955_v25  ;;  %v6964_v30 = vadd.f32 %v5398_v11, %v6946_v18  ;;  %v1056_v1 = vmul.f32 0.044715, %v6955_v25  ;;  %v1089_v11 = vmul.f32 %v1057_v34, %v6952_v24  ;;  %v1118_v57 = vmul.f32 %v1086_v44, %v6977_v6 }
 0x1de   : > { %v883_v12 = vpop.f32.mrf.mxu1 }
 0x1df   : > { %9228 = vst [vmem:[#allocation45_spill] sm:$0xff] %v6964_v30  ;;  %v6969_v63 = vadd.f32 %v6946_v18, %v883_v12  ;;  %v1059_v7 = vmul.f32 0.044715, %v6964_v30 }
 0x1e0   : > { %v5401_v13 = vpop.f32.mrf.mxu1 }
 0x1e1   : > { %9229 = vst [vmem:[#allocation46_spill] sm:$0xff] %v6969_v63  ;;  %v6973_v2 = vadd.f32 %v5401_v13, %v6946_v18  ;;  %v1058_v12 = vmul.f32 0.044715, %v6969_v63  ;;  %v1088_v13 = vmul.f32 %v1056_v1, %v6955_v25  ;;  %v1091_v34 = vmul.f32 %v1059_v7, %v6964_v30 }
 0x1e2   : > { %v893_v16 = vpop.f32.mrf.mxu1  ;;  %v1121_v1 = vmul.f32 %v1089_v11, %v6952_v24 }
 0x1e3   : > { %9230 = vst [vmem:[#allocation47_spill] sm:$0xff] %v6973_v2  ;;  %v6981_v9 = vadd.f32 %v6946_v18, %v893_v16  ;;  %v1061_v28 = vmul.f32 0.044715, %v6973_v2  ;;  %v1119_v16 = vmul.f32 %v1087_v5, %v6949_v21  ;;  %v1120_v5 = vmul.f32 %v1088_v13, %v6955_v25 }
 0x1e4   : > { %v5404_v17 = vpop.f32.mrf.mxu1  ;;  %v1123_v11 = vmul.f32 %v1091_v34, %v6964_v30  ;;  %v1153_v43 = vadd.f32 %v1121_v1, %v6952_v24 }
 0x1e5   : > { %9232 = vst [vmem:[#allocation49_spill] sm:$0xff] %v6981_v9  ;;  %v6986_v0 = vadd.f32 %v5404_v17, %v6946_v18  ;;  %v1060_v14 = vmul.f32 0.044715, %v6981_v9  ;;  %v1093_v7 = vmul.f32 %v1061_v28, %v6973_v2 }
 0x1e6   : > { %v903_v19 = vpop.f32.mrf.mxu1  ;;  %v1155_v1 = vadd.f32 %v1123_v11, %v6964_v30  ;;  %v1185_v56 = vmul.f32 0.7978846, %v1153_v43 }
 0x1e7   : > { %9233 = vst [vmem:[#allocation50_spill] sm:$0xff] %v6986_v0  ;;  %v1063_v46 = vmul.f32 0.044715, %v6986_v0 }
 0x1e8   : > { %v5407_v20 = vpop.f32.mrf.mxu1  ;;  %v1187_v24 = vmul.f32 0.7978846, %v1155_v1 }
 0x1e9   : > { %v6991_v8 = vadd.f32 %v5407_v20, %v6946_v18  ;;  %v1090_v20 = vmul.f32 %v1058_v12, %v6969_v63  ;;  %v7019_v12 = vadd.f32 %v6946_v18, %v903_v19  ;;  %v1095_v27 = vmul.f32 %v1063_v46, %v6986_v0 }
 0x1ea   : > { %v913_v22 = vpop.f32.mrf.mxu1  ;;  %v1125_v19 = vmul.f32 %v1093_v7, %v6973_v2 }
 0x1eb   : > { %v7000_v17 = vadd.f32 %v6946_v18, %v913_v22  ;;  %v1065_v45 = vmul.f32 0.044715, %v6991_v8  ;;  %v1151_v22 = vadd.f32 %v1119_v16, %v6949_v21  ;;  %9234 = vst [vmem:[#allocation51_spill] sm:$0xff] %v7019_v12  ;;  %v1122_v16 = vmul.f32 %v1090_v20, %v6969_v63 }
 0x1ec   : > { %v5410_v26 = vpop.f32.mrf.mxu1  ;;  %v1062_v20 = vmul.f32 0.044715, %v7019_v12 }
 0x1ed   : > { %v7008_v61 = vadd.f32 %v5410_v26, %v6946_v18  ;;  %v1092_v26 = vmul.f32 %v1060_v14, %v6981_v9  ;;  %v1064_v59 = vmul.f32 0.044715, %v7000_v17  ;;  %v1097_v58 = vmul.f32 %v1065_v45, %v6991_v8 }
 0x1ee   : > { %v923_v32 = vpop.f32.mrf.mxu1  ;;  %v1183_v46 = vmul.f32 0.7978846, %v1151_v22  ;;  %v1154_v11 = vadd.f32 %v1122_v16, %v6969_v63  ;;  %v1157_v22 = vadd.f32 %v1125_v19, %v6973_v2 }
 0x1ef   : > { %v1067_v34 = vmul.f32 0.044715, %v7008_v61  ;;  %v7035_v14 = vadd.f32 %v6946_v18, %v923_v32  ;;  %v1124_v41 = vmul.f32 %v1092_v26, %v6981_v9  ;;  %v1096_v7 = vmul.f32 %v1064_v59, %v7000_v17 }
 0x1f0   : > { %v5413_v4 = vpop.f32.mrf.mxu1  ;;  %v1129_v26 = vmul.f32 %v1097_v58, %v6991_v8  ;;  %6104 = vtanh.f32 %v1183_v46  ;;  %v1186_v39 = vmul.f32 0.7978846, %v1154_v11  ;;  %v1189_v46 = vmul.f32 0.7978846, %v1157_v22 }
 0x1f1   : > { %v7024_v13 = vadd.f32 %v5413_v4, %v6946_v18  ;;  %v1152_v4 = vadd.f32 %v1120_v5, %v6955_v25  ;;  %v1127_v5 = vmul.f32 %v1095_v27, %v6986_v0  ;;  %v1099_v44 = vmul.f32 %v1067_v34, %v7008_v61 }
 0x1f2   : > { %v933_v10 = vpop.f32.mrf.mxu1  ;;  %v1066_v59 = vmul.f32 0.044715, %v7035_v14  ;;  %v1150_v27 = vadd.f32 %v1118_v57, %v6977_v6  ;;  %v1128_v34 = vmul.f32 %v1096_v7, %v7000_v17  ;;  %v1156_v58 = vadd.f32 %v1124_v41, %v6981_v9 }
 0x1f3   : > { %v1069_v45 = vmul.f32 0.044715, %v7024_v13  ;;  %v7047_v32 = vadd.f32 %v6946_v18, %v933_v10  ;;  %v1184_v25 = vmul.f32 0.7978846, %v1152_v4  ;;  %v1094_v10 = vmul.f32 %v1062_v20, %v7019_v12 }
 0x1f4   : > { %v6993_v23 = vpop.f32.mrf.mxu1  ;;  %v1159_v55 = vadd.f32 %v1127_v5, %v6986_v0  ;;  %v1131_v4 = vmul.f32 %v1099_v44, %v7008_v61  ;;  %6106 = vtanh.f32 %v1185_v56  ;;  %v1161_v1 = vadd.f32 %v1129_v26, %v6991_v8 }
 0x1f5   : > { %v1101_v16 = vmul.f32 %v1069_v45, %v7024_v13  ;;  %v1068_v43 = vmul.f32 0.044715, %v7047_v32  ;;  %v1098_v57 = vmul.f32 %v1066_v59, %v7035_v14  ;;  %6108 = vtanh.f32 %v1184_v25 }
 0x1f6   : > { %v7002_v62 = vpop.f32.mrf.mxu1  ;;  %v1126_v7 = vmul.f32 %v1094_v10, %v7019_v12  ;;  %6110 = vtanh.f32 %v1187_v24  ;;  %v1160_v5 = vadd.f32 %v1128_v34, %v7000_v17  ;;  %v1188_v44 = vmul.f32 0.7978846, %v1156_v58 }
 0x1f7   : > { %v1133_v45 = vmul.f32 %v1101_v16, %v7024_v13  ;;  %v1100_v41 = vmul.f32 %v1068_v43, %v7047_v32  ;;  %v1163_v56 = vadd.f32 %v1131_v4, %v7008_v61  ;;  %v1191_v11 = vmul.f32 0.7978846, %v1159_v55 }
 0x1f8   : > { %v7013_v60 = vpop.f32.mrf.mxu1  ;;  %6112 = vtanh.f32 %v1186_v39  ;;  %v7076_v26 = vmul.f32 0.7978846, %v1150_v27  ;;  %v1130_v22 = vmul.f32 %v1098_v57, %v7035_v14  ;;  %v7080_v59 = vmul.f32 0.5, %v6991_v8 }
 0x1f9   : > { %v1193_v24 = vmul.f32 0.7978846, %v1161_v1  ;;  %6114 = vtanh.f32 %v1189_v46  ;;  %v7084_v10 = vadd.f32 %v6993_v23, %v6946_v18  ;;  %v7090_v55 = vmul.f32 0.5, %v7008_v61 }
 0x1fa   : > { %v7026_v28 = vpop.f32.mrf.mxu1  ;;  %9235 = vst [vmem:[#allocation52_spill] sm:$0xff] %v7076_v26  ;;  %v7093_v39 = vadd.f32 %v1126_v7, %v7019_v12  ;;  %v1165_v27 = vadd.f32 %v1133_v45, %v7024_v13  ;;  %v1132_v8 = vmul.f32 %v1100_v41, %v7047_v32  ;;  %v1192_v43 = vmul.f32 0.7978846, %v1160_v5 }
 0x1fb   : > { %6116 = vtanh.f32 %v1188_v44  ;;  %v1195_v23 = vmul.f32 0.7978846, %v1163_v56  ;;  %v7101_v4 = vmul.f32 0.5, %v7035_v14  ;;  %v1162_v46 = vadd.f32 %v1130_v22, %v7035_v14 }
 0x1fc   : > { %v7037_v42 = vpop.f32.mrf.mxu1  ;;  %6118 = vtanh.f32 %v1191_v11  ;;  %v7111_v7 = vmul.f32 0.044715, %v7084_v10  ;;  %v7115_v45 = vadd.f32 %v6946_v18, %v7002_v62  ;;  %v1197_v44 = vmul.f32 0.7978846, %v1165_v27 }
 0x1fd   : > { %6120 = vtanh.f32 %v1193_v24  ;;  %v1164_v56 = vadd.f32 %v1132_v8, %v7047_v32 }
 0x1fe   : > { %v7049_v21 = vpop.f32.mrf.mxu1  ;;  %6122 = vtanh.f32 %v1192_v43 }
 0x1ff   : > { %6124 = vtanh.f32 %v1195_v23  ;;  %v7182_v9 = vadd.f32 %v6946_v18, %v7049_v21 }
 0x200   : > { %v7057_v40 = vpop.f32.mrf.mxu1  ;;  %6126 = vtanh.f32 %v1197_v44 }
 0x201   : > { %v7137_v24 = vadd.f32 %v7057_v40, %v6946_v18 }
 0x202   : > { %v7064_v19 = vpop.f32.mrf.mxu1 }
 0x204   : > { %v5428_v20 = vpop.f32.mrf.mxu1 }
 0x205   : > { %v7104_v61 = vadd.f32 %v5428_v20, %v6946_v18  ;;  %v7121_v20 = vpop.eup %6104 }
 0x206   : > { %v983_v6 = vpop.f32.mrf.mxu1  ;;  %9236 = vst [vmem:[#allocation53_spill] sm:$0xff] %v7121_v20 }
 0x207   : > { %v7107_v1 = vadd.f32 %v6946_v18, %v983_v6  ;;  %v7125_v6 = vadd.f32 %v7013_v60, %v6946_v18  ;;  %v1079_v60 = vmul.f32 0.044715, %v7104_v61 }
 0x208   : > { %v5431_v25 = vpop.f32.mrf.mxu1 }
 0x209   : > { %v7087_v34 = vadd.f32 %v5431_v25, %v6946_v18  ;;  %v7133_v25 = vpop.eup %6106  ;;  %v1078_v27 = vmul.f32 0.044715, %v7107_v1  ;;  %v1111_v38 = vmul.f32 %v1079_v60, %v7104_v61 }
 0x20a   : > { %v993_v16 = vpop.f32.mrf.mxu1  ;;  %9237 = vst [vmem:[#allocation54_spill] sm:$0xff] %v7133_v25  ;;  %v7143_v43 = vpop.eup %6108  ;;  %v7155_v25 = vadd.f32 %v7037_v42, %v6946_v18  ;;  %v1077_v42 = vmul.f32 0.044715, %v7137_v24 }
 0x20b   : > { %v7098_v58 = vadd.f32 %v6946_v18, %v993_v16  ;;  %v1081_v41 = vmul.f32 0.044715, %v7087_v34  ;;  %v7141_v16 = vmul.f32 0.7978846, %v1162_v46  ;;  %9238 = vst [vmem:[#allocation55_spill] sm:$0xff] %v7143_v43  ;;  %v7151_v40 = vpop.eup %6110  ;;  %v7159_v46 = vadd.f32 %v6946_v18, %v7064_v19 }
 0x20c   : > { %v5434_v57 = vpop.f32.mrf.mxu1  ;;  %9239 = vst [vmem:[#allocation56_spill] sm:$0xff] %v7151_v40  ;;  %v7167_v54 = vpop.eup %6112  ;;  %v1110_v19 = vmul.f32 %v1078_v27, %v7107_v1  ;;  %v1109_v37 = vmul.f32 %v1077_v42, %v7137_v24 }
 0x20d   : > { %v7119_v5 = vadd.f32 %v5434_v57, %v6946_v18  ;;  %v1080_v11 = vmul.f32 0.044715, %v7098_v58  ;;  %v1113_v57 = vmul.f32 %v1081_v41, %v7087_v34  ;;  %v1196_v41 = vmul.f32 0.7978846, %v1164_v56  ;;  %9240 = vst [vmem:[#allocation57_spill] sm:$0xff] %v7167_v54  ;;  %v7173_v56 = vpop.eup %6114 }
 0x20e   : > { %v1003_v14 = vpop.f32.mrf.mxu1  ;;  %9241 = vst [vmem:[#allocation58_spill] sm:$0xff] %v7173_v56  ;;  %v1075_v54 = vmul.f32 0.044715, %v7155_v25  ;;  %v1076_v60 = vmul.f32 0.044715, %v7159_v46  ;;  %v1143_v56 = vmul.f32 %v1111_v38, %v7104_v61 }
 0x20f   : > { %v1083_v62 = vmul.f32 0.044715, %v7119_v5  ;;  %v7131_v22 = vadd.f32 %v6946_v18, %v1003_v14  ;;  %6128 = vtanh.f32 %v1196_v41  ;;  %v1074_v41 = vmul.f32 0.044715, %v7182_v9 }
 0x210   : > { %v5437_v8 = vpop.f32.mrf.mxu1  ;;  %v1175_v0 = vadd.f32 %v1143_v56, %v7104_v61 }
 0x211   : > { %v1115_v14 = vmul.f32 %v1083_v62, %v7119_v5  ;;  %v1082_v23 = vmul.f32 0.044715, %v7131_v22  ;;  %v7149_v20 = vadd.f32 %v5437_v8, %v6946_v18  ;;  %v1112_v62 = vmul.f32 %v1080_v11, %v7098_v58 }
 0x212   : > { %v1013_v43 = vpop.f32.mrf.mxu1 }
 0x213   : > { %v1114_v63 = vmul.f32 %v1082_v23, %v7131_v22  ;;  %v1085_v8 = vmul.f32 0.044715, %v7149_v20  ;;  %v7165_v30 = vadd.f32 %v6946_v18, %v1013_v43  ;;  %v1147_v44 = vmul.f32 %v1115_v14, %v7119_v5  ;;  %v7186_v14 = vpop.eup %6116 }
 0x214   : > { %v1145_v43 = vmul.f32 %v1113_v57, %v7087_v34  ;;  %9242 = vst [vmem:[#allocation59_spill] sm:$0xff] %v7186_v14  ;;  %v1144_v57 = vmul.f32 %v1112_v62, %v7098_v58  ;;  %v7192_v53 = vpop.eup %6118  ;;  %v1073_v62 = vmul.f32 0.044715, %v7125_v6  ;;  %v7205_v14 = vadd.f32 %v6946_v18, %v7026_v28 }
 0x215   : > { %v1117_v11 = vmul.f32 %v1085_v8, %v7149_v20  ;;  %v1084_v23 = vmul.f32 0.044715, %v7165_v30  ;;  %v1146_v40 = vmul.f32 %v1114_v63, %v7131_v22  ;;  %v1179_v27 = vadd.f32 %v1147_v44, %v7119_v5  ;;  %v7196_v12 = vpop.eup %6120 }
 0x216   : > { %v7208_v38 = vpop.eup %6122  ;;  %v1141_v18 = vmul.f32 %v1109_v37, %v7137_v24  ;;  %v1207_v37 = vmul.f32 0.7978846, %v1175_v0 }
 0x217   : > { %v1116_v8 = vmul.f32 %v1084_v23, %v7165_v30  ;;  %v1149_v2 = vmul.f32 %v1117_v11, %v7149_v20  ;;  %v1178_v63 = vadd.f32 %v1146_v40, %v7131_v22  ;;  %v1211_v21 = vmul.f32 0.7978846, %v1179_v27  ;;  %v6125_v26 = vpop.eup %6124 }
 0x218   : > { %v1177_v11 = vadd.f32 %v1145_v43, %v7087_v34  ;;  %v1142_v40 = vmul.f32 %v1110_v19, %v7107_v1  ;;  %v1108_v27 = vmul.f32 %v1076_v60, %v7159_v46  ;;  %v1176_v43 = vadd.f32 %v1144_v57, %v7098_v58  ;;  %v6127_v57 = vpop.eup %6126 }
 0x219   : > { %v1181_v44 = vadd.f32 %v1149_v2, %v7149_v20  ;;  %v1148_v23 = vmul.f32 %v1116_v8, %v7165_v30  ;;  %v1210_v42 = vmul.f32 0.7978846, %v1178_v63  ;;  %v1107_v19 = vmul.f32 %v1075_v54, %v7155_v25 }
 0x21a   : > { %6130 = vtanh.f32 %v1211_v21  ;;  %v1209_v63 = vmul.f32 0.7978846, %v1177_v11  ;;  %v1174_v52 = vadd.f32 %v1142_v40, %v7107_v1  ;;  %v1070_v60 = vmul.f32 0.044715, %v7115_v45 }
 0x21b   : > { %v1213_v2 = vmul.f32 0.7978846, %v1181_v44  ;;  %v1180_v8 = vadd.f32 %v1148_v23, %v7165_v30  ;;  %v1072_v44 = vmul.f32 0.044715, %v7205_v14  ;;  %v1106_v23 = vmul.f32 %v1074_v41, %v7182_v9 }
 0x21c   : > { %v1105_v54 = vmul.f32 %v1073_v62, %v7125_v6  ;;  %v1208_v21 = vmul.f32 0.7978846, %v1176_v43  ;;  %v1140_v56 = vmul.f32 %v1108_v27, %v7159_v46  ;;  %v1190_v11 = vmul.f32 0.7978846, %v7093_v39 }
 0x21d   : > { %6132 = vtanh.f32 %v1213_v2  ;;  %v1212_v28 = vmul.f32 0.7978846, %v1180_v8  ;;  %v1139_v40 = vmul.f32 %v1107_v19, %v7155_v25  ;;  %v1037_v2 = vmul.f32 0.5, %v7024_v13  ;;  %v6129_v19 = vpop.eup %6128 }
 0x21e   : > { %6134 = vtanh.f32 %v1210_v42  ;;  %v1206_v8 = vmul.f32 0.7978846, %v1174_v52  ;;  %v1173_v41 = vadd.f32 %v1141_v18, %v7137_v24  ;;  %v1103_v62 = vmul.f32 %v7111_v7, %v7084_v10 }
 0x21f   : > { %6136 = vtanh.f32 %v1212_v28  ;;  %v1102_v42 = vmul.f32 %v1070_v60, %v7115_v45  ;;  %v1104_v27 = vmul.f32 %v1072_v44, %v7205_v14  ;;  %v1172_v0 = vadd.f32 %v1140_v56, %v7159_v46 }
 0x220   : > { %6138 = vtanh.f32 %v7141_v16  ;;  %v1138_v16 = vmul.f32 %v1106_v23, %v7182_v9  ;;  %v1137_v39 = vmul.f32 %v1105_v54, %v7125_v6  ;;  %v1171_v13 = vadd.f32 %v1139_v40, %v7155_v25 }
 0x221   : > { %6140 = vtanh.f32 %v1209_v63  ;;  %v9107_v52 = vmov 0.0   ;;  %v1261_v18 = vadd.f32 1.0, %v6127_v57  ;;  %v1205_v28 = vmul.f32 0.7978846, %v1173_v41 }
 0x222   : > { %6142 = vtanh.f32 %v1208_v21  ;;  %v4538_v7 = vsel %vm337_vm5, 1.0, %v9107_v52  ;;  %v4554_v43 = vsel %vm353_vm15, 1.0, %v9107_v52  ;;  %v1170_v60 = vadd.f32 %v1138_v16, %v7182_v9 }
 0x223   : > { %6144 = vtanh.f32 %v1207_v37  ;;  %v5880_v63 = vpack.i.bf16 %v4538_v7, %v4554_v43  ;;  %v1136_v44 = vmul.f32 %v1104_v27, %v7205_v14  ;;  %v4539_v23 = vsel %vm338_vm8, 1.0, %v9107_v52 }
 0x224   : > { %6146 = vtanh.f32 %v1206_v8  ;;  %v4555_v54 = vsel %vm354_vm14, 1.0, %v9107_v52  ;;  %v1036_v21 = vmul.f32 0.5, %v7047_v32  ;;  %v1204_v57 = vmul.f32 0.7978846, %v1172_v0 }
 0x225   : > { %6148 = vtanh.f32 %v1190_v11  ;;  %5881 = vxpose.xlu0.b32.start [1/16] %v5880_v63, 128  ;;  %v5882_v56 = vpack.i.bf16 %v4539_v23, %v4555_v54  ;;  %v1259_v37 = vadd.f32 1.0, %v6125_v26  ;;  %v7255_v40 = vadd.f32 1.0, %v7196_v12 }
 0x226   : > { %v1203_v8 = vmul.f32 0.7978846, %v1171_v13  ;;  %v1169_v41 = vadd.f32 %v1137_v39, %v7125_v6  ;;  %v1293_v16 = vmul.f32 %v1261_v18, %v1037_v2  ;;  %v1260_v7 = vadd.f32 1.0, %v6129_v19 }
 0x227   : > { %v6131_v27 = vpop.eup %6130  ;;  %6150 = vtanh.f32 %v1205_v28  ;;  %v1135_v43 = vmul.f32 %v1103_v62, %v7084_v10  ;;  %v1053_v32 = vmul.f32 0.5, %v7149_v20  ;;  %v1202_v11 = vmul.f32 0.7978846, %v1170_v60 }
 0x228   : > { %v1168_v0 = vadd.f32 %v1136_v44, %v7205_v14  ;;  %v1134_v26 = vmul.f32 %v1102_v42, %v7115_v45  ;;  %6152 = vtanh.f32 %v1204_v57  ;;  %v9243_v13 = vmov 0.0  }
 0x229   : > { %5883 = vxpose.xlu0.b32.cont [2/16] %v5882_v56, 128  ;;  %v4540_v2 = vsel %vm339_vm9, 1.0, %v9243_v13  ;;  %v4556_v62 = vsel %vm355_vm10, 1.0, %v9243_v13  ;;  %v1052_v39 = vmul.f32 0.5, %v7165_v30  ;;  %v1051_v19 = vmul.f32 0.5, %v7119_v5  ;;  %4244 = vst [vmem:[%s7762_s26 + $0x6] sm:$0x1] %v9243_v13 }
 0x22a   : > { %v6133_v52 = vpop.eup %6132  ;;  %6154 = vtanh.f32 %v1203_v8  ;;  %v1201_v42 = vmul.f32 0.7978846, %v1169_v41  ;;  %v1275_v60 = vadd.f32 1.0, %v6131_v27  ;;  %v1167_v44 = vadd.f32 %v1135_v43, %v7084_v10 }
 0x22b   : > { %v6135_v63 = vpop.eup %6134  ;;  %v1277_v12 = vadd.f32 1.0, %v6133_v52  ;;  %6156 = vtanh.f32 %v1202_v11  ;;  %v1200_v54 = vmul.f32 0.7978846, %v1168_v0  ;;  %v1166_v57 = vadd.f32 %v1134_v26, %v7115_v45 }
 0x22c   : > { %v6137_v20 = vpop.eup %6136  ;;  %v5884_v56 = vpack.i.bf16 %v4540_v2, %v4556_v62  ;;  %v1274_v30 = vadd.f32 1.0, %v6135_v63  ;;  %v4541_v5 = vsel %vm340_vm12, 1.0, %v9243_v13  ;;  %v4557_v8 = vsel %vm356_vm4, 1.0, %v9243_v13 }
 0x22d   : > { %v6139_v52 = vpop.eup %6138  ;;  %v1309_v18 = vmul.f32 %v1277_v12, %v1053_v32  ;;  %v1276_v28 = vadd.f32 1.0, %v6137_v20  ;;  %v1292_v27 = vmul.f32 %v1260_v7, %v1036_v21  ;;  %v1291_v43 = vmul.f32 %v1259_v37, %v7090_v55 }
 0x22e   : > { %v6141_v23 = vpop.eup %6140  ;;  %v1050_v32 = vmul.f32 0.5, %v7131_v22  ;;  %v1258_v11 = vadd.f32 1.0, %v6139_v52  ;;  %v1307_v26 = vmul.f32 %v1275_v60, %v1051_v19  ;;  %6158 = vtanh.f32 %v1201_v42  ;;  %5885 = vxpose.xlu0.b32.cont [3/16] %v5884_v56, 128  ;;  %v9250_v56 = vld [vmem:[#allocation52_spill] sm:$0xff] }
 0x22f   : > { %4840 = vmatprep.subr.mxu1 %v1309_v18  ;;  %4874 = vmatprep.subr.mxu0 %v1309_v18  ;;  %v1308_v49 = vmul.f32 %v1276_v28, %v1052_v39  ;;  %v6143_v41 = vpop.eup %6142  ;;  %v1273_v63 = vadd.f32 1.0, %v6141_v23  ;;  %v1199_v12 = vmul.f32 0.7978846, %v1167_v44  ;;  %v1049_v62 = vmul.f32 0.5, %v7087_v34 }
 0x230   : > { %4841 = vmatpush3.xpose.msra.mxu1 %v1293_v16  ;;  %4875 = vmatpush3.msra.mxu0 %v1293_v16  ;;  %v6145_v0 = vpop.eup %6144  ;;  %6160 = vtanh.f32 %v1200_v54  ;;  %v1198_v20 = vmul.f32 0.7978846, %v1166_v57  ;;  %v5886_v21 = vpack.i.bf16 %v4541_v5, %v4557_v8  ;;  %v1306_v55 = vmul.f32 %v1274_v30, %v1050_v32 }
 0x231   : > { %4842 = vmatprep.subr.mxu1 %v1308_v49  ;;  %4876 = vmatprep.subr.mxu0 %v1308_v49  ;;  %v6147_v2 = vpop.eup %6146  ;;  %v1272_v37 = vadd.f32 1.0, %v6143_v41  ;;  %vm9244_vm5 = vcmp.eq.s32.totalorder %v6584_v35, %v6544_v15  ;;  %v4558_v22 = vsel %vm9245_vm6, 1.0, %v9243_v13  ;;  %v1290_v34 = vmul.f32 %v1258_v11, %v7101_v4  ;;  %v9251_v41 = vld [vmem:[#allocation51_spill] sm:$0xff] }
 0x232   : > { %4877 = vmatpush3.msra.mxu0 %v1292_v27  ;;  %v4542_v49 = vsel %vm9244_vm5, 1.0, %v9243_v13  ;;  %v6149_v16 = vpop.eup %6148  ;;  %v1032_v7 = vmul.f32 0.5, %v7000_v17  ;;  %v1256_v39 = vadd.f32 1.0, %v7208_v38  ;;  %v1255_v19 = vadd.f32 1.0, %v7192_v53  ;;  %5887 = vxpose.xlu0.b32.cont [4/16] %v5886_v21, 128  ;;  %v9255_v21 = vld [vmem:[#allocation31_spill] sm:$0xff] }
 0x233   : > { %4878 = vmatprep.subr.mxu0 %v1307_v26  ;;  %v1305_v42 = vmul.f32 %v1273_v63, %v1049_v62  ;;  %v1048_v52 = vmul.f32 0.5, %v7098_v58  ;;  %v1271_v18 = vadd.f32 1.0, %v6145_v0  ;;  %6162 = vtanh.f32 %v1199_v12  ;;  %v9247_v58 = vld [vmem:[#allocation30_spill] sm:$0xff] }
 0x234   : > { %4843 = vmatpush3.xpose.msra.mxu1 %v1292_v27  ;;  %4879 = vmatpush3.msra.mxu0 %v1291_v43  ;;  %v6151_v28 = vpop.eup %6150  ;;  %v1289_v60 = vmul.f32 %v7255_v40, %v7080_v59  ;;  %v1047_v4 = vmul.f32 0.5, %v7104_v61  ;;  %v1270_v44 = vadd.f32 1.0, %v6147_v2  ;;  %v5888_v17 = vpack.i.bf16 %v4542_v49, %v4558_v22  ;;  %v9249_v61 = vld [vmem:[#allocation50_spill] sm:$0xff]  ;;  %v9258_v22 = vld [vmem:[#allocation59_spill] sm:$0xff] }
 0x235   : > { %4844 = vmatprep.subr.mxu1 %v1307_v26  ;;  %4880 = vmatprep.subr.mxu0 %v1306_v55  ;;  %v1304_v38 = vmul.f32 %v1272_v37, %v1048_v52  ;;  %6164 = vtanh.f32 %v1198_v20  ;;  %vm9246_vm8 = vcmp.eq.s32.totalorder %v6599_v36, %v6544_v15  ;;  %vm9248_vm9 = vcmp.eq.s32.totalorder %v9247_v58, %v6544_v15  ;;  %v6153_v54 = vpop.eup %6152  ;;  %v9252_v0 = vld [vmem:[#allocation58_spill] sm:$0xff]  ;;  %v9257_v37 = vld [vmem:[#allocation47_spill] sm:$0xff] }
 0x236   : > { %4881 = vmatpush3.msra.mxu0 %v1290_v34  ;;  %v4543_v53 = vsel %vm9246_vm8, 1.0, %v9243_v13  ;;  %v4559_v23 = vsel %vm9248_vm9, 1.0, %v9243_v13  ;;  %v7309_v59 = vmul.f32 %v1256_v39, %v1032_v7  ;;  %v1031_v40 = vmul.f32 0.5, %v9249_v61  ;;  %5889 = vxpose.xlu0.b32.cont [5/16] %v5888_v17, 128 }
 0x237   : > { %4882 = vmatprep.subr.mxu0 %v1305_v42  ;;  %v1254_v57 = vadd.f32 1.0, %v6149_v16  ;;  %6166 = vtanh.f32 %v9250_v56  ;;  %v6155_v30 = vpop.eup %6154  ;;  %v7313_v5 = vmul.f32 %v1271_v18, %v1047_v4  ;;  %v1046_v8 = vmul.f32 0.5, %v7107_v1  ;;  %v9253_v1 = vld [vmem:[#allocation15_spill] sm:$0xff]  ;;  %v9265_v56 = vld [vmem:[#allocation45_spill] sm:$0xff] }
 0x238   : > { %4845 = vmatpush3.xpose.msra.mxu1 %v1291_v43  ;;  %4883 = vmatpush3.msra.mxu0 %v1289_v60  ;;  %v1030_v27 = vmul.f32 0.5, %v9251_v41  ;;  %v1269_v32 = vadd.f32 1.0, %v6151_v28  ;;  %v7318_v43 = vmul.f32 %v1255_v19, %v1031_v40  ;;  %v1045_v11 = vmul.f32 0.5, %v7137_v24  ;;  %v6157_v12 = vpop.eup %6156  ;;  %v9259_v19 = vld [vmem:[#allocation49_spill] sm:$0xff]  ;;  %v9263_v40 = vld [vmem:[#allocation32_spill] sm:$0xff] }
 0x239   : > { %4846 = vmatprep.subr.mxu1 %v1306_v55  ;;  %4884 = vmatprep.subr.mxu0 %v1304_v38  ;;  %v1253_v26 = vadd.f32 1.0, %v9252_v0  ;;  %v5890_v63 = vpack.i.bf16 %v4543_v53, %v4559_v23  ;;  %v7323_v2 = vmul.f32 %v1270_v44, %v1046_v8  ;;  %v1268_v62 = vadd.f32 1.0, %v6153_v54  ;;  %v9260_v44 = vld [vmem:[#allocation56_spill] sm:$0xff]  ;;  %v9266_v8 = vld [vmem:[#allocation57_spill] sm:$0xff] }
 0x23a   : > { %4885 = vmatpush3.msra.mxu0 %v7309_v59  ;;  %vm9254_vm12 = vcmp.eq.s32.totalorder %v9253_v1, %v6544_v15  ;;  %vm9256_vm4 = vcmp.eq.s32.totalorder %v9255_v21, %v6544_v15  ;;  %v7334_v55 = vmul.f32 %v1254_v57, %v1030_v27  ;;  %v1029_v49 = vmul.f32 0.5, %v9257_v37  ;;  %v9261_v54 = vld [vmem:[#allocation16_spill] sm:$0xff] }
 0x23b   : > { %4886 = vmatprep.subr.mxu0 %v7313_v5  ;;  %v4544_v20 = vsel %vm9254_vm12, 1.0, %v9243_v13  ;;  %v4560_v24 = vsel %vm9256_vm4, 1.0, %v9243_v13  ;;  %v1252_v16 = vadd.f32 1.0, %v9258_v22  ;;  %v7339_v7 = vmul.f32 %v1269_v32, %v1045_v11  ;;  %v6159_v28 = vpop.eup %6158  ;;  %5891 = vxpose.xlu0.b32.cont [6/16] %v5890_v63, 128  ;;  %v9267_v11 = vld [vmem:[#allocation46_spill] sm:$0xff]  ;;  %v9271_v22 = vld [vmem:[#allocation33_spill] sm:$0xff] }
 0x23c   : > { %4847 = vmatpush3.xpose.msra.mxu1 %v1290_v34  ;;  %4887 = vmatpush3.msra.mxu0 %v7318_v43  ;;  %v1044_v39 = vmul.f32 0.5, %v7159_v46  ;;  %v1028_v52 = vmul.f32 0.5, %v9259_v19  ;;  %v1267_v18 = vadd.f32 1.0, %v6155_v30  ;;  %v7344_v34 = vmul.f32 %v1253_v26, %v1029_v49  ;;  %v9273_v19 = vld [vmem:[#allocation42_spill] sm:$0xff] }
 0x23d   : > { %4848 = vmatprep.subr.mxu1 %v1305_v42  ;;  %4888 = vmatprep.subr.mxu0 %v7323_v2  ;;  %v1043_v4 = vmul.f32 0.5, %v7155_v25  ;;  %v1251_v17 = vadd.f32 1.0, %v9260_v44  ;;  %v5892_v42 = vpack.i.bf16 %v4544_v20, %v4560_v24  ;;  %v6161_v53 = vpop.eup %6160  ;;  %v1266_v46 = vadd.f32 1.0, %v6157_v12 }
 0x23e   : > { %4889 = vmatpush3.msra.mxu0 %v7334_v55  ;;  %v7349_v23 = vmul.f32 %v1268_v62, %v1044_v39  ;;  %vm9262_vm14 = vcmp.eq.s32.totalorder %v9261_v54, %v6544_v15  ;;  %vm9264_vm15 = vcmp.eq.s32.totalorder %v9263_v40, %v6544_v15  ;;  %v7360_v57 = vmul.f32 %v1252_v16, %v1028_v52  ;;  %v9268_v62 = vld [vmem:[#allocation54_spill] sm:$0xff] }
 0x23f   : > { %4890 = vmatprep.subr.mxu0 %v7339_v7  ;;  %v4545_v61 = vsel %vm9262_vm14, 1.0, %v9243_v13  ;;  %v4561_v25 = vsel %vm9264_vm15, 1.0, %v9243_v13  ;;  %v1027_v30 = vmul.f32 0.5, %v9265_v56  ;;  %v1250_v41 = vadd.f32 1.0, %v9266_v8  ;;  %5893 = vxpose.xlu0.b32.cont [7/16] %v5892_v42, 128  ;;  %v9275_v42 = vld [vmem:[#allocation43_spill] sm:$0xff] }
 0x240   : > { %4849 = vmatpush3.xpose.msra.mxu1 %v1289_v60  ;;  %4891 = vmatpush3.msra.mxu0 %v7344_v34  ;;  %v7365_v27 = vmul.f32 %v1267_v18, %v1043_v4  ;;  %v1042_v32 = vmul.f32 0.5, %v7182_v9  ;;  %v1026_v0 = vmul.f32 0.5, %v9267_v11  ;;  %v1265_v26 = vadd.f32 1.0, %v6159_v28  ;;  %v6163_v63 = vpop.eup %6162  ;;  %v9269_v9 = vld [vmem:[#allocation17_spill] sm:$0xff]  ;;  %v9274_v18 = vld [vmem:[#allocation55_spill] sm:$0xff] }
 0x241   : > { %4850 = vmatprep.subr.mxu1 %v1304_v38  ;;  %4892 = vmatprep.subr.mxu0 %v7349_v23  ;;  %v7370_v60 = vmul.f32 %v1251_v17, %v1027_v30  ;;  %v1041_v12 = vmul.f32 0.5, %v7125_v6  ;;  %v1249_v20 = vadd.f32 1.0, %v9268_v62  ;;  %v5894_v38 = vpack.i.bf16 %v4545_v61, %v4561_v25  ;;  %v9276_v25 = vld [vmem:[#allocation53_spill] sm:$0xff] }
 0x242   : > { %4893 = vmatpush3.msra.mxu0 %v7360_v57  ;;  %v7375_v24 = vmul.f32 %v1266_v46, %v1042_v32  ;;  %v1264_v37 = vadd.f32 1.0, %v6161_v53  ;;  %vm9270_vm10 = vcmp.eq.s32.totalorder %v9269_v9, %v6544_v15  ;;  %vm9272_vm7 = vcmp.eq.s32.totalorder %v9271_v22, %v6544_v15  ;;  %v6165_v6 = vpop.eup %6164  ;;  %v9279_v32 = vld [vmem:[#allocation34_spill] sm:$0xff] }
 0x243   : > { %4894 = vmatprep.subr.mxu0 %v7365_v27  ;;  %v4546_v49 = vsel %vm9270_vm10, 1.0, %v9243_v13  ;;  %v4562_v16 = vsel %vm9272_vm7, 1.0, %v9243_v13  ;;  %v7387_v39 = vmul.f32 %v1250_v41, %v1026_v0  ;;  %v1025_v52 = vmul.f32 0.5, %v9273_v19  ;;  %5895 = vxpose.xlu0.b32.cont [8/16] %v5894_v38, 128  ;;  %v9277_v41 = vld [vmem:[#allocation18_spill] sm:$0xff]  ;;  %v9281_v0 = vld [vmem:[#allocation41_spill] sm:$0xff]  ;;  %v9282_v38 = vld [vmem:[#allocation48_spill] sm:$0xff] }
 0x244   : > { %4851 = vmatpush3.xpose.msra.mxu1 %v7309_v59  ;;  %4895 = vmatpush3.msra.mxu0 %v7370_v60  ;;  %v1248_v28 = vadd.f32 1.0, %v9274_v18  ;;  %v6167_v4 = vpop.eup %6166  ;;  %v7393_v44 = vmul.f32 %v1265_v26, %v1041_v12  ;;  %v1040_v17 = vmul.f32 0.5, %v7205_v14  ;;  %v1024_v53 = vmul.f32 0.5, %v9275_v42  ;;  %v9285_v19 = vld [vmem:[#allocation35_spill] sm:$0xff]  ;;  %v9287_v18 = vld [vmem:[#allocation20_spill] sm:$0xff] }
 0x245   : > { %4852 = vmatprep.subr.mxu1 %v7313_v5  ;;  %4896 = vmatprep.subr.mxu0 %v7375_v24  ;;  %v1263_v59 = vadd.f32 1.0, %v6163_v63  ;;  %v7398_v46 = vmul.f32 %v1249_v20, %v1025_v52  ;;  %v1039_v61 = vmul.f32 0.5, %v7084_v10  ;;  %v1247_v56 = vadd.f32 1.0, %v9276_v25  ;;  %v7435_v42 = vld [vmem:[#allocation2 + $0x18] sm:$0xff] }
 0x246   : > { %4897 = vmatpush3.msra.mxu0 %v7387_v39  ;;  %v5896_v30 = vpack.i.bf16 %v4546_v49, %v4562_v16  ;;  %v1296_v5 = vmul.f32 %v1264_v37, %v1040_v17  ;;  %v1262_v8 = vadd.f32 1.0, %v6165_v6  ;;  %vm9278_vm3 = vcmp.eq.s32.totalorder %v9277_v41, %v6544_v15  ;;  %v9283_v16 = vld [vmem:[#allocation19_spill] sm:$0xff] }
 0x247   : > { %4898 = vmatprep.subr.mxu0 %v7393_v44  ;;  %v4547_v14 = vsel %vm9278_vm3, 1.0, %v9243_v13  ;;  %vm9280_vm2 = vcmp.eq.s32.totalorder %v9279_v32, %v6544_v15  ;;  %v1280_v10 = vmul.f32 %v1248_v28, %v1024_v53  ;;  %v1023_v26 = vmul.f32 0.5, %v9281_v0 }
 0x248   : > { %v4563_v11 = vsel %vm9280_vm2, 1.0, %v9243_v13  ;;  %4853 = vmatpush3.xpose.msra.mxu1 %v7318_v43  ;;  %4899 = vmatpush3.msra.mxu0 %v7398_v46  ;;  %v1246_v63 = vadd.f32 1.0, %v6167_v4  ;;  %v1295_v12 = vmul.f32 %v1263_v59, %v1039_v61  ;;  %v1038_v62 = vmul.f32 0.5, %v7115_v45  ;;  %v9289_v4 = vld [vmem:[#allocation36_spill] sm:$0xff]  ;;  %v9293_v59 = vld [vmem:[#allocation37_spill] sm:$0xff] }
 0x249   : > { %4854 = vmatprep.subr.mxu1 %v7323_v2  ;;  %4900 = vmatprep.subr.mxu0 %v1296_v5  ;;  %v1279_v20 = vmul.f32 %v1247_v56, %v1023_v26  ;;  %v1022_v37 = vmul.f32 0.5, %v9282_v38  ;;  %v5898_v49 = vpack.i.bf16 %v4547_v14, %v4563_v11  ;;  %vm9284_vm5 = vcmp.eq.s32.totalorder %v9283_v16, %v6544_v15  ;;  %v9297_v56 = vld [vmem:[#allocation38_spill] sm:$0xff]  ;;  %v9300_v14 = vld [vmem:[#allocation39_spill] sm:$0xff]  ;;  %v9303_v26 = vld [vmem:[#allocation40_spill] sm:$0xff] }
 0x24a   : > { %4901 = vmatpush3.msra.mxu0 %v1280_v10  ;;  %5897 = vxpose.xlu0.b32.cont [9/16] %v5896_v30, 128  ;;  %v1294_v43 = vmul.f32 %v1262_v8, %v1038_v62  ;;  %v4548_v6 = vsel %vm9284_vm5, 1.0, %v9243_v13  ;;  %vm9286_vm6 = vcmp.eq.s32.totalorder %v9285_v19, %v6544_v15  ;;  %vm9288_vm8 = vcmp.eq.s32.totalorder %v9287_v18, %v6544_v15  ;;  %v6333_v62 = vld [vmem:[%s6529_s13] sm:$0x7] }
 0x24b   : > { %4902 = vmatprep.subr.mxu0 %v1295_v12  ;;  %v4564_v2 = vsel %vm9286_vm6, 1.0, %v9243_v13  ;;  %v1278_v45 = vmul.f32 %v1246_v63, %v1022_v37  ;;  %v4549_v28 = vsel %vm9288_vm8, 1.0, %v9243_v13  ;;  %vm9290_vm9 = vcmp.eq.s32.totalorder %v9289_v4, %v6544_v15  ;;  %v6337_v37 = vld [vmem:[%s6534_s16 + $0x60] sm:$0xff] }
 0x24c   : > { %4855 = vmatpush3.xpose.msra.mxu1 %v7334_v55  ;;  %4903 = vmatpush3.msra.mxu0 %v1279_v20  ;;  %v5900_v52 = vpack.i.bf16 %v4548_v6, %v4564_v2  ;;  %v4565_v17 = vsel %vm9290_vm9, 1.0, %v9243_v13  ;;  %vm9294_vm4 = vcmp.eq.s32.totalorder %v9293_v59, %v6544_v15  ;;  %v4567_v30 = vsel %vm366_vm0, 1.0, %v9243_v13  ;;  %v6340_v6 = vld [vmem:[%s6534_s16 + $0x48] sm:$0xff]  ;;  %v6341_v2 = vld [vmem:[%s6534_s16 + $0x40] sm:$0xff] }
 0x24d   : > { %4856 = vmatprep.subr.mxu1 %v7339_v7  ;;  %4904 = vmatprep.subr.mxu0 %v1294_v43  ;;  %v5902_v55 = vpack.i.bf16 %v4549_v28, %v4565_v17  ;;  %v9291_v7 = vld [vmem:[#allocation21_spill] sm:$0xff]  ;;  %v4566_v61 = vsel %vm9294_vm4, 1.0, %v9243_v13  ;;  %v4568_v11 = vsel %vm367_vm1, 1.0, %v9243_v13  ;;  %v4569_v63 = vsel %vm368_vm13, 1.0, %v9243_v13  ;;  %v6345_v17 = vld [vmem:[%s6534_s16 + $0x20] sm:$0xff] }
 0x24e   : > { %4905 = vmatpush3.msra.mxu0 %v1278_v45  ;;  %5899 = vxpose.xlu0.b32.cont [10/16] %v5898_v49, 128  ;;  %vm9292_vm12 = vcmp.eq.s32.totalorder %v9291_v7, %v6544_v15  ;;  %v6338_v49 = vld [vmem:[%s6534_s16 + $0x58] sm:$0xff]  ;;  %v6344_v28 = vld [vmem:[%s6534_s16 + $0x28] sm:$0xff] }
 0x24f   : > { %5518 = vmatprep.subr.mxu0 %v7435_v42  ;;  %v4550_v53 = vsel %vm9292_vm12, 1.0, %v9243_v13 }
 0x250   : > { %4857 = vmatpush3.xpose.msra.mxu1 %v7344_v34  ;;  %v5904_v34 = vpack.i.bf16 %v4550_v53, %v4566_v61  ;;  %v6347_v53 = vld [vmem:[%s6534_s16 + $0x10] sm:$0xff]  ;;  %v6348_v61 = vld [vmem:[%s6534_s16 + $0x8] sm:$0xff] }
 0x251   : > { %4858 = vmatprep.subr.mxu1 %v7349_v23  ;;  %v9295_v23 = vld [vmem:[#allocation22_spill] sm:$0xff] }
 0x252   : > { %5901 = vxpose.xlu0.b32.cont [11/16] %v5900_v52, 128  ;;  %vm9296_vm14 = vcmp.eq.s32.totalorder %v9295_v23, %v6544_v15  ;;  %v6343_v52 = vld [vmem:[%s6534_s16 + $0x30] sm:$0xff] }
 0x253   : > { %v4551_v25 = vsel %vm9296_vm14, 1.0, %v9243_v13 }
 0x254   : > { %4859 = vmatpush3.xpose.msra.mxu1 %v7360_v57  ;;  %v5906_v57 = vpack.i.bf16 %v4551_v25, %v4567_v30 }
 0x255   : > { %4860 = vmatprep.subr.mxu1 %v7365_v27  ;;  %v9298_v27 = vld [vmem:[#allocation23_spill] sm:$0xff] }
 0x256   : > { %5903 = vxpose.xlu0.b32.cont [12/16] %v5902_v55, 128  ;;  %vm9299_vm15 = vcmp.eq.s32.totalorder %v9298_v27, %v6544_v15  ;;  %v6346_v55 = vld [vmem:[%s6534_s16 + $0x18] sm:$0xff] }
 0x257   : > { %v4552_v8 = vsel %vm9299_vm15, 1.0, %v9243_v13 }
 0x258   : > { %4861 = vmatpush3.xpose.msra.mxu1 %v7370_v60  ;;  %v5908_v60 = vpack.i.bf16 %v4552_v8, %v4568_v11  ;;  %v9308_v8 = vld [vmem:[#allocation27_spill] sm:$0xff] }
 0x259   : > { %4862 = vmatprep.subr.mxu1 %v7375_v24  ;;  %v9301_v24 = vld [vmem:[#allocation24_spill] sm:$0xff] }
 0x25a   : > { %5905 = vxpose.xlu0.b32.cont [13/16] %v5904_v34, 128  ;;  %vm9302_vm0 = vcmp.eq.s32.totalorder %v9301_v24, %v6544_v15  ;;  %v9305_v15 = vld [vmem:[#allocation9_spill] sm:$0xff]  ;;  %v6349_v34 = vld [vmem:[%s6534_s16] sm:$0xff] }
 0x25b   : > { %v4553_v0 = vsel %vm9302_vm0, 1.0, %v9243_v13  ;;  %vm1721_vm13 = vcmp.eq.s32.totalorder %v9305_v15, 1 }
 0x25c   : > { %4863 = vmatpush3.xpose.msra.mxu1 %v7387_v39  ;;  %v1682_v39 = vsub.s32 2, %v6522_v3 }
 0x25d   : > { %4864 = vmatprep.subr.mxu1 %v7393_v44  ;;  %v5910_v44 = vpack.i.bf16 %v4553_v0, %v4569_v63  ;;  %v6350_v63 = vld [vmem:[#allocation2 + $0x10] sm:$0xff] }
 0x25e   : > { %5907 = vxpose.xlu0.b32.cont [14/16] %v5906_v57, 128  ;;  %v7481_v38 = vrot.slane %v6333_v62, %v1682_v39  ;;  %v6351_v39 = vld [vmem:[#allocation2 + $0x8] sm:$0xff] }
 0x260   : > { %4865 = vmatpush3.xpose.msra.mxu1 %v7398_v46  ;;  %9304 = vst [vmem:[#allocation50_spill] sm:$0xff] %v7481_v38  ;;  %vm1684_vm1 = vcmp.eq.s32.totalorder %v6522_v3, %v7481_v38  ;;  %v6334_v46 = vld [vmem:[%s6534_s16 + $0x78] sm:$0xff]  ;;  %vm1685_vm7 = vcmp.eq.s32.totalorder %v6568_v29, %v7481_v38  ;;  %vm1686_vm3 = vcmp.eq.s32.totalorder %v6572_v31, %v7481_v38 }
 0x261   : > { %4866 = vmatprep.subr.mxu1 %v1296_v5  ;;  %vm1722_vm10 = vmand %vm1684_vm1, %vm1721_vm13  ;;  %v9306_v5 = vld [vmem:[#allocation44_spill] sm:$0xff]  ;;  %vm1687_vm6 = vcmp.eq.s32.totalorder %v6578_v33, %v7481_v38  ;;  %vm9123_vm8 = vcmp.eq.s32.totalorder %v6584_v35, %v7481_v38  ;;  %vm9121_vm4 = vcmp.eq.s32.totalorder %v6599_v36, %v7481_v38  ;;  %vm9120_vm14 = vcmp.eq.s32.totalorder %v9253_v1, %v7481_v38 }
 0x262   : > { %5909 = vxpose.xlu0.b32.cont [15/16] %v5908_v60, 128  ;;  %vm1723_vm2 = vmand %vm1685_vm7, %vm1721_vm13 }
 0x263   : > { %vm1724_vm5 = vmand %vm1686_vm3, %vm1721_vm13 }
 0x264   : > { %4867 = vmatpush3.xpose.msra.mxu1 %v1280_v10  ;;  %v9307_v10 = vmov 1.0   ;;  %vm1725_vm9 = vmand %vm1687_vm6, %vm1721_vm13 }
 0x265   : > { %4868 = vmatprep.subr.mxu1 %v1295_v12  ;;  %v6335_v12 = vld [vmem:[%s6534_s16 + $0x70] sm:$0xff]  ;;  %vm1726_vm12 = vmand %vm9123_vm8, %vm1721_vm13 }
 0x266   : > { %5911 = vxpose.xlu0.b32.end [16/16] %v5910_v44, 128  ;;  %vm1727_vm15 = vmand %vm9121_vm4, %vm1721_vm13 }
 0x267   : > { %vm1728_vm0 = vmand %vm9120_vm14, %vm1721_vm13 }
 0x268   : > { %4869 = vmatpush3.xpose.msra.mxu1 %v1279_v20  ;;  %v6336_v20 = vld [vmem:[%s6534_s16 + $0x68] sm:$0xff] }
 0x269   : > { %4870 = vmatprep.subr.mxu1 %v1294_v43  ;;  %v6339_v43 = vld [vmem:[%s6534_s16 + $0x50] sm:$0xff] }
 0x26c   : > { %4871 = vmatpush3.xpose.msra.mxu1 %v1278_v45  ;;  %v6342_v45 = vld [vmem:[%s6534_s16 + $0x38] sm:$0xff] }
 0x26d   : > { %5438 = vmatprep.subr.mxu1 %v6334_v46 }
 0x26f   : > { %4873 = vmatmul.mubr.f32.vlgmr.msra.gmra.mxu1 %v9306_v5 }
 0x270   : > { %5439 = vmatpush3.msra.mxu1 %v6334_v46  ;;  %5470 = vmatprep.mubr.msk.f32.mxu1 %vm1722_vm10, %v9307_v10  ;;  %vm9112_vm10 = vcmp.eq.s32.totalorder %v9261_v54, %v7481_v38  ;;  %v6352_v46 = vld [vmem:[#allocation2] sm:$0xff] }
 0x271   : > { %5440 = vmatprep.subr.mxu1 %v6335_v12 }
 0x272   : > { %5441 = vmatpush3.msra.mxu1 %v6335_v12 }
 0x273   : > { %5442 = vmatprep.subr.mxu1 %v6336_v20 }
 0x274   : > { %5443 = vmatpush3.msra.mxu1 %v6336_v20 }
 0x275   : > { %5444 = vmatprep.subr.mxu1 %v6337_v37 }
 0x276   : > { %5445 = vmatpush3.msra.mxu1 %v6337_v37 }
 0x277   : > { %5446 = vmatprep.subr.mxu1 %v6338_v49 }
 0x278   : > { %5447 = vmatpush3.msra.mxu1 %v6338_v49 }
 0x279   : > { %5448 = vmatprep.subr.mxu1 %v6339_v43 }
 0x27a   : > { %5449 = vmatpush3.msra.mxu1 %v6339_v43 }
 0x27b   : > { %5450 = vmatprep.subr.mxu1 %v6340_v6 }
 0x27c   : > { %5451 = vmatpush3.msra.mxu1 %v6340_v6 }
 0x27d   : > { %5452 = vmatprep.subr.mxu1 %v6341_v2 }
 0x27e   : > { %5453 = vmatpush3.msra.mxu1 %v6341_v2 }
 0x27f   : > { %5454 = vmatprep.subr.mxu1 %v6342_v45 }
 0x280   : > { %5455 = vmatpush3.msra.mxu1 %v6342_v45 }
 0x281   : > { %5456 = vmatprep.subr.mxu1 %v6343_v52 }
 0x282   : > { %5457 = vmatpush3.msra.mxu1 %v6343_v52 }
 0x283   : > { %5458 = vmatprep.subr.mxu1 %v6344_v28 }
 0x284   : > { %5459 = vmatpush3.msra.mxu1 %v6344_v28 }
 0x285   : > { %5460 = vmatprep.subr.mxu1 %v6345_v17 }
 0x286   : > { %5461 = vmatpush3.msra.mxu1 %v6345_v17 }
 0x287   : > { %5462 = vmatprep.subr.mxu1 %v6346_v55 }
 0x288   : > { %5463 = vmatpush3.msra.mxu1 %v6346_v55 }
 0x289   : > { %5464 = vmatprep.subr.mxu1 %v6347_v53 }
 0x28a   : > { %5465 = vmatpush3.msra.mxu1 %v6347_v53 }
 0x28b   : > { %5466 = vmatprep.subr.mxu1 %v6348_v61 }
 0x28c   : > { %5467 = vmatpush3.msra.mxu1 %v6348_v61 }
 0x28d   : > { %5468 = vmatprep.subr.mxu1 %v6349_v34 }
 0x28e   : > { %5469 = vmatpush3.msra.mxu1 %v6349_v34 }
 0x28f   : > { %5471 = vmatmul.mubr.msk.f32.vlgmr.msra.gmra.mxu1 %vm1723_vm2, %v9307_v10  ;;  %vm9111_vm2 = vcmp.eq.s32.totalorder %v9269_v9, %v7481_v38 }
 0x290   : > { %5473 = vmatprep.mubr.msk.f32.mxu1 %vm1724_vm5, %v9307_v10  ;;  %vm1729_vm5 = vmand %vm9112_vm10, %vm1721_vm13  ;;  %vm9116_vm10 = vcmp.eq.s32.totalorder %v9287_v18, %v7481_v38 }
 0x293   : > { %5474 = vmatmul.mubr.msk.f32.gmra.mxu1 %vm1725_vm9, %v9307_v10  ;;  %vm1730_vm9 = vmand %vm9111_vm2, %vm1721_vm13 }
 0x294   : > { %5476 = vmatprep.mubr.msk.f32.mxu1 %vm1726_vm12, %v9307_v10  ;;  %vm9114_vm12 = vcmp.eq.s32.totalorder %v9277_v41, %v7481_v38 }
 0x297   : > { %5477 = vmatmul.mubr.msk.f32.gmra.mxu1 %vm1727_vm15, %v9307_v10  ;;  %vm9113_vm15 = vcmp.eq.s32.totalorder %v9283_v16, %v7481_v38 }
 0x298   : > { %5479 = vmatprep.mubr.msk.f32.mxu1 %vm1728_vm0, %v9307_v10  ;;  %vm1731_vm0 = vmand %vm9114_vm12, %vm1721_vm13  ;;  %vm9118_vm12 = vcmp.eq.s32.totalorder %v9295_v23, %v7481_v38 }
 0x299   : > { %vm1732_vm2 = vmand %vm9113_vm15, %vm1721_vm13 }
 0x29b   : > { %5480 = vmatmul.mubr.msk.f32.gmra.mxu1 %vm1729_vm5, %v9307_v10  ;;  %vm9115_vm5 = vcmp.eq.s32.totalorder %v9291_v7, %v7481_v38 }
 0x29c   : > { %5482 = vmatprep.mubr.msk.f32.mxu1 %vm1730_vm9, %v9307_v10  ;;  %vm1733_vm9 = vmand %vm9116_vm10, %vm1721_vm13  ;;  %vm9119_vm10 = vcmp.eq.s32.totalorder %v9301_v24, %v7481_v38 }
 0x29d   : > { %vm1734_vm15 = vmand %vm9115_vm5, %vm1721_vm13 }
 0x29f   : > { %5483 = vmatmul.mubr.msk.f32.gmra.mxu1 %vm1731_vm0, %v9307_v10  ;;  %vm9117_vm0 = vcmp.eq.s32.totalorder %v9298_v27, %v7481_v38 }
 0x2a0   : > { %5485 = vmatprep.mubr.msk.f32.mxu1 %vm1732_vm2, %v9307_v10  ;;  %vm1735_vm2 = vmand %vm9118_vm12, %vm1721_vm13  ;;  %vm1701_vm12 = vcmp.eq.s32.totalorder %v6731_v48, %v7481_v38  ;;  %v7983_v48 = vld [vmem:[%s9025_s3] ss:$0 sm:$0xff] }
 0x2a1   : > { %vm1736_vm5 = vmand %vm9117_vm0, %vm1721_vm13 }
 0x2a3   : > { %5486 = vmatmul.mubr.msk.f32.gmra.mxu1 %vm1733_vm9, %v9307_v10  ;;  %vm1700_vm9 = vcmp.eq.s32.totalorder %v6714_v47, %v7481_v38 }
 0x2a4   : > { %5488 = vmatprep.mubr.msk.f32.mxu1 %vm1734_vm15, %v9307_v10  ;;  %vm1737_vm15 = vmand %vm9119_vm10, %vm1721_vm13  ;;  %vm9124_vm10 = vcmp.eq.s32.totalorder %v6753_v50, %v7481_v38 }
 0x2a5   : > { %vm1738_vm0 = vmand %vm1700_vm9, %vm1721_vm13 }
 0x2a6   : > { %v5912_v25 = vpop.trf.xlu0  ;;  %vm1741_vm14 = vmand %vm9124_vm10, %vm1721_vm13  ;;  %vm9128_vm10 = vcmp.eq.s32.totalorder %v9263_v40, %v7481_v38 }
 0x2a7   : > { %5489 = vmatmul.mubr.msk.f32.gmra.mxu1 %vm1735_vm2, %v9307_v10  ;;  %v5916_v30 = vunpack.i.h.bf16 %v5912_v25  ;;  %v5913_v57 = vunpack.i.l.bf16 %v5912_v25  ;;  %vm1702_vm2 = vcmp.eq.s32.totalorder %v9308_v8, %v7481_v38 }
 0x2a8   : > { %5491 = vmatprep.mubr.msk.f32.mxu1 %vm1736_vm5, %v9307_v10  ;;  %vm1739_vm5 = vmand %vm1701_vm12, %vm1721_vm13 }
 0x2a9   : > { %1599 = vmatprep.mubr.f32.mxu0 %v5913_v57 }
 0x2aa   : > { %v5917_v11 = vpop.trf.xlu0  ;;  %1600 = vmatmul.mubr.f32.vlgmr.msra.gmra.mxu0 %v5916_v30 }
 0x2ab   : > { %5492 = vmatmul.mubr.msk.f32.gmra.mxu1 %vm1737_vm15, %v9307_v10  ;;  %v5918_v60 = vunpack.i.l.bf16 %v5917_v11  ;;  %v5921_v0 = vunpack.i.h.bf16 %v5917_v11  ;;  %5519 = vmatpush3.msra.mxu0 %v7435_v42  ;;  %vm1740_vm15 = vmand %vm1702_vm2, %vm1721_vm13 }
 0x2ac   : > { %5494 = vmatprep.mubr.msk.f32.mxu1 %vm1738_vm0, %v9307_v10  ;;  %5520 = vmatprep.subr.mxu0 %v6350_v63  ;;  %vm9122_vm0 = vcmp.eq.s32.totalorder %v6758_v51, %v7481_v38 }
 0x2ad   : > { %1604 = vmatprep.mubr.f32.mxu0 %v5918_v60  ;;  %5521 = vmatpush3.msra.mxu0 %v6350_v63  ;;  %vm1742_vm4 = vmand %vm9122_vm0, %vm1721_vm13 }
 0x2ae   : > { %v5922_v42 = vpop.trf.xlu0  ;;  %1605 = vmatmul.mubr.f32.gmra.mxu0 %v5921_v0  ;;  %5522 = vmatprep.subr.mxu0 %v6351_v39 }
 0x2af   : > { %5495 = vmatmul.mubr.msk.f32.gmra.mxu1 %vm1739_vm5, %v9307_v10  ;;  %v5923_v44 = vunpack.i.l.bf16 %v5922_v42  ;;  %v5926_v62 = vunpack.i.h.bf16 %v5922_v42  ;;  %5523 = vmatpush3.msra.mxu0 %v6351_v39  ;;  %vm9126_vm5 = vcmp.eq.s32.totalorder %v9247_v58, %v7481_v38 }
 0x2b0   : > { %5497 = vmatprep.mubr.msk.f32.mxu1 %vm1740_vm15, %v9307_v10  ;;  %5524 = vmatprep.subr.mxu0 %v6352_v46  ;;  %vm9125_vm15 = vcmp.eq.s32.totalorder %v9255_v21, %v7481_v38  ;;  %vm1743_vm0 = vmand %vm9126_vm5, %vm1721_vm13  ;;  %vm9130_vm5 = vcmp.eq.s32.totalorder %v9279_v32, %v7481_v38 }
 0x2b1   : > { %1609 = vmatprep.mubr.f32.mxu0 %v5923_v44  ;;  %5525 = vmatpush3.msra.mxu0 %v6352_v46  ;;  %vm1744_vm8 = vmand %vm9125_vm15, %vm1721_vm13 }
 0x2b2   : > { %v5927_v5 = vpop.trf.xlu0  ;;  %1610 = vmatmul.mubr.f32.gmra.mxu0 %v5926_v62 }
 0x2b3   : > { %5498 = vmatmul.mubr.msk.f32.gmra.mxu1 %vm1741_vm14, %v9307_v10  ;;  %v5928_v12 = vunpack.i.l.bf16 %v5927_v5  ;;  %v5931_v20 = vunpack.i.h.bf16 %v5927_v5  ;;  %vm9127_vm14 = vcmp.eq.s32.totalorder %v9271_v22, %v7481_v38 }
 0x2b4   : > { %5500 = vmatprep.mubr.msk.f32.mxu1 %vm1742_vm4, %v9307_v10  ;;  %vm1745_vm4 = vmand %vm9128_vm10, %vm1721_vm13  ;;  %vm9132_vm10 = vcmp.eq.s32.totalorder %v9289_v4, %v7481_v38 }
 0x2b5   : > { %1614 = vmatprep.mubr.f32.mxu0 %v5928_v12  ;;  %vm1746_vm15 = vmand %vm9127_vm14, %vm1721_vm13 }
 0x2b6   : > { %v5932_v37 = vpop.trf.xlu0  ;;  %1615 = vmatmul.mubr.f32.gmra.mxu0 %v5931_v20 }
 0x2b7   : > { %5501 = vmatmul.mubr.msk.f32.gmra.mxu1 %vm1743_vm0, %v9307_v10  ;;  %v5933_v49 = vunpack.i.l.bf16 %v5932_v37  ;;  %v5936_v43 = vunpack.i.h.bf16 %v5932_v37  ;;  %vm9129_vm0 = vcmp.eq.s32.totalorder %v9285_v19, %v7481_v38 }
 0x2b8   : > { %5503 = vmatprep.mubr.msk.f32.mxu1 %vm1744_vm8, %v9307_v10  ;;  %vm1747_vm8 = vmand %vm9130_vm5, %vm1721_vm13  ;;  %vm1713_vm5 = vcmp.eq.s32.totalorder %v9297_v56, %v7481_v38 }
 0x2b9   : > { %1619 = vmatprep.mubr.f32.mxu0 %v5933_v49  ;;  %vm1748_vm14 = vmand %vm9129_vm0, %vm1721_vm13 }
 0x2ba   : > { %v5937_v6 = vpop.trf.xlu0  ;;  %1620 = vmatmul.mubr.f32.gmra.mxu0 %v5936_v43 }
 0x2bb   : > { %5504 = vmatmul.mubr.msk.f32.gmra.mxu1 %vm1745_vm4, %v9307_v10  ;;  %v5938_v2 = vunpack.i.l.bf16 %v5937_v6  ;;  %v5941_v45 = vunpack.i.h.bf16 %v5937_v6  ;;  %vm9131_vm4 = vcmp.eq.s32.totalorder %v9293_v59, %v7481_v38 }
 0x2bc   : > { %5506 = vmatprep.mubr.msk.f32.mxu1 %vm1746_vm15, %v9307_v10  ;;  %vm1749_vm15 = vmand %vm9132_vm10, %vm1721_vm13  ;;  %vm1715_vm10 = vcmp.eq.s32.totalorder %v9303_v26, %v7481_v38 }
 0x2bd   : > { %1624 = vmatprep.mubr.f32.mxu0 %v5938_v2  ;;  %vm1750_vm0 = vmand %vm9131_vm4, %vm1721_vm13 }
 0x2be   : > { %v5942_v52 = vpop.trf.xlu0  ;;  %1625 = vmatmul.mubr.f32.gmra.mxu0 %v5941_v45 }
 0x2bf   : > { %5507 = vmatmul.mubr.msk.f32.gmra.mxu1 %vm1747_vm8, %v9307_v10  ;;  %v5943_v28 = vunpack.i.l.bf16 %v5942_v52  ;;  %v5946_v17 = vunpack.i.h.bf16 %v5942_v52  ;;  %vm1714_vm8 = vcmp.eq.s32.totalorder %v9300_v14, %v7481_v38 }
 0x2c0   : > { %5509 = vmatprep.mubr.msk.f32.mxu1 %vm1748_vm14, %v9307_v10  ;;  %vm1751_vm14 = vmand %vm1713_vm5, %vm1721_vm13 }
 0x2c1   : > { %1629 = vmatprep.mubr.f32.mxu0 %v5943_v28  ;;  %vm1752_vm4 = vmand %vm1714_vm8, %vm1721_vm13  ;;  %v4666_v28 = vsel %vm1684_vm1, 1.0, %v9243_v13 }
 0x2c2   : > { %v5947_v55 = vpop.trf.xlu0  ;;  %1630 = vmatmul.mubr.f32.gmra.mxu0 %v5946_v17  ;;  %v4682_v17 = vsel %vm1700_vm9, 1.0, %v9243_v13 }
 0x2c3   : > { %5510 = vmatmul.mubr.msk.f32.gmra.mxu1 %vm1749_vm15, %v9307_v10  ;;  %v5948_v53 = vunpack.i.l.bf16 %v5947_v55  ;;  %v5951_v61 = vunpack.i.h.bf16 %v5947_v55  ;;  %v5992_v55 = vpack.i.bf16 %v4666_v28, %v4682_v17  ;;  %vm9330_vm15 = vcmp.eq.s32.totalorder %v6584_v35, %v7481_v38 }
 0x2c4   : > { %5512 = vmatprep.mubr.msk.f32.mxu1 %vm1750_vm0, %v9307_v10  ;;  %vm1753_vm0 = vmand %vm1715_vm10, %vm1721_vm13 }
 0x2c5   : > { %1634 = vmatprep.mubr.f32.mxu0 %v5948_v53  ;;  %5993 = vxpose.xlu1.b32.start [1/16] %v5992_v55, 128  ;;  %v4667_v53 = vsel %vm1685_vm7, 1.0, %v9243_v13 }
 0x2c6   : > { %v5952_v34 = vpop.trf.xlu0  ;;  %1635 = vmatmul.mubr.f32.gmra.mxu0 %v5951_v61  ;;  %v4683_v61 = vsel %vm1701_vm12, 1.0, %v9243_v13 }
 0x2c7   : > { %5513 = vmatmul.mubr.msk.f32.gmra.mxu1 %vm1751_vm14, %v9307_v10  ;;  %v5953_v25 = vunpack.i.l.bf16 %v5952_v34  ;;  %v5956_v30 = vunpack.i.h.bf16 %v5952_v34  ;;  %v6434_v34 = vmov 1966171168   ;;  %vm9331_vm14 = vcmp.eq.s32.totalorder %v6758_v51, %v7481_v38 }
 0x2c8   : > { %5515 = vmatprep.mubr.msk.f32.mxu1 %vm1752_vm4, %v9307_v10  ;;  %vm9328_vm4 = vcmp.eq.s32.totalorder %v6753_v50, %v7481_v38 }
 0x2c9   : > { %1639 = vmatprep.mubr.f32.mxu0 %v5953_v25  ;;  %v1388_v25 = vunpack.c.l.s4 %v6434_v34 }
 0x2ca   : > { %v5957_v57 = vpop.trf.xlu0  ;;  %1640 = vmatmul.mubr.f32.gmra.mxu0 %v5956_v30  ;;  %v5994_v30 = vpack.i.bf16 %v4667_v53, %v4683_v61 }
 0x2cb   : > { %5516 = vmatmul.mubr.msk.f32.gmra.mxu1 %vm1753_vm0, %v9307_v10  ;;  %v5958_v11 = vunpack.i.l.bf16 %v5957_v57  ;;  %v5961_v60 = vunpack.i.h.bf16 %v5957_v57  ;;  %v1312_v57 = vstv %s1311_s27  ;;  %vm9332_vm0 = vcmp.eq.s32.totalorder %v6599_v36, %v7481_v38 }
 0x2cc   : > { %5995 = vxpose.xlu1.b32.cont [2/16] %v5994_v30, 128 }
 0x2cd   : > { %1644 = vmatprep.mubr.f32.mxu0 %v5958_v11  ;;  %v1389_v11 = vunpack.c.0.s8 %v1388_v25 }
 0x2ce   : > { %v5962_v0 = vpop.trf.xlu0  ;;  %1645 = vmatmul.mubr.f32.gmra.mxu0 %v5961_v60 }
 0x2cf   : > { %v5963_v63 = vunpack.i.l.bf16 %v5962_v0  ;;  %v5966_v42 = vunpack.i.h.bf16 %v5962_v0 }
 0x2d1   : > { %1649 = vmatprep.mubr.f32.mxu0 %v5963_v63 }
 0x2d2   : > { %v5967_v39 = vpop.trf.xlu0  ;;  %1650 = vmatmul.mubr.f32.gmra.mxu0 %v5966_v42 }
 0x2d3   : > { %v5968_v15 = vunpack.i.l.bf16 %v5967_v39  ;;  %v5971_v44 = vunpack.i.h.bf16 %v5967_v39  ;;  %v7783_v39 = vsub.s32 %v1389_v11, %v6522_v3 }
 0x2d5   : > { %1654 = vmatprep.mubr.f32.mxu0 %v5968_v15  ;;  %9309 = vst [vmem:[#allocation52_spill] sm:$0xff] %v7783_v39 }
 0x2d6   : > { %v5972_v62 = vpop.trf.xlu0  ;;  %1655 = vmatmul.mubr.f32.gmra.mxu0 %v5971_v44 }
 0x2d7   : > { %v5973_v46 = vunpack.i.l.bf16 %v5972_v62  ;;  %v5976_v5 = vunpack.i.h.bf16 %v5972_v62  ;;  %v9310_v62 = vlaneseq }
 0x2d9   : > { %1659 = vmatprep.mubr.f32.mxu0 %v5973_v46  ;;  %vm7787_vm13 = vcmp.lt.s32.totalorder %v9310_v62, 256  ;;  %v9311_v46 = vmov 0 }
 0x2da   : > { %v5977_v12 = vpop.trf.xlu0  ;;  %1660 = vmatmul.mubr.f32.gmra.mxu0 %v5976_v5  ;;  %v9312_v46 = vsel %vm7787_vm13, 4294967295, %v9311_v46 }
 0x2db   : > { %v5978_v20 = vunpack.i.l.bf16 %v5977_v12  ;;  %v5981_v37 = vunpack.i.h.bf16 %v5977_v12  ;;  %9313 = vst [vmem:[#allocation51_spill] sm:$0xff] %v9312_v46 }
 0x2dd   : > { %1664 = vmatprep.mubr.f32.mxu0 %v5978_v20 }
 0x2de   : > { %v5982_v49 = vpop.trf.xlu0  ;;  %1665 = vmatmul.mubr.f32.gmra.mxu0 %v5981_v37 }
 0x2df   : > { %v5983_v43 = vunpack.i.l.bf16 %v5982_v49  ;;  %v5986_v6 = vunpack.i.h.bf16 %v5982_v49 }
 0x2e1   : > { %1669 = vmatprep.mubr.f32.mxu0 %v5983_v43 }
 0x2e2   : > { %v5987_v2 = vpop.trf.xlu0  ;;  %1670 = vmatmul.mubr.f32.gmra.mxu0 %v5986_v6 }
 0x2e3   : > { %v5991_v45 = vunpack.i.h.bf16 %v5987_v2  ;;  %v5988_v52 = vunpack.i.l.bf16 %v5987_v2 }
 0x2e5   : > { %1674 = vmatprep.mubr.f32.mxu0 %v5988_v52 }
 0x2e6   : > { %1675 = vmatmul.mubr.f32.gmra.mxu0 %v5991_v45 }
 0x32f   : > { %v1379_v60 = vpop.f32.mrf.mxu1 }
 0x330   : > { %v1380_v0 = vadd.f32 %v1379_v60, %v1312_v57 }
 0x331   : > { %v1381_v63 = vpop.f32.mrf.mxu1 }
 0x332   : > { %v1382_v42 = vadd.f32 %v1381_v63, %v1312_v57 }
 0x334   : > { %v1386_v15 = vcombine.low %v1380_v0, %v1382_v42 }
 0x336   : > { %v1393_v44 = vrot.slane %v1386_v15, %v7783_v39 }
 0x338   : > { %v1400_v5 = vrot.slane %v1393_v44, %v7783_v39 }
 0x33a   : > { %1406 = vst.msk [vmem:[%s7762_s26] ss:$4 sm:$0x3] %vm7787_vm13, %v1400_v5 }
 0x34f   : > { %v5472_v12 = vpop.f32.mrf.mxu1 }
 0x351   : > { %v1884_v20 = vpop.f32.mrf.mxu1 }
 0x352   : > { %5526 = vmatprep.mubr.msk.f32.mxu0 %vm700_vm11, %v1884_v20 }
 0x353   : > { %v5475_v37 = vpop.f32.mrf.mxu1  ;;  %5527 = vmatmul.mubr.msk.f32.vlgmr.msra.gmra.mxu0 %vm700_vm11, %v5472_v12 }
 0x355   : > { %v1894_v49 = vpop.f32.mrf.mxu1 }
 0x356   : > { %5529 = vmatprep.mubr.msk.f32.mxu0 %vm700_vm11, %v1894_v49 }
 0x357   : > { %v5478_v43 = vpop.f32.mrf.mxu1  ;;  %5530 = vmatmul.mubr.msk.f32.gmra.mxu0 %vm700_vm11, %v5475_v37 }
 0x359   : > { %v1904_v6 = vpop.f32.mrf.mxu1 }
 0x35a   : > { %5532 = vmatprep.mubr.msk.f32.mxu0 %vm700_vm11, %v1904_v6 }
 0x35b   : > { %v5481_v2 = vpop.f32.mrf.mxu1  ;;  %5533 = vmatmul.mubr.msk.f32.gmra.mxu0 %vm700_vm11, %v5478_v43 }
 0x35d   : > { %v1914_v45 = vpop.f32.mrf.mxu1 }
 0x35e   : > { %5535 = vmatprep.mubr.msk.f32.mxu0 %vm700_vm11, %v1914_v45 }
 0x35f   : > { %v5484_v52 = vpop.f32.mrf.mxu1  ;;  %5536 = vmatmul.mubr.msk.f32.gmra.mxu0 %vm700_vm11, %v5481_v2 }
 0x361   : > { %v1924_v28 = vpop.f32.mrf.mxu1 }
 0x362   : > { %5538 = vmatprep.mubr.msk.f32.mxu0 %vm700_vm11, %v1924_v28 }
 0x363   : > { %v5487_v17 = vpop.f32.mrf.mxu1  ;;  %5539 = vmatmul.mubr.msk.f32.gmra.mxu0 %vm700_vm11, %v5484_v52 }
 0x365   : > { %v1934_v55 = vpop.f32.mrf.mxu1 }
 0x366   : > { %5541 = vmatprep.mubr.msk.f32.mxu0 %vm700_vm11, %v1934_v55 }
 0x367   : > { %v5490_v53 = vpop.f32.mrf.mxu1  ;;  %5542 = vmatmul.mubr.msk.f32.gmra.mxu0 %vm700_vm11, %v5487_v17 }
 0x369   : > { %v1944_v61 = vpop.f32.mrf.mxu1 }
 0x36a   : > { %5544 = vmatprep.mubr.msk.f32.mxu0 %vm700_vm11, %v1944_v61  ;;  %v4906_v34 = vpop.f32.mrf.mxu0 }
 0x36b   : > { %v5493_v25 = vpop.f32.mrf.mxu1  ;;  %5545 = vmatmul.mubr.msk.f32.gmra.mxu0 %vm700_vm11, %v5490_v53 }
 0x36c   : > { %v4907_v30 = vpop.f32.mrf.mxu0 }
 0x36d   : > { %v1954_v57 = vpop.f32.mrf.mxu1  ;;  %v7809_v11 = vadd.f32 %v4907_v30, %v4906_v34 }
 0x36e   : > { %5547 = vmatprep.mubr.msk.f32.mxu0 %vm700_vm11, %v1954_v57  ;;  %v4909_v60 = vpop.f32.mrf.mxu0 }
 0x36f   : > { %9314 = vst [vmem:[#allocation58_spill] sm:$0xff] %v7809_v11  ;;  %v5496_v0 = vpop.f32.mrf.mxu1  ;;  %5548 = vmatmul.mubr.msk.f32.gmra.mxu0 %vm700_vm11, %v5493_v25 }
 0x370   : > { %v4910_v63 = vpop.f32.mrf.mxu0 }
 0x371   : > { %v1964_v42 = vpop.f32.mrf.mxu1  ;;  %v7813_v15 = vadd.f32 %v4910_v63, %v4909_v60 }
 0x372   : > { %5550 = vmatprep.mubr.msk.f32.mxu0 %vm700_vm11, %v1964_v42  ;;  %v4912_v44 = vpop.f32.mrf.mxu0 }
 0x373   : > { %9315 = vst [vmem:[#allocation47_spill] sm:$0xff] %v7813_v15  ;;  %v5499_v5 = vpop.f32.mrf.mxu1  ;;  %5551 = vmatmul.mubr.msk.f32.gmra.mxu0 %vm700_vm11, %v5496_v0 }
 0x374   : > { %v4913_v12 = vpop.f32.mrf.mxu0 }
 0x375   : > { %v1974_v20 = vpop.f32.mrf.mxu1  ;;  %v7817_v37 = vadd.f32 %v4913_v12, %v4912_v44 }
 0x376   : > { %5553 = vmatprep.mubr.msk.f32.mxu0 %vm700_vm11, %v1974_v20  ;;  %v4915_v49 = vpop.f32.mrf.mxu0 }
 0x377   : > { %9316 = vst [vmem:[#allocation59_spill] sm:$0xff] %v7817_v37  ;;  %v5502_v43 = vpop.f32.mrf.mxu1  ;;  %5554 = vmatmul.mubr.msk.f32.gmra.mxu0 %vm700_vm11, %v5499_v5 }
 0x378   : > { %v4916_v6 = vpop.f32.mrf.mxu0 }
 0x379   : > { %v1984_v2 = vpop.f32.mrf.mxu1  ;;  %v7821_v45 = vadd.f32 %v4916_v6, %v4915_v49 }
 0x37a   : > { %5556 = vmatprep.mubr.msk.f32.mxu0 %vm700_vm11, %v1984_v2  ;;  %v4918_v52 = vpop.f32.mrf.mxu0 }
 0x37b   : > { %9317 = vst [vmem:[#allocation49_spill] sm:$0xff] %v7821_v45  ;;  %v5505_v28 = vpop.f32.mrf.mxu1  ;;  %5557 = vmatmul.mubr.msk.f32.gmra.mxu0 %vm700_vm11, %v5502_v43 }
 0x37c   : > { %v4919_v17 = vpop.f32.mrf.mxu0 }
 0x37d   : > { %v1994_v55 = vpop.f32.mrf.mxu1  ;;  %v7825_v53 = vadd.f32 %v4919_v17, %v4918_v52 }
 0x37e   : > { %5559 = vmatprep.mubr.msk.f32.mxu0 %vm700_vm11, %v1994_v55  ;;  %v4921_v61 = vpop.f32.mrf.mxu0 }
 0x37f   : > { %9318 = vst [vmem:[#allocation56_spill] sm:$0xff] %v7825_v53  ;;  %v5508_v34 = vpop.f32.mrf.mxu1  ;;  %5560 = vmatmul.mubr.msk.f32.gmra.mxu0 %vm700_vm11, %v5505_v28 }
 0x380   : > { %v4922_v25 = vpop.f32.mrf.mxu0 }
 0x381   : > { %v2004_v30 = vpop.f32.mrf.mxu1  ;;  %v7829_v57 = vadd.f32 %v4922_v25, %v4921_v61 }
 0x382   : > { %5562 = vmatprep.mubr.msk.f32.mxu0 %vm700_vm11, %v2004_v30  ;;  %v4924_v60 = vpop.f32.mrf.mxu0 }
 0x383   : > { %9319 = vst [vmem:[#allocation45_spill] sm:$0xff] %v7829_v57  ;;  %v5511_v0 = vpop.f32.mrf.mxu1  ;;  %5563 = vmatmul.mubr.msk.f32.gmra.mxu0 %vm700_vm11, %v5508_v34 }
 0x384   : > { %v4925_v63 = vpop.f32.mrf.mxu0 }
 0x385   : > { %v2014_v42 = vpop.f32.mrf.mxu1  ;;  %v7833_v44 = vadd.f32 %v4925_v63, %v4924_v60 }
 0x386   : > { %5565 = vmatprep.mubr.msk.f32.mxu0 %vm700_vm11, %v2014_v42  ;;  %v4927_v5 = vpop.f32.mrf.mxu0 }
 0x387   : > { %9320 = vst [vmem:[#allocation57_spill] sm:$0xff] %v7833_v44  ;;  %v5514_v12 = vpop.f32.mrf.mxu1  ;;  %5566 = vmatmul.mubr.msk.f32.gmra.mxu0 %vm700_vm11, %v5511_v0 }
 0x388   : > { %v4928_v20 = vpop.f32.mrf.mxu0 }
 0x389   : > { %v2024_v49 = vpop.f32.mrf.mxu1  ;;  %v7837_v43 = vadd.f32 %v4928_v20, %v4927_v5 }
 0x38a   : > { %5568 = vmatprep.mubr.msk.f32.mxu0 %vm700_vm11, %v2024_v49  ;;  %v4930_v6 = vpop.f32.mrf.mxu0 }
 0x38b   : > { %9321 = vst [vmem:[#allocation46_spill] sm:$0xff] %v7837_v43  ;;  %v5517_v2 = vpop.f32.mrf.mxu1  ;;  %5569 = vmatmul.mubr.msk.f32.gmra.mxu0 %vm700_vm11, %v5514_v12 }
 0x38c   : > { %v4931_v52 = vpop.f32.mrf.mxu0 }
 0x38d   : > { %v2034_v28 = vpop.f32.mrf.mxu1  ;;  %v7841_v17 = vadd.f32 %v4931_v52, %v4930_v6  ;;  %v4668_v6 = vsel %vm1686_vm3, 1.0, %v9243_v13 }
 0x38e   : > { %5571 = vmatprep.mubr.msk.f32.mxu0 %vm700_vm11, %v2034_v28  ;;  %v4933_v55 = vpop.f32.mrf.mxu0 }
 0x38f   : > { %9322 = vst [vmem:[#allocation54_spill] sm:$0xff] %v7841_v17  ;;  %5572 = vmatmul.mubr.msk.f32.gmra.mxu0 %vm700_vm11, %v5517_v2  ;;  %v4684_v2 = vsel %vm1702_vm2, 1.0, %v9243_v13 }
 0x390   : > { %v4934_v61 = vpop.f32.mrf.mxu0  ;;  %v5996_v52 = vpack.i.bf16 %v4668_v6, %v4684_v2  ;;  %v4671_v2 = vsel %vm9332_vm0, 1.0, %v9243_v13  ;;  %vm9336_vm0 = vcmp.eq.s32.totalorder %v9261_v54, %v7481_v38 }
 0x391   : > { %v7845_v34 = vadd.f32 %v4934_v61, %v4933_v55 }
 0x392   : > { %v4936_v25 = vpop.f32.mrf.mxu0  ;;  %5997 = vxpose.xlu1.b32.cont [3/16] %v5996_v52, 128 }
 0x393   : > { %9323 = vst [vmem:[#allocation42_spill] sm:$0xff] %v7845_v34 }
 0x394   : > { %v4937_v30 = vpop.f32.mrf.mxu0 }
 0x395   : > { %v7847_v60 = vadd.f32 %v4937_v30, %v4936_v25  ;;  %v4669_v25 = vsel %vm1687_vm6, 1.0, %v9243_v13  ;;  %v4685_v30 = vsel %vm9328_vm4, 1.0, %v9243_v13  ;;  %vm9333_vm4 = vcmp.eq.s32.totalorder %v9247_v58, %v7481_v38 }
 0x396   : > { %v4939_v0 = vpop.f32.mrf.mxu0  ;;  %v4687_v52 = vsel %vm9333_vm4, 1.0, %v9243_v13  ;;  %vm9337_vm4 = vcmp.eq.s32.totalorder %v9263_v40, %v7481_v38 }
 0x397   : > { %9324 = vst [vmem:[#allocation55_spill] sm:$0xff] %v7847_v60 }
 0x398   : > { %v4940_v63 = vpop.f32.mrf.mxu0 }
 0x399   : > { %v7849_v42 = vadd.f32 %v4940_v63, %v4939_v0  ;;  %v5998_v0 = vpack.i.bf16 %v4669_v25, %v4685_v30 }
 0x39a   : > { %v4942_v5 = vpop.f32.mrf.mxu0 }
 0x39b   : > { %9325 = vst [vmem:[#allocation43_spill] sm:$0xff] %v7849_v42  ;;  %5999 = vxpose.xlu1.b32.cont [4/16] %v5998_v0, 128  ;;  %v4673_v0 = vsel %vm9336_vm0, 1.0, %v9243_v13  ;;  %vm9340_vm0 = vcmp.eq.s32.totalorder %v9277_v41, %v7481_v38 }
 0x39c   : > { %v4943_v12 = vpop.f32.mrf.mxu0 }
 0x39d   : > { %v7851_v20 = vadd.f32 %v4943_v12, %v4942_v5  ;;  %v4670_v12 = vsel %vm9330_vm15, 1.0, %v9243_v13  ;;  %vm9334_vm15 = vcmp.eq.s32.totalorder %v9253_v1, %v7481_v38 }
 0x39e   : > { %v4945_v49 = vpop.f32.mrf.mxu0 }
 0x39f   : > { %9326 = vst [vmem:[#allocation53_spill] sm:$0xff] %v7851_v20 }
 0x3a0   : > { %v4946_v28 = vpop.f32.mrf.mxu0 }
 0x3a1   : > { %v7861_v55 = vadd.f32 %v4946_v28, %v4945_v49  ;;  %v4686_v49 = vsel %vm9331_vm14, 1.0, %v9243_v13  ;;  %v6002_v28 = vpack.i.bf16 %v4671_v2, %v4687_v52  ;;  %vm9335_vm14 = vcmp.eq.s32.totalorder %v9255_v21, %v7481_v38 }
 0x3a2   : > { %v4948_v61 = vpop.f32.mrf.mxu0  ;;  %v6000_v6 = vpack.i.bf16 %v4670_v12, %v4686_v49  ;;  %v4688_v25 = vsel %vm9335_vm14, 1.0, %v9243_v13  ;;  %vm9339_vm14 = vcmp.eq.s32.totalorder %v9271_v22, %v7481_v38  ;;  %v4675_v52 = vsel %vm9340_vm0, 1.0, %v9243_v13 }
 0x3a3   : > { %9327 = vst [vmem:[#allocation41_spill] sm:$0xff] %v7861_v55  ;;  %vm9344_vm0 = vcmp.eq.s32.totalorder %v9287_v18, %v7481_v38 }
 0x3a4   : > { %v4949_v63 = vpop.f32.mrf.mxu0  ;;  %6001 = vxpose.xlu1.b32.cont [5/16] %v6000_v6, 128  ;;  %v4690_v6 = vsel %vm9339_vm14, 1.0, %v9243_v13  ;;  %vm9343_vm14 = vcmp.eq.s32.totalorder %v9285_v19, %v7481_v38 }
 0x3a5   : > { %v7871_v5 = vadd.f32 %v4949_v63, %v4948_v61  ;;  %v4672_v61 = vsel %vm9334_vm15, 1.0, %v9243_v13  ;;  %v4689_v63 = vsel %vm9337_vm4, 1.0, %v9243_v13  ;;  %vm9338_vm15 = vcmp.eq.s32.totalorder %v9269_v9, %v7481_v38 }
 0x3a6   : > { %v6004_v30 = vpack.i.bf16 %v4672_v61, %v4688_v25  ;;  %v6006_v12 = vpack.i.bf16 %v4673_v0, %v4689_v63  ;;  %v4674_v49 = vsel %vm9338_vm15, 1.0, %v9243_v13  ;;  %vm9341_vm4 = vcmp.eq.s32.totalorder %v9279_v32, %v7481_v38 }
 0x3a7   : > { %9329 = vst [vmem:[#allocation48_spill] sm:$0xff] %v7871_v5  ;;  %v6008_v2 = vpack.i.bf16 %v4674_v49, %v4690_v6  ;;  %vm9342_vm15 = vcmp.eq.s32.totalorder %v9283_v16, %v7481_v38  ;;  %v4677_v63 = vsel %vm9344_vm0, 1.0, %v9243_v13  ;;  %vm9348_vm0 = vcmp.eq.s32.totalorder %v9295_v23, %v7481_v38 }
 0x3a8   : > { %6003 = vxpose.xlu1.b32.cont [6/16] %v6002_v28, 128  ;;  %v4691_v28 = vsel %vm9341_vm4, 1.0, %v9243_v13  ;;  %v4676_v25 = vsel %vm9342_vm15, 1.0, %v9243_v13  ;;  %vm9345_vm4 = vcmp.eq.s32.totalorder %v9289_v4, %v7481_v38  ;;  %vm9346_vm15 = vcmp.eq.s32.totalorder %v9291_v7, %v7481_v38 }
 0x3a9   : > { %v6010_v61 = vpack.i.bf16 %v4675_v52, %v4691_v28  ;;  %v4678_v6 = vsel %vm9346_vm15, 1.0, %v9243_v13  ;;  %v4679_v28 = vsel %vm9348_vm0, 1.0, %v9243_v13  ;;  %vm9350_vm15 = vcmp.eq.s32.totalorder %v9301_v24, %v7481_v38 }
 0x3aa   : > { %vm9416_vm0 = vmmov %vm9350_vm15 }
 0x3ac   : > { %6005 = vxpose.xlu1.b32.cont [7/16] %v6004_v30, 128  ;;  %v4692_v30 = vsel %vm9343_vm14, 1.0, %v9243_v13  ;;  %vm9347_vm14 = vcmp.eq.s32.totalorder %v9293_v59, %v7481_v38 }
 0x3ad   : > { %v6012_v0 = vpack.i.bf16 %v4676_v25, %v4692_v30 }
 0x3b0   : > { %6007 = vxpose.xlu1.b32.cont [8/16] %v6006_v12, 128  ;;  %v4693_v12 = vsel %vm9345_vm4, 1.0, %v9243_v13  ;;  %vm9349_vm4 = vcmp.eq.s32.totalorder %v9298_v27, %v7481_v38 }
 0x3b1   : > { %v6014_v49 = vpack.i.bf16 %v4677_v63, %v4693_v12  ;;  %v4680_v30 = vsel %vm9349_vm4, 1.0, %v9243_v13  ;;  %v4681_v12 = vsel %vm9350_vm15, 1.0, %v9243_v13 }
 0x3b4   : > { %6009 = vxpose.xlu1.b32.cont [9/16] %v6008_v2, 128  ;;  %v4694_v2 = vsel %vm9347_vm14, 1.0, %v9243_v13 }
 0x3b5   : > { %v6016_v52 = vpack.i.bf16 %v4678_v6, %v4694_v2  ;;  %v7969_v2 = vpop.f32.mrf.mxu0 }
 0x3b6   : > { %9351 = vst [vmem:[#allocation9_spill] sm:$0xff] %v7969_v2 }
 0x3b8   : > { %6011 = vxpose.xlu1.b32.cont [10/16] %v6010_v61, 128  ;;  %v4695_v61 = vsel %vm1713_vm5, 1.0, %v9243_v13 }
 0x3b9   : > { %v6018_v25 = vpack.i.bf16 %v4679_v28, %v4695_v61 }
 0x3bc   : > { %6013 = vxpose.xlu1.b32.cont [11/16] %v6012_v0, 128  ;;  %v4696_v0 = vsel %vm1714_vm8, 1.0, %v9243_v13 }
 0x3bd   : > { %v6020_v63 = vpack.i.bf16 %v4680_v30, %v4696_v0 }
 0x3c0   : > { %6015 = vxpose.xlu1.b32.cont [12/16] %v6014_v49, 128  ;;  %v4697_v49 = vsel %vm1715_vm10, 1.0, %v9243_v13 }
 0x3c1   : > { %v6022_v6 = vpack.i.bf16 %v4681_v12, %v4697_v49 }
 0x3c4   : > { %6017 = vxpose.xlu1.b32.cont [13/16] %v6016_v52, 128  ;;  %v7971_v52 = vpop.f32.mrf.mxu0 }
 0x3c5   : > { %9352 = vst [vmem:[#allocation44_spill] sm:$0xff] %v7971_v52 }
 0x3c8   : > { %6019 = vxpose.xlu1.b32.cont [14/16] %v6018_v25, 128 }
 0x3cc   : > { %6021 = vxpose.xlu1.b32.cont [15/16] %v6020_v63, 128 }
 0x3d0   : > { %6023 = vxpose.xlu1.b32.end [16/16] %v6022_v6, 128 }
 0x410   : > { %v7973_v25 = vpop.trf.xlu1 }
 0x411   : > { %9353 = vst [vmem:[#allocation60_spill] sm:$0xff] %v7973_v25  ;;  %v6025_v0 = vunpack.i.l.bf16 %v7973_v25 }
 0x413   : > { %v5528_v28 = vpop.f32.mrf.mxu0  ;;  %2844 = vmatprep.mubr.f32.mxu1 %v6025_v0 }
 0x414   : > { %v7976_v39 = vpop.trf.xlu1  ;;  %v7986_v31 = vadd.f32 %v7983_v48, %v5528_v28 }
 0x415   : > { %v2205_v61 = vpop.f32.mrf.mxu0  ;;  %9354 = vst [vmem:[#allocation61_spill] sm:$0xff] %v7976_v39 }
 0x416   : > { %9356 = vst [vmem:[#allocation63_spill] sm:$0xff] %v7986_v31  ;;  %v2397_v50 = vmul.f32 0.044715, %v7986_v31  ;;  %v8001_v1 = vadd.f32 %v7983_v48, %v2205_v61 }
 0x417   : > { %v5531_v30 = vpop.f32.mrf.mxu0 }
 0x418   : > { %v7978_v63 = vpop.trf.xlu1  ;;  %v7989_v0 = vadd.f32 %v7983_v48, %v5531_v30  ;;  %9360 = vst [vmem:[#allocation67_spill] sm:$0xff] %v8001_v1  ;;  %v2429_v54 = vmul.f32 %v2397_v50, %v7986_v31  ;;  %v2396_v22 = vmul.f32 0.044715, %v8001_v1 }
 0x419   : > { %v2215_v46 = vpop.f32.mrf.mxu0  ;;  %9355 = vst [vmem:[#allocation62_spill] sm:$0xff] %v7978_v63 }
 0x41a   : > { %9357 = vst [vmem:[#allocation64_spill] sm:$0xff] %v7989_v0  ;;  %v7993_v35 = vadd.f32 %v7983_v48, %v2215_v46  ;;  %v2399_v28 = vmul.f32 0.044715, %v7989_v0  ;;  %v2461_v19 = vmul.f32 %v2429_v54, %v7986_v31  ;;  %v2428_v59 = vmul.f32 %v2396_v22, %v8001_v1 }
 0x41b   : > { %v5534_v3 = vpop.f32.mrf.mxu0 }
 0x41c   : > { %9358 = vst [vmem:[#allocation65_spill] sm:$0xff] %v7993_v35  ;;  %v7996_v51 = vadd.f32 %v7983_v48, %v5534_v3  ;;  %v7998_v58 = vpop.trf.xlu1  ;;  %v2398_v46 = vmul.f32 0.044715, %v7993_v35  ;;  %v2431_v41 = vmul.f32 %v2399_v28, %v7989_v0 }
 0x41d   : > { %v2225_v47 = vpop.f32.mrf.mxu0  ;;  %9359 = vst [vmem:[#allocation66_spill] sm:$0xff] %v7998_v58 }
 0x41e   : > { %v8005_v30 = vadd.f32 %v7983_v48, %v2225_v47  ;;  %v2401_v3 = vmul.f32 0.044715, %v7996_v51  ;;  %v2463_v54 = vmul.f32 %v2431_v41, %v7989_v0 }
 0x41f   : > { %v5537_v12 = vpop.f32.mrf.mxu0 }
 0x420   : > { %9361 = vst [vmem:[#allocation68_spill] sm:$0xff] %v8005_v30  ;;  %v8010_v40 = vadd.f32 %v7983_v48, %v5537_v12  ;;  %v2400_v47 = vmul.f32 0.044715, %v8005_v30  ;;  %v8025_v16 = vpop.trf.xlu1  ;;  %v2433_v28 = vmul.f32 %v2401_v3, %v7996_v51 }
 0x421   : > { %v2235_v49 = vpop.f32.mrf.mxu0  ;;  %9362 = vst [vmem:[#allocation69_spill] sm:$0xff] %v8025_v16 }
 0x422   : > { %v8014_v9 = vadd.f32 %v7983_v48, %v2235_v49  ;;  %v2430_v49 = vmul.f32 %v2398_v46, %v7993_v35  ;;  %v2403_v18 = vmul.f32 0.044715, %v8010_v40  ;;  %v2432_v46 = vmul.f32 %v2400_v47, %v8005_v30 }
 0x423   : > { %v5540_v6 = vpop.f32.mrf.mxu0  ;;  %v2465_v41 = vmul.f32 %v2433_v28, %v7996_v51 }
 0x424   : > { %v8020_v32 = vadd.f32 %v7983_v48, %v5540_v6  ;;  %v2402_v6 = vmul.f32 0.044715, %v8014_v9  ;;  %v2462_v27 = vmul.f32 %v2430_v49, %v7993_v35  ;;  %v2435_v14 = vmul.f32 %v2403_v18, %v8010_v40  ;;  %v8062_v26 = vpop.trf.xlu1 }
 0x425   : > { %v2245_v29 = vpop.f32.mrf.mxu0  ;;  %9363 = vst [vmem:[#allocation70_spill] sm:$0xff] %v8062_v26  ;;  %v2495_v49 = vadd.f32 %v2463_v54, %v7989_v0  ;;  %v2464_v18 = vmul.f32 %v2432_v46, %v8005_v30  ;;  %v2497_v46 = vadd.f32 %v2465_v41, %v7996_v51 }
 0x426   : > { %v8023_v50 = vadd.f32 %v7983_v48, %v2245_v29  ;;  %v2405_v23 = vmul.f32 0.044715, %v8020_v32  ;;  %v2434_v47 = vmul.f32 %v2402_v6, %v8014_v9  ;;  %v2494_v52 = vadd.f32 %v2462_v27, %v7993_v35 }
 0x427   : > { %v5543_v8 = vpop.f32.mrf.mxu0  ;;  %v2467_v2 = vmul.f32 %v2435_v14, %v8010_v40  ;;  %v2496_v20 = vadd.f32 %v2464_v18, %v8005_v30  ;;  %v2527_v14 = vmul.f32 0.7978846, %v2495_v49 }
 0x428   : > { %v8031_v4 = vadd.f32 %v7983_v48, %v5543_v8  ;;  %v2404_v8 = vmul.f32 0.044715, %v8023_v50  ;;  %v2437_v10 = vmul.f32 %v2405_v23, %v8020_v32  ;;  %v2466_v23 = vmul.f32 %v2434_v47, %v8014_v9  ;;  %v8095_v42 = vpop.trf.xlu1 }
 0x429   : > { %v2255_v33 = vpop.f32.mrf.mxu0  ;;  %9364 = vst [vmem:[#allocation71_spill] sm:$0xff] %v8095_v42  ;;  %v2526_v60 = vmul.f32 0.7978846, %v2494_v52  ;;  %v2528_v17 = vmul.f32 0.7978846, %v2496_v20 }
 0x42a   : > { %v8036_v7 = vadd.f32 %v7983_v48, %v2255_v33  ;;  %v2493_v33 = vadd.f32 %v2461_v19, %v7986_v31  ;;  %v2407_v22 = vmul.f32 0.044715, %v8031_v4  ;;  %v2460_v19 = vmul.f32 %v2428_v59, %v8001_v1 }
 0x42b   : > { %v5546_v36 = vpop.f32.mrf.mxu0  ;;  %v2436_v28 = vmul.f32 %v2404_v8, %v8023_v50  ;;  %v2469_v27 = vmul.f32 %v2437_v10, %v8020_v32  ;;  %v2498_v10 = vadd.f32 %v2466_v23, %v8014_v9 }
 0x42c   : > { %v8046_v56 = vadd.f32 %v7983_v48, %v5546_v36  ;;  %v2406_v24 = vmul.f32 0.044715, %v8036_v7  ;;  %v2439_v59 = vmul.f32 %v2407_v22, %v8031_v4  ;;  %v2525_v54 = vmul.f32 0.7978846, %v2493_v33 }
 0x42d   : > { %v2265_v21 = vpop.f32.mrf.mxu0  ;;  %v2468_v22 = vmul.f32 %v2436_v28, %v8023_v50  ;;  %v2501_v34 = vadd.f32 %v2469_v27, %v8020_v32 }
 0x42e   : > { %v8058_v38 = vadd.f32 %v7983_v48, %v2265_v21  ;;  %v2409_v6 = vmul.f32 0.044715, %v8046_v56  ;;  %v2438_v8 = vmul.f32 %v2406_v24, %v8036_v7  ;;  %v2471_v18 = vmul.f32 %v2439_v59, %v8031_v4 }
 0x42f   : > { %v5549_v61 = vpop.f32.mrf.mxu0  ;;  %6168 = vtanh.f32 %v2525_v54  ;;  %v2500_v43 = vadd.f32 %v2468_v22, %v8023_v50  ;;  %v8116_v22 = vpop.trf.xlu1 }
 0x430   : > { %v8071_v13 = vadd.f32 %v7983_v48, %v5549_v61  ;;  %v2408_v5 = vmul.f32 0.044715, %v8058_v38  ;;  %v2492_v61 = vadd.f32 %v2460_v19, %v8001_v1  ;;  %v2441_v33 = vmul.f32 %v2409_v6, %v8046_v56  ;;  %9365 = vst [vmem:[#allocation72_spill] sm:$0xff] %v8116_v22 }
 0x431   : > { %v2275_v12 = vpop.f32.mrf.mxu0  ;;  %v2499_v19 = vadd.f32 %v2467_v2, %v8010_v40  ;;  %v2470_v49 = vmul.f32 %v2438_v8, %v8036_v7  ;;  %6170 = vtanh.f32 %v2527_v14  ;;  %v2503_v23 = vadd.f32 %v2471_v18, %v8031_v4 }
 0x432   : > { %v2411_v41 = vmul.f32 0.044715, %v8071_v13  ;;  %v8091_v47 = vadd.f32 %v7983_v48, %v2275_v12  ;;  %v2440_v28 = vmul.f32 %v2408_v5, %v8058_v38  ;;  %v2529_v12 = vmul.f32 0.7978846, %v2497_v46 }
 0x433   : > { %v8038_v29 = vpop.f32.mrf.mxu0  ;;  %v2473_v2 = vmul.f32 %v2441_v33, %v8046_v56  ;;  %v2531_v5 = vmul.f32 0.7978846, %v2499_v19  ;;  %6172 = vtanh.f32 %v2526_v60  ;;  %v8112_v8 = vmul.f32 0.7978846, %v2492_v61 }
 0x434   : > { %v2443_v52 = vmul.f32 %v2411_v41, %v8071_v13  ;;  %v2410_v59 = vmul.f32 0.044715, %v8091_v47  ;;  %v2502_v46 = vadd.f32 %v2470_v49, %v8036_v7  ;;  %v2472_v20 = vmul.f32 %v2440_v28, %v8058_v38 }
 0x435   : > { %v8048_v3 = vpop.f32.mrf.mxu0  ;;  %v2530_v14 = vmul.f32 0.7978846, %v2498_v10  ;;  %6174 = vtanh.f32 %v2529_v12  ;;  %v8120_v33 = vadd.f32 %v7983_v48, %v8038_v29  ;;  %v8123_v41 = vmul.f32 0.5, %v8031_v4 }
 0x436   : > { %v2533_v19 = vmul.f32 0.7978846, %v2501_v34  ;;  %6176 = vtanh.f32 %v2528_v17  ;;  %v2505_v60 = vadd.f32 %v2473_v2, %v8046_v56  ;;  %v2475_v61 = vmul.f32 %v2443_v52, %v8071_v13 }
 0x437   : > { %v8060_v36 = vpop.f32.mrf.mxu0  ;;  %v2442_v18 = vmul.f32 %v2410_v59, %v8091_v47  ;;  %v2532_v10 = vmul.f32 0.7978846, %v2500_v43  ;;  %v8129_v28 = vmul.f32 0.5, %v8046_v56  ;;  %v2535_v12 = vmul.f32 0.7978846, %v2503_v23 }
 0x438   : > { %v8132_v29 = vmul.f32 0.5, %v8036_v7  ;;  %6178 = vtanh.f32 %v2531_v5  ;;  %v2504_v4 = vadd.f32 %v2472_v20, %v8058_v38  ;;  %v8136_v17 = vmul.f32 0.5, %v8058_v38  ;;  %v8148_v38 = vpop.trf.xlu1 }
 0x439   : > { %v8073_v21 = vpop.f32.mrf.mxu0  ;;  %v2534_v2 = vmul.f32 0.7978846, %v2502_v46  ;;  %6180 = vtanh.f32 %v2530_v14  ;;  %v2413_v52 = vmul.f32 0.044715, %v8120_v33  ;;  %v8141_v43 = vadd.f32 %v7983_v48, %v8048_v3  ;;  %9366 = vst [vmem:[#allocation73_spill] sm:$0xff] %v8148_v38 }
 0x43a   : > { %6182 = vtanh.f32 %v2533_v19  ;;  %v2507_v7 = vadd.f32 %v2475_v61, %v8071_v13  ;;  %v2474_v59 = vmul.f32 %v2442_v18, %v8091_v47  ;;  %v2537_v5 = vmul.f32 0.7978846, %v2505_v60 }
 0x43b   : > { %v8082_v55 = vpop.f32.mrf.mxu0  ;;  %6184 = vtanh.f32 %v2532_v10  ;;  %v8152_v46 = vadd.f32 %v7983_v48, %v8060_v36  ;;  %v8158_v20 = vmul.f32 0.5, %v8071_v13  ;;  %v8166_v61 = vmul.f32 0.5, %v8091_v47 }
 0x43c   : > { %6186 = vtanh.f32 %v2535_v12  ;;  %v8160_v14 = vpop.eup %6168  ;;  %v2536_v18 = vmul.f32 0.7978846, %v2504_v4  ;;  %v8169_v36 = vmul.f32 %v2413_v52, %v8120_v33  ;;  %v8172_v10 = vmul.f32 0.044715, %v8141_v43 }
 0x43d   : > { %v8093_v24 = vpop.f32.mrf.mxu0  ;;  %9367 = vst [vmem:[#allocation74_spill] sm:$0xff] %v8160_v14  ;;  %6188 = vtanh.f32 %v2534_v2  ;;  %v2539_v2 = vmul.f32 0.7978846, %v2507_v7  ;;  %v8185_v52 = vmul.f32 0.044715, %v8152_v46  ;;  %v8255_v14 = vadd.f32 %v7983_v48, %v8073_v21 }
 0x43e   : > { %6190 = vtanh.f32 %v2537_v5  ;;  %v8203_v5 = vpop.trf.xlu1  ;;  %v8240_v63 = vadd.f32 %v7983_v48, %v8093_v24 }
 0x43f   : > { %v8102_v6 = vpop.f32.mrf.mxu0  ;;  %6192 = vtanh.f32 %v2536_v18  ;;  %9370 = vst [vmem:[#allocation77_spill] sm:$0xff] %v8203_v5 }
 0x440   : > { %6194 = vtanh.f32 %v2539_v2 }
 0x441   : > { %v8109_v54 = vpop.f32.mrf.mxu0 }
 0x442   : > { %v8245_v25 = vpop.trf.xlu1 }
 0x443   : > { %v5564_v27 = vpop.f32.mrf.mxu0  ;;  %9371 = vst [vmem:[#allocation78_spill] sm:$0xff] %v8245_v25 }
 0x444   : > { %v8163_v19 = vadd.f32 %v7983_v48, %v5564_v27  ;;  %v2506_v27 = vadd.f32 %v2474_v59, %v8091_v47  ;;  %v8196_v47 = vadd.f32 %v7983_v48, %v8082_v55 }
 0x445   : > { %v2325_v49 = vpop.f32.mrf.mxu0 }
 0x446   : > { %v2421_v7 = vmul.f32 0.044715, %v8163_v19  ;;  %v2538_v5 = vmul.f32 0.7978846, %v2506_v27  ;;  %v2417_v42 = vmul.f32 0.044715, %v8196_v47 }
 0x447   : > { %v5567_v34 = vpop.f32.mrf.mxu0 }
 0x448   : > { %v8144_v56 = vadd.f32 %v7983_v48, %v5567_v34  ;;  %v8178_v34 = vpop.eup %6170  ;;  %v2453_v26 = vmul.f32 %v2421_v7, %v8163_v19  ;;  %6196 = vtanh.f32 %v2538_v5 }
 0x449   : > { %v2335_v23 = vpop.f32.mrf.mxu0  ;;  %9368 = vst [vmem:[#allocation75_spill] sm:$0xff] %v8178_v34  ;;  %v8192_v53 = vpop.eup %6172 }
 0x44a   : > { %v8155_v3 = vadd.f32 %v7983_v48, %v2335_v23  ;;  %v2423_v13 = vmul.f32 0.044715, %v8144_v56  ;;  %v8182_v23 = vadd.f32 %v7983_v48, %v2325_v49  ;;  %9369 = vst [vmem:[#allocation76_spill] sm:$0xff] %v8192_v53  ;;  %v8200_v49 = vadd.f32 %v7983_v48, %v8102_v6  ;;  %v8205_v45 = vpop.eup %6174 }
 0x44b   : > { %v5570_v60 = vpop.f32.mrf.mxu0  ;;  %v8213_v11 = vpop.eup %6176  ;;  %v8217_v6 = vadd.f32 %v7983_v48, %v8109_v54  ;;  %v2416_v53 = vmul.f32 0.044715, %v8240_v63 }
 0x44c   : > { %v8176_v12 = vadd.f32 %v7983_v48, %v5570_v60  ;;  %v2422_v44 = vmul.f32 0.044715, %v8155_v3  ;;  %v2420_v18 = vmul.f32 0.044715, %v8182_v23  ;;  %v8226_v22 = vpop.eup %6178  ;;  %v2419_v54 = vmul.f32 0.044715, %v8200_v49 }
 0x44d   : > { %v2345_v4 = vpop.f32.mrf.mxu0  ;;  %v8232_v27 = vpop.eup %6180  ;;  %v2418_v39 = vmul.f32 0.044715, %v8217_v6 }
 0x44e   : > { %v2425_v57 = vmul.f32 0.044715, %v8176_v12  ;;  %v8190_v60 = vadd.f32 %v7983_v48, %v2345_v4  ;;  %v2455_v4 = vmul.f32 %v2423_v13, %v8144_v56  ;;  %v2454_v13 = vmul.f32 %v2422_v44, %v8155_v3  ;;  %v6183_v58 = vpop.eup %6182 }
 0x44f   : > { %v5573_v59 = vpop.f32.mrf.mxu0  ;;  %v2452_v7 = vmul.f32 %v2420_v18, %v8182_v23  ;;  %v2451_v18 = vmul.f32 %v2419_v54, %v8200_v49  ;;  %v2450_v5 = vmul.f32 %v2418_v39, %v8217_v6  ;;  %v2448_v39 = vmul.f32 %v2416_v53, %v8240_v63 }
 0x450   : > { %v2457_v37 = vmul.f32 %v2425_v57, %v8176_v12  ;;  %v2424_v15 = vmul.f32 0.044715, %v8190_v60  ;;  %v8211_v55 = vadd.f32 %v7983_v48, %v5573_v59  ;;  %v2486_v31 = vmul.f32 %v2454_v13, %v8155_v3 }
 0x451   : > { %v2355_v62 = vpop.f32.mrf.mxu0  ;;  %v2449_v13 = vmul.f32 %v2417_v42, %v8196_v47  ;;  %v2483_v42 = vmul.f32 %v2451_v18, %v8200_v49 }
 0x452   : > { %v2456_v57 = vmul.f32 %v2424_v15, %v8190_v60  ;;  %v2427_v38 = vmul.f32 0.044715, %v8211_v55  ;;  %v8224_v59 = vadd.f32 %v7983_v48, %v2355_v62  ;;  %v2489_v2 = vmul.f32 %v2457_v37, %v8176_v12 }
 0x453   : > { %v2487_v62 = vmul.f32 %v2455_v4, %v8144_v56  ;;  %v2484_v48 = vmul.f32 %v2452_v7, %v8182_v23 }
 0x454   : > { %v2459_v44 = vmul.f32 %v2427_v38, %v8211_v55  ;;  %v2426_v15 = vmul.f32 0.044715, %v8224_v59  ;;  %v2488_v16 = vmul.f32 %v2456_v57, %v8190_v60  ;;  %v2521_v37 = vadd.f32 %v2489_v2, %v8176_v12  ;;  %v8247_v38 = vpop.eup %6184 }
 0x455   : > { %v6187_v24 = vpop.eup %6186 }
 0x456   : > { %v2458_v1 = vmul.f32 %v2426_v15, %v8224_v59  ;;  %v2491_v57 = vmul.f32 %v2459_v44, %v8211_v55  ;;  %v2520_v4 = vadd.f32 %v2488_v16, %v8190_v60  ;;  %v2553_v2 = vmul.f32 0.7978846, %v2521_v37  ;;  %v6189_v25 = vpop.eup %6188 }
 0x457   : > { %v2519_v44 = vadd.f32 %v2487_v62, %v8144_v56  ;;  %v2485_v16 = vmul.f32 %v2453_v26, %v8163_v19  ;;  %v6191_v21 = vpop.eup %6190  ;;  %v2414_v26 = vmul.f32 0.044715, %v8255_v14  ;;  %v8272_v62 = vpop.trf.xlu1 }
 0x458   : > { %v2523_v35 = vadd.f32 %v2491_v57, %v8211_v55  ;;  %v2490_v15 = vmul.f32 %v2458_v1, %v8224_v59  ;;  %v2552_v0 = vmul.f32 0.7978846, %v2520_v4  ;;  %v2518_v57 = vadd.f32 %v2486_v31, %v8155_v3  ;;  %9372 = vst [vmem:[#allocation79_spill] sm:$0xff] %v8272_v62  ;;  %v6193_v4 = vpop.eup %6192 }
 0x459   : > { %v2447_v1 = vmul.f32 %v8185_v52, %v8152_v46  ;;  %6198 = vtanh.f32 %v2553_v2  ;;  %v2551_v34 = vmul.f32 0.7978846, %v2519_v44  ;;  %v2516_v31 = vadd.f32 %v2484_v48, %v8182_v23 }
 0x45a   : > { %v2555_v54 = vmul.f32 0.7978846, %v2523_v35  ;;  %v2522_v37 = vadd.f32 %v2490_v15, %v8224_v59  ;;  %v2517_v35 = vadd.f32 %v2485_v16, %v8163_v19  ;;  %v2481_v52 = vmul.f32 %v2449_v13, %v8196_v47  ;;  %v6195_v15 = vpop.eup %6194 }
 0x45b   : > { %v2444_v2 = vmul.f32 %v8172_v10, %v8141_v43  ;;  %v2550_v18 = vmul.f32 0.7978846, %v2518_v57  ;;  %v2482_v62 = vmul.f32 %v2450_v5, %v8217_v6  ;;  %v2599_v44 = vadd.f32 1.0, %v6187_v24  ;;  %v8288_v57 = vpop.trf.xlu1 }
 0x45c   : > { %6200 = vtanh.f32 %v2555_v54  ;;  %v2554_v7 = vmul.f32 0.7978846, %v2522_v37  ;;  %v2446_v54 = vmul.f32 %v2414_v26, %v8255_v14  ;;  %v8282_v37 = vadd.f32 1.0, %v6183_v58  ;;  %v6197_v26 = vpop.eup %6196 }
 0x45d   : > { %6202 = vtanh.f32 %v2552_v0  ;;  %v2479_v53 = vmul.f32 %v2447_v1, %v8152_v46  ;;  %v2549_v0 = vmul.f32 0.7978846, %v2517_v35  ;;  %v2515_v16 = vadd.f32 %v2483_v42, %v8200_v49 }
 0x45e   : > { %6204 = vtanh.f32 %v2554_v7  ;;  %v2601_v13 = vadd.f32 1.0, %v6191_v21  ;;  %v2548_v48 = vmul.f32 0.7978846, %v2516_v31  ;;  %v2513_v30 = vadd.f32 %v2481_v52, %v8196_v47 }
 0x45f   : > { %6206 = vtanh.f32 %v2551_v34  ;;  %v2480_v10 = vmul.f32 %v2448_v39, %v8240_v63  ;;  %v2514_v5 = vadd.f32 %v2482_v62, %v8217_v6  ;;  %v2603_v24 = vadd.f32 1.0, %v6195_v15  ;;  %v8303_v15 = vpop.trf.xlu1 }
 0x460   : > { %6208 = vtanh.f32 %v2550_v18  ;;  %v8292_v58 = vmul.f32 %v2599_v44, %v8123_v41  ;;  %v8294_v1 = vadd.f32 1.0, %v6189_v25  ;;  %v2511_v34 = vadd.f32 %v2479_v53, %v8152_v46 }
 0x461   : > { %6210 = vtanh.f32 %v2549_v0  ;;  %v2547_v21 = vmul.f32 0.7978846, %v2515_v16  ;;  %v2545_v42 = vmul.f32 0.7978846, %v2513_v30  ;;  %v2512_v7 = vadd.f32 %v2480_v10, %v8240_v63 }
 0x462   : > { %6212 = vtanh.f32 %v2548_v48  ;;  %v2478_v35 = vmul.f32 %v2446_v54, %v8255_v14  ;;  %v2633_v39 = vmul.f32 %v2601_v13, %v8129_v28  ;;  %v2546_v62 = vmul.f32 0.7978846, %v2514_v5 }
 0x463   : > { %v2635_v31 = vmul.f32 %v2603_v24, %v8158_v20  ;;  %v2602_v41 = vadd.f32 1.0, %v6197_v26  ;;  %v2600_v52 = vadd.f32 1.0, %v6193_v4  ;;  %v2477_v25 = vmul.f32 %v8169_v36, %v8120_v33 }
 0x464   : > { %v2395_v44 = vmul.f32 0.5, %v8211_v55  ;;  %6214 = vtanh.f32 %v2547_v21  ;;  %v2394_v53 = vmul.f32 0.5, %v8224_v59  ;;  %v2544_v54 = vmul.f32 0.7978846, %v2512_v7  ;;  %v8312_v21 = vpop.trf.xlu1 }
 0x465   : > { %v2510_v28 = vadd.f32 %v2478_v35, %v8255_v14  ;;  %v2476_v0 = vmul.f32 %v2444_v2, %v8141_v43  ;;  %6216 = vtanh.f32 %v2546_v62  ;;  %v2543_v36 = vmul.f32 0.7978846, %v2511_v34 }
 0x466   : > { %v6199_v18 = vpop.eup %6198  ;;  %6218 = vtanh.f32 %v2545_v42  ;;  %v2509_v48 = vadd.f32 %v2477_v25, %v8120_v33  ;;  %v2393_v24 = vmul.f32 0.5, %v8176_v12  ;;  %v2634_v34 = vmul.f32 %v2602_v41, %v8166_v61 }
 0x467   : > { %v2617_v13 = vadd.f32 1.0, %v6199_v18  ;;  %6220 = vtanh.f32 %v2544_v54  ;;  %v2542_v59 = vmul.f32 0.7978846, %v2510_v28  ;;  %v2508_v26 = vadd.f32 %v2476_v0, %v8141_v43 }
 0x468   : > { %v2392_v42 = vmul.f32 0.5, %v8190_v60  ;;  %6222 = vtanh.f32 %v2543_v36  ;;  %v2541_v12 = vmul.f32 0.7978846, %v2509_v48  ;;  %v2632_v61 = vmul.f32 %v2600_v52, %v8136_v17 }
 0x469   : > { %v6201_v30 = vpop.eup %6200  ;;  %v2649_v62 = vmul.f32 %v2617_v13, %v2393_v24  ;;  %6224 = vtanh.f32 %v2542_v59  ;;  %v2540_v28 = vmul.f32 0.7978846, %v2508_v26  ;;  %v2390_v60 = vmul.f32 0.5, %v8155_v3 }
 0x46a   : > { %v6203_v20 = vpop.eup %6202  ;;  %v2619_v16 = vadd.f32 1.0, %v6201_v30  ;;  %6226 = vtanh.f32 %v2541_v12  ;;  %v2630_v17 = vmul.f32 %v8294_v1, %v8132_v29  ;;  %v2373_v3 = vmul.f32 0.5, %v8020_v32  ;;  %v9373_v12 = vld [vmem:[#allocation68_spill] sm:$0xff] }
 0x46b   : > { %v6205_v4 = vpop.eup %6204  ;;  %v2616_v7 = vadd.f32 1.0, %v6203_v20  ;;  %6228 = vtanh.f32 %v2540_v28  ;;  %v2370_v26 = vmul.f32 0.5, %v8014_v9  ;;  %v9375_v28 = vld [vmem:[#allocation64_spill] sm:$0xff] }
 0x46c   : > { %v2651_v10 = vmul.f32 %v2619_v16, %v2395_v44  ;;  %v2618_v55 = vadd.f32 1.0, %v6205_v4  ;;  %v6207_v5 = vpop.eup %6206  ;;  %v2391_v44 = vmul.f32 0.5, %v8144_v56  ;;  %v2389_v56 = vmul.f32 0.5, %v8163_v19 }
 0x46d   : > { %v6209_v35 = vpop.eup %6208  ;;  %v2615_v25 = vadd.f32 1.0, %v6207_v5  ;;  %6230 = vtanh.f32 %v8112_v8  ;;  %v2388_v19 = vmul.f32 0.5, %v8182_v23  ;;  %v2371_v5 = vmul.f32 0.5, %v8010_v40 }
 0x46e   : > { %5038 = vmatprep.subr.mxu1 %v2651_v10  ;;  %v2650_v2 = vmul.f32 %v2618_v55, %v2394_v53  ;;  %v6211_v18 = vpop.eup %6210  ;;  %v2648_v53 = vmul.f32 %v2616_v7, %v2392_v42  ;;  %v2614_v54 = vadd.f32 1.0, %v6209_v35  ;;  %v2629_v10 = vmul.f32 %v8282_v37, %v2373_v3 }
 0x46f   : > { %5039 = vmatpush3.msra.mxu1 %v2635_v31  ;;  %v6213_v30 = vpop.eup %6212  ;;  %v8319_v31 = vpop.trf.xlu1  ;;  %v2647_v41 = vmul.f32 %v2615_v25, %v2391_v44  ;;  %v2613_v0 = vadd.f32 1.0, %v6211_v18  ;;  %v2595_v55 = vadd.f32 1.0, %v8226_v22  ;;  %v2594_v23 = vadd.f32 1.0, %v8232_v27  ;;  %v9374_v44 = vld [vmem:[#allocation75_spill] sm:$0xff] }
 0x470   : > { %5040 = vmatprep.subr.mxu1 %v2650_v2  ;;  %v2612_v16 = vadd.f32 1.0, %v6213_v30  ;;  %v2646_v4 = vmul.f32 %v2614_v54, %v2390_v60  ;;  %v2386_v37 = vmul.f32 0.5, %v8217_v6  ;;  %v2593_v2 = vadd.f32 1.0, %v8205_v45  ;;  %v9376_v60 = vld [vmem:[#allocation76_spill] sm:$0xff] }
 0x471   : > { %5041 = vmatpush3.msra.mxu1 %v2634_v34  ;;  %v6215_v20 = vpop.eup %6214  ;;  %v2645_v36 = vmul.f32 %v2613_v0, %v2389_v56  ;;  %v2627_v22 = vmul.f32 %v2595_v55, %v2371_v5  ;;  %v2385_v35 = vmul.f32 0.5, %v8196_v47  ;;  %v2626_v27 = vmul.f32 %v2594_v23, %v2370_v26  ;;  %v9382_v5 = vld [vmem:[#allocation61_spill] sm:$0xff]  ;;  %v2962_v26 = vld [vmem:[#allocation2 + $0x100] sm:$0xff] }
 0x472   : > { %5042 = vmatprep.subr.mxu1 %v2649_v62  ;;  %v6217_v13 = vpop.eup %6216  ;;  %v2611_v48 = vadd.f32 1.0, %v6215_v20  ;;  %v2644_v32 = vmul.f32 %v2612_v16, %v2388_v19  ;;  %v2369_v34 = vmul.f32 0.5, %v7996_v51  ;;  %v2592_v42 = vadd.f32 1.0, %v8213_v11  ;;  %v9379_v19 = vld [vmem:[#allocation63_spill] sm:$0xff] }
 0x473   : > { %5043 = vmatpush3.msra.mxu1 %v2633_v39  ;;  %v2596_v39 = vadd.f32 1.0, %v8247_v38  ;;  %v6219_v52 = vpop.eup %6218  ;;  %v2387_v38 = vmul.f32 0.5, %v8200_v49  ;;  %v2610_v1 = vadd.f32 1.0, %v6217_v13  ;;  %v2384_v62 = vmul.f32 0.5, %v8240_v63 }
 0x474   : > { %5044 = vmatprep.subr.mxu1 %v2648_v53  ;;  %v6221_v29 = vpop.eup %6220  ;;  %v2625_v45 = vmul.f32 %v2593_v2, %v2369_v34  ;;  %v2368_v18 = vmul.f32 0.5, %v9373_v12  ;;  %v2591_v30 = vadd.f32 1.0, %v9374_v44  ;;  %v2383_v53 = vmul.f32 0.5, %v8152_v46 }
 0x475   : > { %5045 = vmatpush3.msra.mxu1 %v2632_v61  ;;  %v6223_v24 = vpop.eup %6222  ;;  %v2643_v59 = vmul.f32 %v2611_v48, %v2387_v38  ;;  %v2642_v7 = vmul.f32 %v2610_v1, %v2386_v37  ;;  %v2608_v40 = vadd.f32 1.0, %v6221_v29  ;;  %v2367_v61 = vmul.f32 0.5, %v9375_v28  ;;  %v9380_v29 = vld [vmem:[#allocation67_spill] sm:$0xff]  ;;  %v9381_v38 = vld [vmem:[#allocation60_spill] sm:$0xff] }
 0x476   : > { %5046 = vmatprep.subr.mxu1 %v2647_v41  ;;  %v6225_v49 = vpop.eup %6224  ;;  %v2607_v25 = vadd.f32 1.0, %v6223_v24  ;;  %v2624_v11 = vmul.f32 %v2592_v42, %v2368_v18  ;;  %v2590_v63 = vadd.f32 1.0, %v9376_v60  ;;  %v2382_v20 = vmul.f32 0.5, %v8255_v14  ;;  %v2965_v24 = vld [vmem:[#allocation2 + $0x118] sm:$0xff]  ;;  %v9388_v18 = vld [vmem:[#allocation72_spill] sm:$0xff] }
 0x477   : > { %5047 = vmatpush3.msra.mxu1 %v8292_v58  ;;  %v2372_v58 = vmul.f32 0.5, %v8023_v50  ;;  %v2609_v50 = vadd.f32 1.0, %v6219_v52  ;;  %v6227_v9 = vpop.eup %6226  ;;  %v2640_v47 = vmul.f32 %v2608_v40, %v2384_v62  ;;  %v2606_v54 = vadd.f32 1.0, %v6225_v49  ;;  %v9384_v49 = vld [vmem:[#allocation66_spill] sm:$0xff] }
 0x478   : > { %5048 = vmatprep.subr.mxu1 %v2646_v4  ;;  %v6229_v51 = vpop.eup %6228  ;;  %v2639_v0 = vmul.f32 %v2607_v25, %v2383_v53  ;;  %v2605_v56 = vadd.f32 1.0, %v6227_v9  ;;  %v2623_v16 = vmul.f32 %v2591_v30, %v2367_v61  ;;  %v9377_v4 = vld [vmem:[#allocation65_spill] sm:$0xff]  ;;  %v2365_v48 = vmul.f32 0.5, %v9379_v19  ;;  %v9387_v9 = vld [vmem:[#allocation71_spill] sm:$0xff]  ;;  %v9391_v61 = vld [vmem:[#allocation78_spill] sm:$0xff] }
 0x479   : > { %5049 = vmatpush3.msra.mxu1 %v2630_v17  ;;  %v2628_v8 = vmul.f32 %v2596_v39, %v2372_v58  ;;  %v2641_v6 = vmul.f32 %v2609_v50, %v2385_v35  ;;  %v2366_v13 = vmul.f32 0.5, %v9377_v4  ;;  %v9378_v17 = vld [vmem:[#allocation74_spill] sm:$0xff]  ;;  %v2638_v3 = vmul.f32 %v2606_v54, %v2382_v20  ;;  %v2960_v35 = vld [vmem:[#allocation2 + $0xf8] sm:$0xff] }
 0x47a   : > { %5050 = vmatprep.subr.mxu1 %v2645_v36  ;;  %v6231_v41 = vpop.eup %6230  ;;  %v2589_v46 = vadd.f32 1.0, %v9378_v17  ;;  %v2381_v39 = vmul.f32 0.5, %v8120_v33  ;;  %v2604_v52 = vadd.f32 1.0, %v6229_v51  ;;  %v2380_v14 = vmul.f32 0.5, %v8141_v43  ;;  %v9383_v43 = vld [vmem:[#allocation62_spill] sm:$0xff]  ;;  %v9390_v51 = vld [vmem:[#allocation77_spill] sm:$0xff] }
 0x47b   : > { %5051 = vmatpush3.msra.mxu1 %v2629_v10  ;;  %v2622_v36 = vmul.f32 %v2590_v63, %v2366_v13  ;;  %v2588_v10 = vadd.f32 1.0, %v6231_v41  ;;  %v6028_v1 = vunpack.i.h.bf16 %v9381_v38  ;;  %v6030_v23 = vunpack.i.l.bf16 %v9382_v5  ;;  %v9392_v41 = vld [vmem:[#allocation79_spill] sm:$0xff] }
 0x47c   : > { %5052 = vmatprep.subr.mxu1 %v2644_v32  ;;  %v2637_v58 = vmul.f32 %v2605_v56, %v2381_v39  ;;  %v2621_v55 = vmul.f32 %v2589_v46, %v2365_v48  ;;  %v2364_v32 = vmul.f32 0.5, %v9380_v29  ;;  %v6033_v37 = vunpack.i.h.bf16 %v9382_v5  ;;  %v6357_v19 = vld [vmem:[%s6534_s16 + $0x18] sm:$0xff]  ;;  %v6358_v48 = vld [vmem:[%s6534_s16 + $0x20] sm:$0xff]  ;;  %v2954_v29 = vld [vmem:[#allocation2 + $0xc8] sm:$0xff] }
 0x47d   : > { %5053 = vmatpush3.msra.mxu1 %v2628_v8  ;;  %v2636_v8 = vmul.f32 %v2604_v52, %v2380_v14  ;;  %v6035_v50 = vunpack.i.l.bf16 %v9383_v43  ;;  %v6038_v2 = vunpack.i.h.bf16 %v9383_v43  ;;  %v6043_v40 = vunpack.i.h.bf16 %v9384_v49  ;;  %v6355_v52 = vld [vmem:[%s6534_s16 + $0x8] sm:$0xff]  ;;  %v6361_v38 = vld [vmem:[%s6534_s16 + $0x38] sm:$0xff]  ;;  %v6366_v43 = vld [vmem:[%s6534_s16 + $0x60] sm:$0xff] }
 0x47e   : > { %5054 = vmatprep.subr.mxu1 %v2643_v59  ;;  %v2620_v33 = vmul.f32 %v2588_v10, %v2364_v32  ;;  %v2964_v59 = vld [vmem:[#allocation2 + $0x110] sm:$0xff]  ;;  %v6058_v12 = vunpack.i.h.bf16 %v9387_v9  ;;  %v6060_v44 = vunpack.i.l.bf16 %v9388_v18  ;;  %v6063_v30 = vunpack.i.h.bf16 %v9388_v18  ;;  %v2956_v10 = vld [vmem:[#allocation2 + $0xd8] sm:$0xff]  ;;  %v6359_v14 = vld [vmem:[%s6534_s16 + $0x28] sm:$0xff] }
 0x47f   : > { %5055 = vmatpush3.msra.mxu1 %v2627_v22  ;;  %v2963_v22 = vld [vmem:[#allocation2 + $0x108] sm:$0xff]  ;;  %v6073_v28 = vunpack.i.h.bf16 %v9390_v51  ;;  %v6075_v60 = vunpack.i.l.bf16 %v9391_v61  ;;  %v6078_v63 = vunpack.i.h.bf16 %v9391_v61  ;;  %v6083_v20 = vunpack.i.h.bf16 %v9392_v41  ;;  %v2953_v32 = vld [vmem:[#allocation2 + $0xc0] sm:$0xff] }
 0x480   : > { %5056 = vmatprep.subr.mxu1 %v2642_v7  ;;  %v6040_v7 = vunpack.i.l.bf16 %v9384_v49  ;;  %v6085_v56 = vunpack.i.l.bf16 %v8288_v57  ;;  %v6090_v4 = vunpack.i.l.bf16 %v8303_v15  ;;  %v6093_v13 = vunpack.i.h.bf16 %v8303_v15  ;;  %v2959_v15 = vld [vmem:[#allocation2 + $0xf0] sm:$0xff]  ;;  %v6363_v5 = vld [vmem:[%s6534_s16 + $0x48] sm:$0xff] }
 0x481   : > { %5057 = vmatpush3.msra.mxu1 %v2626_v27  ;;  %v9385_v27 = vld [vmem:[#allocation69_spill] sm:$0xff]  ;;  %v6095_v17 = vunpack.i.l.bf16 %v8312_v21  ;;  %v6098_v46 = vunpack.i.h.bf16 %v8312_v21  ;;  %v6103_v39 = vunpack.i.h.bf16 %v8319_v31 }
 0x482   : > { %5058 = vmatprep.subr.mxu1 %v2641_v6  ;;  %v6045_v34 = vunpack.i.l.bf16 %v9385_v27  ;;  %v6048_v42 = vunpack.i.h.bf16 %v9385_v27  ;;  %v9386_v6 = vld [vmem:[#allocation70_spill] sm:$0xff]  ;;  %v2958_v21 = vld [vmem:[#allocation2 + $0xe8] sm:$0xff] }
 0x483   : > { %5059 = vmatpush3.msra.mxu1 %v2625_v45  ;;  %v6050_v62 = vunpack.i.l.bf16 %v9386_v6  ;;  %v6053_v25 = vunpack.i.h.bf16 %v9386_v6  ;;  %v6055_v45 = vunpack.i.l.bf16 %v9387_v9  ;;  %v2946_v49 = vld [vmem:[#allocation2 + $0x88] sm:$0xff] }
 0x484   : > { %5060 = vmatprep.subr.mxu1 %v2640_v47  ;;  %v9389_v47 = vld [vmem:[#allocation73_spill] sm:$0xff] }
 0x485   : > { %5061 = vmatpush3.msra.mxu1 %v2624_v11  ;;  %v6065_v53 = vunpack.i.l.bf16 %v9389_v47  ;;  %v6068_v54 = vunpack.i.h.bf16 %v9389_v47  ;;  %v6070_v11 = vunpack.i.l.bf16 %v9390_v51  ;;  %v9396_v51 = vld [vmem:[#allocation59_spill] sm:$0xff] }
 0x486   : > { %5062 = vmatprep.subr.mxu1 %v2639_v0  ;;  %v6080_v0 = vunpack.i.l.bf16 %v9392_v41 }
 0x487   : > { %5063 = vmatpush3.msra.mxu1 %v2623_v16  ;;  %v6088_v16 = vunpack.i.h.bf16 %v8288_v57  ;;  %v6354_v57 = vld [vmem:[%s6534_s16] sm:$0xff] }
 0x488   : > { %5064 = vmatprep.subr.mxu1 %v2638_v3  ;;  %v6100_v3 = vunpack.i.l.bf16 %v8319_v31  ;;  %v2957_v31 = vld [vmem:[#allocation2 + $0xe0] sm:$0xff] }
 0x489   : > { %5065 = vmatpush3.msra.mxu1 %v2622_v36  ;;  %v6356_v36 = vld [vmem:[%s6534_s16 + $0x10] sm:$0xff] }
 0x48a   : > { %5066 = vmatprep.subr.mxu1 %v2637_v58  ;;  %v2955_v58 = vld [vmem:[#allocation2 + $0xd0] sm:$0xff] }
 0x48b   : > { %5067 = vmatpush3.msra.mxu1 %v2621_v55  ;;  %v6360_v55 = vld [vmem:[%s6534_s16 + $0x30] sm:$0xff] }
 0x48c   : > { %5068 = vmatprep.subr.mxu1 %v2636_v8  ;;  %v2952_v8 = vld [vmem:[#allocation2 + $0xb8] sm:$0xff] }
 0x48d   : > { %5069 = vmatpush3.msra.mxu1 %v2620_v33  ;;  %v2951_v33 = vld [vmem:[#allocation2 + $0xb0] sm:$0xff] }
 0x48e   : > { %2845 = vmatmul.mubr.f32.vlgmr.msra.gmra.mxu1 %v6028_v1  ;;  %5574 = vmatprep.subr.mxu1 %v2965_v24  ;;  %v6362_v1 = vld [vmem:[%s6534_s16 + $0x40] sm:$0xff] }
 0x48f   : > { %2849 = vmatprep.mubr.f32.mxu1 %v6030_v23  ;;  %5575 = vmatpush3.msra.mxu1 %v2965_v24  ;;  %v6364_v23 = vld [vmem:[%s6534_s16 + $0x50] sm:$0xff]  ;;  %v2950_v24 = vld [vmem:[#allocation2 + $0xa8] sm:$0xff] }
 0x490   : > { %5576 = vmatprep.subr.mxu1 %v2964_v59 }
 0x491   : > { %5577 = vmatpush3.msra.mxu1 %v2964_v59  ;;  %v2949_v59 = vld [vmem:[#allocation2 + $0xa0] sm:$0xff] }
 0x492   : > { %2850 = vmatmul.mubr.f32.gmra.mxu1 %v6033_v37  ;;  %5578 = vmatprep.subr.mxu1 %v2963_v22  ;;  %v6365_v37 = vld [vmem:[%s6534_s16 + $0x58] sm:$0xff] }
 0x493   : > { %2854 = vmatprep.mubr.f32.mxu1 %v6035_v50  ;;  %5579 = vmatpush3.msra.mxu1 %v2963_v22  ;;  %v2948_v50 = vld [vmem:[#allocation2 + $0x98] sm:$0xff]  ;;  %v2947_v22 = vld [vmem:[#allocation2 + $0x90] sm:$0xff] }
 0x494   : > { %5580 = vmatprep.subr.mxu1 %v2962_v26 }
 0x495   : > { %5581 = vmatpush3.msra.mxu1 %v2962_v26  ;;  %v6367_v26 = vld [vmem:[%s6534_s16 + $0x68] sm:$0xff] }
 0x496   : > { %2855 = vmatmul.mubr.f32.gmra.mxu1 %v6038_v2  ;;  %5606 = vmatprep.subr.mxu1 %v2960_v35  ;;  %v6368_v2 = vld [vmem:[%s6534_s16 + $0x70] sm:$0xff] }
 0x497   : > { %2859 = vmatprep.mubr.f32.mxu1 %v6040_v7  ;;  %v2945_v7 = vld [vmem:[#allocation2 + $0x80] sm:$0xff] }
 0x49a   : > { %2860 = vmatmul.mubr.f32.gmra.mxu1 %v6043_v40  ;;  %v9393_v40 = vlaneseq }
 0x49b   : > { %2864 = vmatprep.mubr.f32.mxu1 %v6045_v34 }
 0x49c   : > { %v8418_v27 = vand.u32 127, %v9393_v40 }
 0x49e   : > { %2865 = vmatmul.mubr.f32.gmra.mxu1 %v6048_v42  ;;  %vm2927_vm14 = vcmp.lt.s32.totalorder %v8418_v27, 64  ;;  %v3478_v27 = vld [vmem:[#allocation2 + $0x1c0] sm:$0xff] }
 0x49f   : > { %2869 = vmatprep.mubr.f32.mxu1 %v6050_v62 }
 0x4a2   : > { %2870 = vmatmul.mubr.f32.gmra.mxu1 %v6053_v25  ;;  %v9394_v25 = vld [vmem:[#allocation58_spill] sm:$0xff] }
 0x4a3   : > { %2874 = vmatprep.mubr.f32.mxu1 %v6055_v45 }
 0x4a6   : > { %2875 = vmatmul.mubr.f32.gmra.mxu1 %v6058_v12 }
 0x4a7   : > { %2879 = vmatprep.mubr.f32.mxu1 %v6060_v44  ;;  %v9395_v44 = vld [vmem:[#allocation47_spill] sm:$0xff] }
 0x4aa   : > { %2880 = vmatmul.mubr.f32.gmra.mxu1 %v6063_v30 }
 0x4ab   : > { %2884 = vmatprep.mubr.f32.mxu1 %v6065_v53 }
 0x4ae   : > { %2885 = vmatmul.mubr.f32.gmra.mxu1 %v6068_v54 }
 0x4af   : > { %2889 = vmatprep.mubr.f32.mxu1 %v6070_v11 }
 0x4b2   : > { %2890 = vmatmul.mubr.f32.gmra.mxu1 %v6073_v28 }
 0x4b3   : > { %2894 = vmatprep.mubr.f32.mxu1 %v6075_v60 }
 0x4b6   : > { %2895 = vmatmul.mubr.f32.gmra.mxu1 %v6078_v63  ;;  %v9397_v63 = vld [vmem:[#allocation49_spill] sm:$0xff] }
 0x4b7   : > { %2899 = vmatprep.mubr.f32.mxu1 %v6080_v0 }
 0x4ba   : > { %2900 = vmatmul.mubr.f32.gmra.mxu1 %v6083_v20 }
 0x4bb   : > { %2904 = vmatprep.mubr.f32.mxu1 %v6085_v56 }
 0x4be   : > { %2905 = vmatmul.mubr.f32.gmra.mxu1 %v6088_v16  ;;  %v9398_v16 = vld [vmem:[#allocation56_spill] sm:$0xff] }
 0x4bf   : > { %2909 = vmatprep.mubr.f32.mxu1 %v6090_v4 }
 0x4c2   : > { %2910 = vmatmul.mubr.f32.gmra.mxu1 %v6093_v13 }
 0x4c3   : > { %2914 = vmatprep.mubr.f32.mxu1 %v6095_v17 }
 0x4c6   : > { %2915 = vmatmul.mubr.f32.gmra.mxu1 %v6098_v46 }
 0x4c7   : > { %2919 = vmatprep.mubr.f32.mxu1 %v6100_v3  ;;  %v9399_v3 = vld [vmem:[#allocation45_spill] sm:$0xff] }
 0x4ca   : > { %2920 = vmatmul.mubr.f32.gmra.mxu1 %v6103_v39 }
 0x4cb   : > { %5582 = vmatprep.mubr.msk.f32.mxu1 %vm700_vm11, %v6354_v57 }
 0x4ce   : > { %5583 = vmatmul.mubr.msk.f32.vlgmr.msra.gmra.mxu1 %vm700_vm11, %v6355_v52 }
 0x4cf   : > { %5607 = vmatpush3.msra.mxu1 %v2960_v35  ;;  %5585 = vmatprep.mubr.msk.f32.mxu1 %vm700_vm11, %v6356_v36  ;;  %v6369_v35 = vld [vmem:[%s6534_s16 + $0x78] sm:$0xff]  ;;  %v9400_v36 = vld [vmem:[#allocation57_spill] sm:$0xff] }
 0x4d0   : > { %5608 = vmatprep.subr.mxu1 %v2959_v15 }
 0x4d1   : > { %5609 = vmatpush3.msra.mxu1 %v2959_v15 }
 0x4d2   : > { %5586 = vmatmul.mubr.msk.f32.gmra.mxu1 %vm700_vm11, %v6357_v19  ;;  %5610 = vmatprep.subr.mxu1 %v2958_v21 }
 0x4d3   : > { %5611 = vmatpush3.msra.mxu1 %v2958_v21  ;;  %5588 = vmatprep.mubr.msk.f32.mxu1 %vm700_vm11, %v6358_v48 }
 0x4d4   : > { %5612 = vmatprep.subr.mxu1 %v2957_v31 }
 0x4d5   : > { %5613 = vmatpush3.msra.mxu1 %v2957_v31 }
 0x4d6   : > { %5589 = vmatmul.mubr.msk.f32.gmra.mxu1 %vm700_vm11, %v6359_v14  ;;  %5614 = vmatprep.subr.mxu1 %v2956_v10 }
 0x4d7   : > { %5615 = vmatpush3.msra.mxu1 %v2956_v10  ;;  %5591 = vmatprep.mubr.msk.f32.mxu1 %vm700_vm11, %v6360_v55  ;;  %v9401_v10 = vld [vmem:[#allocation46_spill] sm:$0xff] }
 0x4d8   : > { %5616 = vmatprep.subr.mxu1 %v2955_v58 }
 0x4d9   : > { %5617 = vmatpush3.msra.mxu1 %v2955_v58 }
 0x4da   : > { %5592 = vmatmul.mubr.msk.f32.gmra.mxu1 %vm700_vm11, %v6361_v38  ;;  %5618 = vmatprep.subr.mxu1 %v2954_v29 }
 0x4db   : > { %5619 = vmatpush3.msra.mxu1 %v2954_v29  ;;  %5594 = vmatprep.mubr.msk.f32.mxu1 %vm700_vm11, %v6362_v1 }
 0x4dc   : > { %5620 = vmatprep.subr.mxu1 %v2953_v32 }
 0x4dd   : > { %5621 = vmatpush3.msra.mxu1 %v2953_v32  ;;  %v9402_v32 = vld [vmem:[#allocation54_spill] sm:$0xff] }
 0x4de   : > { %5595 = vmatmul.mubr.msk.f32.gmra.mxu1 %vm700_vm11, %v6363_v5  ;;  %5622 = vmatprep.subr.mxu1 %v2952_v8  ;;  %v9403_v5 = vld [vmem:[#allocation42_spill] sm:$0xff] }
 0x4df   : > { %5623 = vmatpush3.msra.mxu1 %v2952_v8  ;;  %5597 = vmatprep.mubr.msk.f32.mxu1 %vm700_vm11, %v6364_v23 }
 0x4e0   : > { %5624 = vmatprep.subr.mxu1 %v2951_v33 }
 0x4e1   : > { %5625 = vmatpush3.msra.mxu1 %v2951_v33 }
 0x4e2   : > { %5598 = vmatmul.mubr.msk.f32.gmra.mxu1 %vm700_vm11, %v6365_v37  ;;  %5626 = vmatprep.subr.mxu1 %v2950_v24 }
 0x4e3   : > { %5627 = vmatpush3.msra.mxu1 %v2950_v24  ;;  %5600 = vmatprep.mubr.msk.f32.mxu1 %vm700_vm11, %v6366_v43  ;;  %v9404_v43 = vld [vmem:[#allocation55_spill] sm:$0xff] }
 0x4e4   : > { %5628 = vmatprep.subr.mxu1 %v2949_v59 }
 0x4e5   : > { %5629 = vmatpush3.msra.mxu1 %v2949_v59 }
 0x4e6   : > { %5601 = vmatmul.mubr.msk.f32.gmra.mxu1 %vm700_vm11, %v6367_v26  ;;  %5630 = vmatprep.subr.mxu1 %v2948_v50 }
 0x4e7   : > { %5631 = vmatpush3.msra.mxu1 %v2948_v50  ;;  %5603 = vmatprep.mubr.msk.f32.mxu1 %vm700_vm11, %v6368_v2 }
 0x4e8   : > { %5632 = vmatprep.subr.mxu1 %v2947_v22 }
 0x4e9   : > { %5633 = vmatpush3.msra.mxu1 %v2947_v22 }
 0x4ea   : > { %5604 = vmatmul.mubr.msk.f32.gmra.mxu1 %vm700_vm11, %v6369_v35  ;;  %5634 = vmatprep.subr.mxu1 %v2946_v49  ;;  %vm6435_vm11 = vmmov 0  }
 0x4eb   : > { %5635 = vmatpush3.msra.mxu1 %v2946_v49  ;;  %v9405_v49 = vld [vmem:[#allocation43_spill] sm:$0xff] }
 0x4ec   : > { %5636 = vmatprep.subr.mxu1 %v2945_v7 }
 0x4ed   : > { %5637 = vmatpush3.msra.mxu1 %v2945_v7 }
 0x54e   : > { %v5070_v34 = vpop.f32.mrf.mxu1 }
 0x550   : > { %v5071_v42 = vpop.f32.mrf.mxu1 }
 0x551   : > { %v5072_v6 = vadd.f32 %v5071_v42, %v5070_v34  ;;  %v9406_v42 = vld [vmem:[#allocation53_spill] sm:$0xff] }
 0x552   : > { %v5073_v62 = vpop.f32.mrf.mxu1 }
 0x553   : > { %v2928_v9 = vsel %vm2927_vm14, %v9394_v25, %v5072_v6 }
 0x554   : > { %v5074_v45 = vpop.f32.mrf.mxu1  ;;  %5638 = vmatprep.mubr.f32.mxu1 %v2928_v9 }
 0x555   : > { %v5075_v12 = vadd.f32 %v5074_v45, %v5073_v62  ;;  %v9407_v45 = vld [vmem:[#allocation41_spill] sm:$0xff] }
 0x556   : > { %v5076_v18 = vpop.f32.mrf.mxu1 }
 0x557   : > { %v2929_v30 = vsel %vm2927_vm14, %v9395_v44, %v5075_v12 }
 0x558   : > { %v5077_v47 = vpop.f32.mrf.mxu1  ;;  %5639 = vmatmul.mubr.f32.vlgmr.msra.gmra.mxu1 %v2929_v30 }
 0x559   : > { %v5078_v53 = vadd.f32 %v5077_v47, %v5076_v18  ;;  %v9408_v47 = vld [vmem:[#allocation48_spill] sm:$0xff] }
 0x55a   : > { %v5079_v54 = vpop.f32.mrf.mxu1 }
 0x55b   : > { %v2930_v11 = vsel %vm2927_vm14, %v9396_v51, %v5078_v53  ;;  %v9409_v51 = vld [vmem:[#allocation9_spill] sm:$0xff] }
 0x55c   : > { %v5080_v28 = vpop.f32.mrf.mxu1  ;;  %5641 = vmatprep.mubr.f32.mxu1 %v2930_v11  ;;  %v9410_v11 = vld [vmem:[#allocation44_spill] sm:$0xff] }
 0x55d   : > { %v5081_v61 = vadd.f32 %v5080_v28, %v5079_v54  ;;  %v4953_v28 = vadd.f32 %v9410_v11, %v9409_v51 }
 0x55e   : > { %v5082_v60 = vpop.f32.mrf.mxu1 }
 0x55f   : > { %v2931_v41 = vsel %vm2927_vm14, %v9397_v63, %v5081_v61  ;;  %v3485_v63 = vld [vmem:[#allocation2 + $0x1f8] sm:$0xff] }
 0x560   : > { %v5083_v0 = vpop.f32.mrf.mxu1  ;;  %5642 = vmatmul.mubr.f32.gmra.mxu1 %v2931_v41  ;;  %v3484_v41 = vld [vmem:[#allocation2 + $0x1f0] sm:$0xff]  ;;  %5662 = vmatprep.subr.mxu0 %v3485_v63 }
 0x561   : > { %v5084_v20 = vadd.f32 %v5083_v0, %v5082_v60  ;;  %5663 = vmatpush3.msra.mxu0 %v3485_v63  ;;  %v3483_v0 = vld [vmem:[#allocation2 + $0x1e8] sm:$0xff] }
 0x562   : > { %v5085_v56 = vpop.f32.mrf.mxu1  ;;  %5664 = vmatprep.subr.mxu0 %v3484_v41 }
 0x563   : > { %v2932_v4 = vsel %vm2927_vm14, %v9398_v16, %v5084_v20  ;;  %5665 = vmatpush3.msra.mxu0 %v3484_v41  ;;  %v3482_v20 = vld [vmem:[#allocation2 + $0x1e0] sm:$0xff]  ;;  %v3480_v16 = vld [vmem:[#allocation2 + $0x1d0] sm:$0xff] }
 0x564   : > { %v5086_v13 = vpop.f32.mrf.mxu1  ;;  %5644 = vmatprep.mubr.f32.mxu1 %v2932_v4  ;;  %5666 = vmatprep.subr.mxu0 %v3483_v0  ;;  %v3479_v4 = vld [vmem:[#allocation2 + $0x1c8] sm:$0xff] }
 0x565   : > { %v5087_v17 = vadd.f32 %v5086_v13, %v5085_v56  ;;  %5667 = vmatpush3.msra.mxu0 %v3483_v0  ;;  %v3481_v56 = vld [vmem:[#allocation2 + $0x1d8] sm:$0xff] }
 0x566   : > { %v5088_v46 = vpop.f32.mrf.mxu1  ;;  %5668 = vmatprep.subr.mxu0 %v3482_v20  ;;  %v3477_v13 = vld [vmem:[#allocation2 + $0x1b8] sm:$0xff] }
 0x567   : > { %v2933_v39 = vsel %vm2927_vm14, %v9399_v3, %v5087_v17  ;;  %5669 = vmatpush3.msra.mxu0 %v3482_v20  ;;  %v3476_v17 = vld [vmem:[#allocation2 + $0x1b0] sm:$0xff]  ;;  %v3474_v3 = vld [vmem:[#allocation2 + $0x1a0] sm:$0xff] }
 0x568   : > { %v5089_v57 = vpop.f32.mrf.mxu1  ;;  %5645 = vmatmul.mubr.f32.gmra.mxu1 %v2933_v39  ;;  %5670 = vmatprep.subr.mxu0 %v3481_v56  ;;  %v3473_v39 = vld [vmem:[#allocation2 + $0x198] sm:$0xff] }
 0x569   : > { %v5090_v15 = vadd.f32 %v5089_v57, %v5088_v46  ;;  %5671 = vmatpush3.msra.mxu0 %v3481_v56  ;;  %v3475_v46 = vld [vmem:[#allocation2 + $0x1a8] sm:$0xff]  ;;  %v3472_v57 = vld [vmem:[#allocation2 + $0x190] sm:$0xff] }
 0x56a   : > { %v5091_v52 = vpop.f32.mrf.mxu1  ;;  %5672 = vmatprep.subr.mxu0 %v3480_v16 }
 0x56b   : > { %v2934_v21 = vsel %vm2927_vm14, %v9400_v36, %v5090_v15  ;;  %5673 = vmatpush3.msra.mxu0 %v3480_v16  ;;  %v3471_v15 = vld [vmem:[#allocation2 + $0x188] sm:$0xff]  ;;  %v9411_v36 = vmov 0.0  }
 0x56c   : > { %v5092_v31 = vpop.f32.mrf.mxu1  ;;  %5647 = vmatprep.mubr.f32.mxu1 %v2934_v21  ;;  %5674 = vmatprep.subr.mxu0 %v3479_v4 }
 0x56d   : > { %v5093_v19 = vadd.f32 %v5092_v31, %v5091_v52  ;;  %5675 = vmatpush3.msra.mxu0 %v3479_v4  ;;  %v3470_v52 = vld [vmem:[#allocation2 + $0x180] sm:$0xff] }
 0x56e   : > { %v5094_v48 = vpop.f32.mrf.mxu1  ;;  %5676 = vmatprep.subr.mxu0 %v3478_v27 }
 0x56f   : > { %v2935_v58 = vsel %vm2927_vm14, %v9401_v10, %v5093_v19  ;;  %5677 = vmatpush3.msra.mxu0 %v3478_v27 }
 0x570   : > { %v5095_v14 = vpop.f32.mrf.mxu1  ;;  %5648 = vmatmul.mubr.f32.gmra.mxu1 %v2935_v58  ;;  %5678 = vmatprep.subr.mxu0 %v3477_v13 }
 0x571   : > { %v5096_v55 = vadd.f32 %v5095_v14, %v5094_v48  ;;  %5679 = vmatpush3.msra.mxu0 %v3477_v13 }
 0x572   : > { %v5097_v29 = vpop.f32.mrf.mxu1  ;;  %5680 = vmatprep.subr.mxu0 %v3476_v17 }
 0x573   : > { %v2936_v38 = vsel %vm2927_vm14, %v9402_v32, %v5096_v55  ;;  %5681 = vmatpush3.msra.mxu0 %v3476_v17 }
 0x574   : > { %v5098_v1 = vpop.f32.mrf.mxu1  ;;  %5650 = vmatprep.mubr.f32.mxu1 %v2936_v38  ;;  %5682 = vmatprep.subr.mxu0 %v3475_v46 }
 0x575   : > { %v5099_v8 = vadd.f32 %v5098_v1, %v5097_v29  ;;  %5683 = vmatpush3.msra.mxu0 %v3475_v46 }
 0x576   : > { %v5100_v33 = vpop.f32.mrf.mxu1  ;;  %5684 = vmatprep.subr.mxu0 %v3474_v3 }
 0x577   : > { %v2937_v23 = vsel %vm2927_vm14, %v9403_v5, %v5099_v8  ;;  %5685 = vmatpush3.msra.mxu0 %v3474_v3 }
 0x578   : > { %v5101_v24 = vpop.f32.mrf.mxu1  ;;  %5651 = vmatmul.mubr.f32.gmra.mxu1 %v2937_v23  ;;  %5686 = vmatprep.subr.mxu0 %v3473_v39 }
 0x579   : > { %v5102_v59 = vadd.f32 %v5101_v24, %v5100_v33  ;;  %5687 = vmatpush3.msra.mxu0 %v3473_v39 }
 0x57a   : > { %v5103_v37 = vpop.f32.mrf.mxu1  ;;  %5688 = vmatprep.subr.mxu0 %v3472_v57 }
 0x57b   : > { %v2938_v50 = vsel %vm2927_vm14, %v9404_v43, %v5102_v59  ;;  %5689 = vmatpush3.msra.mxu0 %v3472_v57  ;;  %v8490_v59 = vld [vmem:[%s9025_s3 + $0x1] ss:$0 sm:$0xff] }
 0x57c   : > { %v5104_v22 = vpop.f32.mrf.mxu1  ;;  %5653 = vmatprep.mubr.f32.mxu1 %v2938_v50  ;;  %5690 = vmatprep.subr.mxu0 %v3471_v15 }
 0x57d   : > { %v5105_v26 = vadd.f32 %v5104_v22, %v5103_v37  ;;  %5691 = vmatpush3.msra.mxu0 %v3471_v15 }
 0x57e   : > { %v5106_v2 = vpop.f32.mrf.mxu1  ;;  %5692 = vmatprep.subr.mxu0 %v3470_v52 }
 0x57f   : > { %v2939_v7 = vsel %vm2927_vm14, %v9405_v49, %v5105_v26  ;;  %5693 = vmatpush3.msra.mxu0 %v3470_v52 }
 0x580   : > { %v5107_v35 = vpop.f32.mrf.mxu1  ;;  %5654 = vmatmul.mubr.f32.gmra.mxu1 %v2939_v7  ;;  %5774 = vmatprep.subr.mxu0 %v9411_v36 }
 0x581   : > { %v5108_v40 = vadd.f32 %v5107_v35, %v5106_v2 }
 0x582   : > { %v5109_v34 = vpop.f32.mrf.mxu1 }
 0x583   : > { %v2940_v6 = vsel %vm2927_vm14, %v9406_v42, %v5108_v40 }
 0x584   : > { %v5110_v62 = vpop.f32.mrf.mxu1  ;;  %5656 = vmatprep.mubr.f32.mxu1 %v2940_v6 }
 0x585   : > { %v5111_v25 = vadd.f32 %v5110_v62, %v5109_v34 }
 0x586   : > { %v5112_v9 = vpop.f32.mrf.mxu1 }
 0x587   : > { %v2941_v12 = vsel %vm2927_vm14, %v9407_v45, %v5111_v25 }
 0x588   : > { %v5113_v18 = vpop.f32.mrf.mxu1  ;;  %5657 = vmatmul.mubr.f32.gmra.mxu1 %v2941_v12 }
 0x589   : > { %v5114_v44 = vadd.f32 %v5113_v18, %v5112_v9 }
 0x58a   : > { %v5115_v30 = vpop.f32.mrf.mxu1 }
 0x58b   : > { %v2942_v53 = vsel %vm2927_vm14, %v9408_v47, %v5114_v44 }
 0x58c   : > { %v5116_v54 = vpop.f32.mrf.mxu1  ;;  %5659 = vmatprep.mubr.f32.mxu1 %v2942_v53 }
 0x58d   : > { %v5117_v61 = vadd.f32 %v5116_v54, %v5115_v30 }
 0x58e   : > { %v5584_v21 = vpop.f32.mrf.mxu1 }
 0x58f   : > { %v2943_v60 = vsel %vm2927_vm14, %v4953_v28, %v5117_v61 }
 0x590   : > { %5660 = vmatmul.mubr.f32.gmra.mxu1 %v2943_v60  ;;  %v3080_v31 = vpop.f32.mrf.mxu1 }
 0x592   : > { %v5587_v19 = vpop.f32.mrf.mxu1 }
 0x594   : > { %v3090_v48 = vpop.f32.mrf.mxu1 }
 0x596   : > { %v5590_v10 = vpop.f32.mrf.mxu1 }
 0x598   : > { %v3100_v58 = vpop.f32.mrf.mxu1 }
 0x59a   : > { %v5593_v14 = vpop.f32.mrf.mxu1 }
 0x59c   : > { %v3110_v55 = vpop.f32.mrf.mxu1 }
 0x59e   : > { %v8471_v29 = vpop.f32.mrf.mxu1 }
 0x5a0   : > { %v8473_v32 = vpop.f32.mrf.mxu1 }
 0x5a2   : > { %v8475_v38 = vpop.f32.mrf.mxu1 }
 0x5a4   : > { %v8477_v1 = vpop.f32.mrf.mxu1 }
 0x5a6   : > { %v8479_v8 = vpop.f32.mrf.mxu1 }
 0x5a8   : > { %v8481_v33 = vpop.f32.mrf.mxu1 }
 0x5aa   : > { %v8483_v5 = vpop.f32.mrf.mxu1 }
 0x5ac   : > { %v8485_v23 = vpop.f32.mrf.mxu1 }
 0x618   : > { %v5640_v24 = vpop.f32.mrf.mxu1 }
 0x619   : > { %v3231_v37 = vadd.f32 %v5640_v24, %v5584_v21 }
 0x61a   : > { %v3225_v43 = vpop.f32.mrf.mxu1 }
 0x61b   : > { %v3310_v50 = vadd.f32 %v8490_v59, %v3231_v37  ;;  %v3226_v22 = vadd.f32 %v3225_v43, %v3080_v31 }
 0x61d   : > { %v3342_v26 = vmul.f32 0.044715, %v3310_v50  ;;  %v3309_v2 = vadd.f32 %v8490_v59, %v3226_v22 }
 0x61f   : > { %v3358_v49 = vmul.f32 %v3342_v26, %v3310_v50  ;;  %v3341_v7 = vmul.f32 0.044715, %v3309_v2 }
 0x620   : > { %v5643_v35 = vpop.f32.mrf.mxu1 }
 0x621   : > { %v3374_v40 = vmul.f32 %v3358_v49, %v3310_v50  ;;  %v3241_v34 = vadd.f32 %v5643_v35, %v5587_v19  ;;  %v3357_v42 = vmul.f32 %v3341_v7, %v3309_v2  ;;  %v3325_v49 = vmul.f32 0.5, %v3309_v2 }
 0x622   : > { %v3235_v6 = vpop.f32.mrf.mxu1 }
 0x623   : > { %v3390_v62 = vadd.f32 %v3374_v40, %v3310_v50  ;;  %v8495_v25 = vadd.f32 %v8490_v59, %v3241_v34  ;;  %v3236_v9 = vadd.f32 %v3235_v6, %v3090_v48  ;;  %v3373_v45 = vmul.f32 %v3357_v42, %v3309_v2 }
 0x624   : > { %v3326_v40 = vmul.f32 0.5, %v3310_v50 }
 0x625   : > { %v3406_v12 = vmul.f32 0.7978846, %v3390_v62  ;;  %v3344_v18 = vmul.f32 0.044715, %v8495_v25  ;;  %v8499_v44 = vadd.f32 %v8490_v59, %v3236_v9  ;;  %v3389_v30 = vadd.f32 %v3373_v45, %v3309_v2 }
 0x627   : > { %6232 = vtanh.f32 %v3406_v12  ;;  %v3343_v47 = vmul.f32 0.044715, %v8499_v44  ;;  %v3405_v53 = vmul.f32 0.7978846, %v3389_v30  ;;  %v3360_v51 = vmul.f32 %v3344_v18, %v8495_v25 }
 0x628   : > { %v5646_v54 = vpop.f32.mrf.mxu1 }
 0x629   : > { %v3251_v11 = vadd.f32 %v5646_v54, %v5590_v10  ;;  %6234 = vtanh.f32 %v3405_v53  ;;  %v3359_v28 = vmul.f32 %v3343_v47, %v8499_v44  ;;  %v3376_v60 = vmul.f32 %v3360_v51, %v8495_v25 }
 0x62a   : > { %v3245_v61 = vpop.f32.mrf.mxu1 }
 0x62b   : > { %v8506_v63 = vadd.f32 %v8490_v59, %v3251_v11  ;;  %v3246_v41 = vadd.f32 %v3245_v61, %v3100_v58  ;;  %v3375_v0 = vmul.f32 %v3359_v28, %v8499_v44  ;;  %v3392_v20 = vadd.f32 %v3376_v60, %v8495_v25 }
 0x62d   : > { %v3346_v56 = vmul.f32 0.044715, %v8506_v63  ;;  %v8512_v16 = vadd.f32 %v8490_v59, %v3246_v41  ;;  %v3391_v4 = vadd.f32 %v3375_v0, %v8499_v44  ;;  %v3408_v27 = vmul.f32 0.7978846, %v3392_v20 }
 0x62e   : > { %v3328_v20 = vmul.f32 0.5, %v8495_v25 }
 0x62f   : > { %v3345_v13 = vmul.f32 0.044715, %v8512_v16  ;;  %v3407_v17 = vmul.f32 0.7978846, %v3391_v4  ;;  %v3362_v46 = vmul.f32 %v3346_v56, %v8506_v63  ;;  %6236 = vtanh.f32 %v3408_v27 }
 0x630   : > { %v5649_v3 = vpop.f32.mrf.mxu1 }
 0x631   : > { %v3261_v39 = vadd.f32 %v5649_v3, %v5593_v14  ;;  %6238 = vtanh.f32 %v3407_v17  ;;  %v3361_v57 = vmul.f32 %v3345_v13, %v8512_v16  ;;  %v3378_v15 = vmul.f32 %v3362_v46, %v8506_v63 }
 0x632   : > { %v3255_v52 = vpop.f32.mrf.mxu1 }
 0x633   : > { %v8520_v21 = vadd.f32 %v8490_v59, %v3261_v39  ;;  %v3256_v31 = vadd.f32 %v3255_v52, %v3110_v55  ;;  %v3377_v19 = vmul.f32 %v3361_v57, %v8512_v16  ;;  %v3394_v48 = vadd.f32 %v3378_v15, %v8506_v63 }
 0x634   : > { %v6233_v10 = vpop.eup %6232 }
 0x635   : > { %v3348_v58 = vmul.f32 0.044715, %v8520_v21  ;;  %v8526_v24 = vadd.f32 %v8490_v59, %v3256_v31  ;;  %v3393_v14 = vadd.f32 %v3377_v19, %v8512_v16  ;;  %v3438_v43 = vadd.f32 1.0, %v6233_v10 }
 0x636   : > { %v6235_v37 = vpop.eup %6234  ;;  %v3410_v22 = vmul.f32 0.7978846, %v3394_v48 }
 0x637   : > { %v3347_v26 = vmul.f32 0.044715, %v8526_v24  ;;  %v3437_v7 = vadd.f32 1.0, %v6235_v37  ;;  %v3409_v55 = vmul.f32 0.7978846, %v3393_v14  ;;  %v3364_v34 = vmul.f32 %v3348_v58, %v8520_v21 }
 0x638   : > { %v5652_v35 = vpop.f32.mrf.mxu1  ;;  %6240 = vtanh.f32 %v3410_v22  ;;  %v3454_v45 = vmul.f32 %v3438_v43, %v3326_v40  ;;  %v3330_v22 = vmul.f32 0.5, %v8506_v63 }
 0x639   : > { %v3271_v42 = vadd.f32 %v5652_v35, %v8471_v29  ;;  %v3453_v6 = vmul.f32 %v3437_v7, %v3325_v49  ;;  %6242 = vtanh.f32 %v3409_v55  ;;  %v3363_v62 = vmul.f32 %v3347_v26, %v8526_v24 }
 0x63a   : > { %v3265_v9 = vpop.f32.mrf.mxu1  ;;  %v3380_v12 = vmul.f32 %v3364_v34, %v8520_v21 }
 0x63b   : > { %v8535_v18 = vadd.f32 %v8490_v59, %v3271_v42  ;;  %v3266_v2 = vadd.f32 %v3265_v9, %v8473_v32  ;;  %5694 = vmatprep.mubr.f32.mxu0 %v3453_v6  ;;  %v3379_v50 = vmul.f32 %v3363_v62, %v8526_v24  ;;  %v3327_v32 = vmul.f32 0.5, %v8499_v44 }
 0x63c   : > { %5695 = vmatmul.mubr.f32.vlgmr.msra.gmra.mxu0 %v3454_v45  ;;  %v3396_v30 = vadd.f32 %v3380_v12, %v8520_v21  ;;  %v6237_v29 = vpop.eup %6236 }
 0x63d   : > { %v3350_v47 = vmul.f32 0.044715, %v8535_v18  ;;  %v8542_v53 = vadd.f32 %v8490_v59, %v3266_v2  ;;  %v3395_v54 = vadd.f32 %v3379_v50, %v8526_v24  ;;  %v3440_v11 = vadd.f32 1.0, %v6237_v29 }
 0x63e   : > { %v6239_v51 = vpop.eup %6238  ;;  %v3412_v28 = vmul.f32 0.7978846, %v3396_v30 }
 0x63f   : > { %v3349_v61 = vmul.f32 0.044715, %v8542_v53  ;;  %v3439_v60 = vadd.f32 1.0, %v6239_v51  ;;  %v3411_v41 = vmul.f32 0.7978846, %v3395_v54  ;;  %v3366_v56 = vmul.f32 %v3350_v47, %v8535_v18 }
 0x640   : > { %v5655_v0 = vpop.f32.mrf.mxu1  ;;  %6244 = vtanh.f32 %v3412_v28  ;;  %v3456_v46 = vmul.f32 %v3440_v11, %v3328_v20  ;;  %v3332_v51 = vmul.f32 0.5, %v8520_v21 }
 0x641   : > { %v3281_v4 = vadd.f32 %v5655_v0, %v8475_v38  ;;  %v3455_v27 = vmul.f32 %v3439_v60, %v3327_v32  ;;  %6246 = vtanh.f32 %v3411_v41  ;;  %v3365_v13 = vmul.f32 %v3349_v61, %v8542_v53 }
 0x642   : > { %v3275_v17 = vpop.f32.mrf.mxu1  ;;  %v3382_v3 = vmul.f32 %v3366_v56, %v8535_v18 }
 0x643   : > { %v8553_v44 = vadd.f32 %v8490_v59, %v3281_v4  ;;  %v3276_v39 = vadd.f32 %v3275_v17, %v8477_v1  ;;  %5697 = vmatprep.mubr.f32.mxu0 %v3455_v27  ;;  %v3381_v25 = vmul.f32 %v3365_v13, %v8542_v53  ;;  %v3329_v1 = vmul.f32 0.5, %v8512_v16 }
 0x644   : > { %5698 = vmatmul.mubr.f32.gmra.mxu0 %v3456_v46  ;;  %v3398_v57 = vadd.f32 %v3382_v3, %v8535_v18 }
 0x645   : > { %v6241_v38 = vpop.eup %6240  ;;  %v3352_v15 = vmul.f32 0.044715, %v8553_v44  ;;  %v8560_v52 = vadd.f32 %v8490_v59, %v3276_v39  ;;  %v3397_v31 = vadd.f32 %v3381_v25, %v8542_v53  ;;  %v3333_v25 = vmul.f32 0.5, %v8542_v53 }
 0x646   : > { %v6243_v19 = vpop.eup %6242  ;;  %v3442_v48 = vadd.f32 1.0, %v6241_v38  ;;  %v3414_v10 = vmul.f32 0.7978846, %v3398_v57  ;;  %v3334_v38 = vmul.f32 0.5, %v8535_v18 }
 0x647   : > { %v3351_v58 = vmul.f32 0.044715, %v8560_v52  ;;  %v3441_v14 = vadd.f32 1.0, %v6243_v19  ;;  %v3413_v37 = vmul.f32 0.7978846, %v3397_v31  ;;  %v3368_v26 = vmul.f32 %v3352_v15, %v8553_v44 }
 0x648   : > { %v5658_v43 = vpop.f32.mrf.mxu1  ;;  %6248 = vtanh.f32 %v3414_v10  ;;  %v3458_v40 = vmul.f32 %v3442_v48, %v3330_v22  ;;  %v3335_v22 = vmul.f32 0.5, %v8560_v52 }
 0x649   : > { %v3291_v49 = vadd.f32 %v5658_v43, %v8479_v8  ;;  %v3457_v7 = vmul.f32 %v3441_v14, %v3329_v1  ;;  %6250 = vtanh.f32 %v3413_v37  ;;  %v3367_v55 = vmul.f32 %v3351_v58, %v8560_v52 }
 0x64a   : > { %v3285_v35 = vpop.f32.mrf.mxu1  ;;  %v3384_v34 = vmul.f32 %v3368_v26, %v8553_v44 }
 0x64b   : > { %v8571_v16 = vadd.f32 %v8490_v59, %v3291_v49  ;;  %v3286_v42 = vadd.f32 %v3285_v35, %v8481_v33  ;;  %5700 = vmatprep.mubr.f32.mxu0 %v3457_v7  ;;  %v3383_v63 = vmul.f32 %v3367_v55, %v8560_v52  ;;  %v3331_v33 = vmul.f32 0.5, %v8526_v24 }
 0x64c   : > { %5701 = vmatmul.mubr.f32.gmra.mxu0 %v3458_v40  ;;  %v3400_v6 = vadd.f32 %v3384_v34, %v8553_v44  ;;  %v3336_v49 = vmul.f32 0.5, %v8553_v44 }
 0x64d   : > { %v6245_v8 = vpop.eup %6244  ;;  %v3354_v62 = vmul.f32 0.044715, %v8571_v16  ;;  %v8578_v9 = vadd.f32 %v8490_v59, %v3286_v42  ;;  %v3399_v45 = vadd.f32 %v3383_v63, %v8560_v52 }
 0x64e   : > { %v6247_v12 = vpop.eup %6246  ;;  %v3444_v2 = vadd.f32 1.0, %v6245_v8  ;;  %v3416_v50 = vmul.f32 0.7978846, %v3400_v6  ;;  %v3338_v6 = vmul.f32 0.5, %v8571_v16 }
 0x64f   : > { %v3353_v30 = vmul.f32 0.044715, %v8578_v9  ;;  %v3443_v29 = vadd.f32 1.0, %v6247_v12  ;;  %v3415_v47 = vmul.f32 0.7978846, %v3399_v45  ;;  %v3370_v11 = vmul.f32 %v3354_v62, %v8571_v16 }
 0x650   : > { %v5661_v54 = vpop.f32.mrf.mxu1  ;;  %6252 = vtanh.f32 %v3416_v50  ;;  %v3460_v41 = vmul.f32 %v3444_v2, %v3332_v51  ;;  %v3337_v42 = vmul.f32 0.5, %v8578_v9  ;;  %v3791_v51 = vld [vmem:[#allocation2 + $0x250] sm:$0xff] }
 0x651   : > { %v3301_v28 = vadd.f32 %v5661_v54, %v8483_v5  ;;  %v3459_v61 = vmul.f32 %v3443_v29, %v3331_v33  ;;  %6254 = vtanh.f32 %v3415_v47  ;;  %v3369_v32 = vmul.f32 %v3353_v30, %v8578_v9  ;;  %v3796_v29 = vld [vmem:[#allocation2 + $0x278] sm:$0xff]  ;;  %v3795_v47 = vld [vmem:[#allocation2 + $0x270] sm:$0xff] }
 0x652   : > { %v3295_v60 = vpop.f32.mrf.mxu1  ;;  %v3386_v0 = vmul.f32 %v3370_v11, %v8571_v16  ;;  %5718 = vmatprep.subr.mxu1 %v3796_v29  ;;  %v3792_v54 = vld [vmem:[#allocation2 + $0x258] sm:$0xff]  ;;  %v3790_v11 = vld [vmem:[#allocation2 + $0x248] sm:$0xff] }
 0x653   : > { %v3324_v24 = vadd.f32 %v8490_v59, %v3301_v28  ;;  %v3296_v20 = vadd.f32 %v3295_v60, %v8485_v23  ;;  %5703 = vmatprep.mubr.f32.mxu0 %v3459_v61  ;;  %v3385_v21 = vmul.f32 %v3369_v32, %v8578_v9  ;;  %5719 = vmatpush3.msra.mxu1 %v3796_v29  ;;  %v3789_v28 = vld [vmem:[#allocation2 + $0x240] sm:$0xff]  ;;  %v3788_v61 = vld [vmem:[#allocation2 + $0x238] sm:$0xff]  ;;  %v3787_v32 = vld [vmem:[#allocation2 + $0x230] sm:$0xff] }
 0x654   : > { %5704 = vmatmul.mubr.f32.gmra.mxu0 %v3460_v41  ;;  %v3402_v56 = vadd.f32 %v3386_v0, %v8571_v16  ;;  %5720 = vmatprep.subr.mxu1 %v3795_v47  ;;  %v3793_v16 = vld [vmem:[#allocation2 + $0x260] sm:$0xff]  ;;  %v3786_v60 = vld [vmem:[#allocation2 + $0x228] sm:$0xff]  ;;  %v3784_v0 = vld [vmem:[#allocation2 + $0x218] sm:$0xff] }
 0x655   : > { %v6249_v4 = vpop.eup %6248  ;;  %v3356_v5 = vmul.f32 0.044715, %v3324_v24  ;;  %v3323_v27 = vadd.f32 %v8490_v59, %v3296_v20  ;;  %v3401_v13 = vadd.f32 %v3385_v21, %v8578_v9  ;;  %v3340_v50 = vmul.f32 0.5, %v3324_v24  ;;  %v3794_v9 = vld [vmem:[#allocation2 + $0x268] sm:$0xff]  ;;  %5721 = vmatpush3.msra.mxu1 %v3795_v47  ;;  %v3785_v41 = vld [vmem:[#allocation2 + $0x220] sm:$0xff] }
 0x656   : > { %v6251_v17 = vpop.eup %6250  ;;  %v3446_v46 = vadd.f32 1.0, %v6249_v4  ;;  %v3418_v3 = vmul.f32 0.7978846, %v3402_v56  ;;  %5722 = vmatprep.subr.mxu1 %v3794_v9  ;;  %v3782_v20 = vld [vmem:[#allocation2 + $0x208] sm:$0xff]  ;;  %v3781_v21 = vld [vmem:[#allocation2 + $0x200] sm:$0xff] }
 0x657   : > { %v3355_v39 = vmul.f32 0.044715, %v3323_v27  ;;  %v3445_v57 = vadd.f32 1.0, %v6251_v17  ;;  %v3417_v23 = vmul.f32 0.7978846, %v3401_v13  ;;  %v3372_v15 = vmul.f32 %v3356_v5, %v3324_v24  ;;  %5723 = vmatpush3.msra.mxu1 %v3794_v9 }
 0x658   : > { %6256 = vtanh.f32 %v3418_v3  ;;  %v3462_v48 = vmul.f32 %v3446_v46, %v3334_v38  ;;  %v3339_v12 = vmul.f32 0.5, %v3323_v27  ;;  %5724 = vmatprep.subr.mxu1 %v3793_v16  ;;  %v8604_v56 = vld [vmem:[%s9025_s3 + $0x2] ss:$0 sm:$0xff] }
 0x659   : > { %v3461_v31 = vmul.f32 %v3445_v57, %v3333_v25  ;;  %6258 = vtanh.f32 %v3417_v23  ;;  %v3371_v19 = vmul.f32 %v3355_v39, %v3323_v27  ;;  %v3388_v10 = vmul.f32 %v3372_v15, %v3324_v24  ;;  %5725 = vmatpush3.msra.mxu1 %v3793_v16 }
 0x65a   : > { %5726 = vmatprep.subr.mxu1 %v3792_v54 }
 0x65b   : > { %5706 = vmatprep.mubr.f32.mxu0 %v3461_v31  ;;  %v3387_v59 = vmul.f32 %v3371_v19, %v3323_v27  ;;  %v3404_v58 = vadd.f32 %v3388_v10, %v3324_v24  ;;  %5727 = vmatpush3.msra.mxu1 %v3792_v54  ;;  %v3783_v24 = vld [vmem:[#allocation2 + $0x210] sm:$0xff] }
 0x65c   : > { %5707 = vmatmul.mubr.f32.gmra.mxu0 %v3462_v48  ;;  %5728 = vmatprep.subr.mxu1 %v3791_v51 }
 0x65d   : > { %v6253_v1 = vpop.eup %6252  ;;  %v3403_v14 = vadd.f32 %v3387_v59, %v3323_v27  ;;  %v3420_v53 = vmul.f32 0.7978846, %v3404_v58  ;;  %5729 = vmatpush3.msra.mxu1 %v3791_v51 }
 0x65e   : > { %v6255_v37 = vpop.eup %6254  ;;  %v3448_v43 = vadd.f32 1.0, %v6253_v1  ;;  %5730 = vmatprep.subr.mxu1 %v3790_v11 }
 0x65f   : > { %v3447_v26 = vadd.f32 1.0, %v6255_v37  ;;  %v3419_v18 = vmul.f32 0.7978846, %v3403_v14  ;;  %6260 = vtanh.f32 %v3420_v53  ;;  %5731 = vmatpush3.msra.mxu1 %v3790_v11 }
 0x660   : > { %v3464_v55 = vmul.f32 %v3448_v43, %v3336_v49  ;;  %5732 = vmatprep.subr.mxu1 %v3789_v28 }
 0x661   : > { %v3463_v7 = vmul.f32 %v3447_v26, %v3335_v22  ;;  %6262 = vtanh.f32 %v3419_v18  ;;  %5733 = vmatpush3.msra.mxu1 %v3789_v28 }
 0x662   : > { %5734 = vmatprep.subr.mxu1 %v3788_v61 }
 0x663   : > { %5709 = vmatprep.mubr.f32.mxu0 %v3463_v7  ;;  %5735 = vmatpush3.msra.mxu1 %v3788_v61 }
 0x664   : > { %5710 = vmatmul.mubr.f32.gmra.mxu0 %v3464_v55  ;;  %5736 = vmatprep.subr.mxu1 %v3787_v32 }
 0x665   : > { %v6257_v35 = vpop.eup %6256  ;;  %5737 = vmatpush3.msra.mxu1 %v3787_v32 }
 0x666   : > { %v6259_v40 = vpop.eup %6258  ;;  %v3450_v34 = vadd.f32 1.0, %v6257_v35  ;;  %5738 = vmatprep.subr.mxu1 %v3786_v60 }
 0x667   : > { %v3449_v63 = vadd.f32 1.0, %v6259_v40  ;;  %5739 = vmatpush3.msra.mxu1 %v3786_v60 }
 0x668   : > { %v3466_v52 = vmul.f32 %v3450_v34, %v3338_v6  ;;  %5740 = vmatprep.subr.mxu1 %v3785_v41 }
 0x669   : > { %v3465_v8 = vmul.f32 %v3449_v63, %v3337_v42  ;;  %5741 = vmatpush3.msra.mxu1 %v3785_v41 }
 0x66a   : > { %5742 = vmatprep.subr.mxu1 %v3784_v0 }
 0x66b   : > { %5712 = vmatprep.mubr.f32.mxu0 %v3465_v8  ;;  %5743 = vmatpush3.msra.mxu1 %v3784_v0 }
 0x66c   : > { %5713 = vmatmul.mubr.f32.gmra.mxu0 %v3466_v52  ;;  %v6261_v62 = vpop.eup %6260  ;;  %5744 = vmatprep.subr.mxu1 %v3783_v24 }
 0x66d   : > { %v3452_v45 = vadd.f32 1.0, %v6261_v62  ;;  %5745 = vmatpush3.msra.mxu1 %v3783_v24 }
 0x66e   : > { %v6263_v44 = vpop.eup %6262  ;;  %5746 = vmatprep.subr.mxu1 %v3782_v20 }
 0x66f   : > { %v3451_v2 = vadd.f32 1.0, %v6263_v44  ;;  %v3468_v33 = vmul.f32 %v3452_v45, %v3340_v50  ;;  %5747 = vmatpush3.msra.mxu1 %v3782_v20 }
 0x670   : > { %5748 = vmatprep.subr.mxu1 %v3781_v21 }
 0x671   : > { %v3467_v30 = vmul.f32 %v3451_v2, %v3339_v12  ;;  %5749 = vmatpush3.msra.mxu1 %v3781_v21 }
 0x672   : > { %5809 = vmatprep.subr.mxu1 %v9411_v36 }
 0x673   : > { %5715 = vmatprep.mubr.f32.mxu0 %v3467_v30 }
 0x674   : > { %5716 = vmatmul.mubr.f32.gmra.mxu0 %v3468_v33 }
 0x675   : > { %5806 = vmatprep.mubr.msk.f32.mxu0 %vm6435_vm11, %v9411_v36 }
 0x6fc   : > { %v5696_v4 = vpop.f32.mrf.mxu0 }
 0x6fd   : > { %v3563_v5 = vadd.f32 %v5696_v4, %v8604_v56 }
 0x6fe   : > { %v3557_v27 = vpop.f32.mrf.mxu0 }
 0x6ff   : > { %v3653_v13 = vmul.f32 0.044715, %v3563_v5  ;;  %v3558_v17 = vadd.f32 %v8604_v56, %v3557_v27  ;;  %v3637_v28 = vmul.f32 0.5, %v3563_v5 }
 0x701   : > { %v3669_v46 = vmul.f32 %v3653_v13, %v3563_v5  ;;  %v3652_v3 = vmul.f32 0.044715, %v3558_v17  ;;  %v3636_v51 = vmul.f32 0.5, %v3558_v17 }
 0x703   : > { %v3685_v39 = vmul.f32 %v3669_v46, %v3563_v5  ;;  %v3668_v25 = vmul.f32 %v3652_v3, %v3558_v17 }
 0x704   : > { %v5699_v57 = vpop.f32.mrf.mxu0 }
 0x705   : > { %v3701_v23 = vadd.f32 %v3685_v39, %v3563_v5  ;;  %v8609_v38 = vadd.f32 %v5699_v57, %v8604_v56  ;;  %v3684_v15 = vmul.f32 %v3668_v25, %v3558_v17 }
 0x706   : > { %v3567_v31 = vpop.f32.mrf.mxu0 }
 0x707   : > { %v3717_v19 = vmul.f32 0.7978846, %v3701_v23  ;;  %v3655_v48 = vmul.f32 0.044715, %v8609_v38  ;;  %v8613_v10 = vadd.f32 %v8604_v56, %v3567_v31  ;;  %v3700_v59 = vadd.f32 %v3684_v15, %v3558_v17 }
 0x709   : > { %6264 = vtanh.f32 %v3717_v19  ;;  %v3671_v58 = vmul.f32 %v3655_v48, %v8609_v38  ;;  %v3654_v1 = vmul.f32 0.044715, %v8613_v10  ;;  %v3716_v14 = vmul.f32 0.7978846, %v3700_v59 }
 0x70a   : > { %v3638_v15 = vmul.f32 0.5, %v8613_v10  ;;  %v3639_v19 = vmul.f32 0.5, %v8609_v38 }
 0x70b   : > { %v3687_v37 = vmul.f32 %v3671_v58, %v8609_v38  ;;  %v3670_v43 = vmul.f32 %v3654_v1, %v8613_v10  ;;  %6266 = vtanh.f32 %v3716_v14 }
 0x70c   : > { %v5702_v53 = vpop.f32.mrf.mxu0 }
 0x70d   : > { %v3703_v22 = vadd.f32 %v3687_v37, %v8609_v38  ;;  %v8621_v26 = vadd.f32 %v5702_v53, %v8604_v56  ;;  %v3686_v18 = vmul.f32 %v3670_v43, %v8613_v10 }
 0x70e   : > { %v3577_v49 = vpop.f32.mrf.mxu0 }
 0x70f   : > { %v3657_v7 = vmul.f32 0.044715, %v8621_v26  ;;  %v8626_v55 = vadd.f32 %v8604_v56, %v3577_v49  ;;  %v3702_v35 = vadd.f32 %v3686_v18, %v8613_v10  ;;  %v3719_v40 = vmul.f32 0.7978846, %v3703_v22 }
 0x711   : > { %v3673_v34 = vmul.f32 %v3657_v7, %v8621_v26  ;;  %v3656_v42 = vmul.f32 0.044715, %v8626_v55  ;;  %v3718_v63 = vmul.f32 0.7978846, %v3702_v35  ;;  %6268 = vtanh.f32 %v3719_v40 }
 0x713   : > { %v3689_v6 = vmul.f32 %v3673_v34, %v8621_v26  ;;  %v3672_v8 = vmul.f32 %v3656_v42, %v8626_v55  ;;  %6270 = vtanh.f32 %v3718_v63 }
 0x714   : > { %v5705_v52 = vpop.f32.mrf.mxu0 }
 0x715   : > { %v3705_v62 = vadd.f32 %v3689_v6, %v8621_v26  ;;  %v8635_v44 = vadd.f32 %v5705_v52, %v8604_v56  ;;  %v3688_v45 = vmul.f32 %v3672_v8, %v8626_v55  ;;  %v3640_v8 = vmul.f32 0.5, %v8626_v55 }
 0x716   : > { %v6265_v12 = vpop.eup %6264  ;;  %v3587_v2 = vpop.f32.mrf.mxu0 }
 0x717   : > { %v3659_v50 = vmul.f32 0.044715, %v8635_v44  ;;  %v8640_v30 = vadd.f32 %v8604_v56, %v3587_v2  ;;  %v3704_v33 = vadd.f32 %v3688_v45, %v8626_v55  ;;  %v3749_v47 = vadd.f32 1.0, %v6265_v12 }
 0x718   : > { %v6267_v29 = vpop.eup %6266  ;;  %v3721_v9 = vmul.f32 0.7978846, %v3705_v62  ;;  %v3641_v12 = vmul.f32 0.5, %v8621_v26 }
 0x719   : > { %v3675_v16 = vmul.f32 %v3659_v50, %v8635_v44  ;;  %v3658_v54 = vmul.f32 0.044715, %v8640_v30  ;;  %v3748_v11 = vadd.f32 1.0, %v6267_v29  ;;  %v3720_v61 = vmul.f32 0.7978846, %v3704_v33 }
 0x71a   : > { %6272 = vtanh.f32 %v3721_v9  ;;  %v3765_v0 = vmul.f32 %v3749_v47, %v3637_v28 }
 0x71b   : > { %v3691_v32 = vmul.f32 %v3675_v16, %v8635_v44  ;;  %v3674_v60 = vmul.f32 %v3658_v54, %v8640_v30  ;;  %v3764_v41 = vmul.f32 %v3748_v11, %v3636_v51  ;;  %6274 = vtanh.f32 %v3720_v61 }
 0x71c   : > { %v5708_v24 = vpop.f32.mrf.mxu0 }
 0x71d   : > { %v3707_v20 = vadd.f32 %v3691_v32, %v8635_v44  ;;  %v8649_v21 = vadd.f32 %v5708_v24, %v8604_v56  ;;  %5750 = vmatprep.mubr.f32.mxu1 %v3764_v41  ;;  %v3690_v4 = vmul.f32 %v3674_v60, %v8640_v30 }
 0x71e   : > { %v6269_v27 = vpop.eup %6268  ;;  %v3597_v5 = vpop.f32.mrf.mxu0  ;;  %5751 = vmatmul.mubr.f32.vlgmr.msra.gmra.mxu1 %v3765_v0  ;;  %v3642_v0 = vmul.f32 0.5, %v8640_v30 }
 0x71f   : > { %v3661_v13 = vmul.f32 0.044715, %v8649_v21  ;;  %v8654_v17 = vadd.f32 %v8604_v56, %v3597_v5  ;;  %v3706_v46 = vadd.f32 %v3690_v4, %v8640_v30  ;;  %v3751_v39 = vadd.f32 1.0, %v6269_v27 }
 0x720   : > { %v6271_v3 = vpop.eup %6270  ;;  %v3723_v25 = vmul.f32 0.7978846, %v3707_v20  ;;  %v3643_v27 = vmul.f32 0.5, %v8635_v44 }
 0x721   : > { %v3677_v57 = vmul.f32 %v3661_v13, %v8649_v21  ;;  %v3660_v23 = vmul.f32 0.044715, %v8654_v17  ;;  %v3750_v31 = vadd.f32 1.0, %v6271_v3  ;;  %v3722_v48 = vmul.f32 0.7978846, %v3706_v46 }
 0x722   : > { %6276 = vtanh.f32 %v3723_v25  ;;  %v3767_v37 = vmul.f32 %v3751_v39, %v3639_v19 }
 0x723   : > { %v3693_v59 = vmul.f32 %v3677_v57, %v8649_v21  ;;  %v3676_v58 = vmul.f32 %v3660_v23, %v8654_v17  ;;  %v3766_v1 = vmul.f32 %v3750_v31, %v3638_v15  ;;  %6278 = vtanh.f32 %v3722_v48 }
 0x724   : > { %v5711_v14 = vpop.f32.mrf.mxu0 }
 0x725   : > { %v3709_v43 = vadd.f32 %v3693_v59, %v8649_v21  ;;  %v8665_v53 = vadd.f32 %v5711_v14, %v8604_v56  ;;  %5753 = vmatprep.mubr.f32.mxu1 %v3766_v1  ;;  %v3692_v10 = vmul.f32 %v3676_v58, %v8654_v17  ;;  %v3644_v1 = vmul.f32 0.5, %v8654_v17 }
 0x726   : > { %v3607_v22 = vpop.f32.mrf.mxu0  ;;  %5754 = vmatmul.mubr.f32.gmra.mxu1 %v3767_v37  ;;  %v3645_v37 = vmul.f32 0.5, %v8649_v21 }
 0x727   : > { %v6273_v38 = vpop.eup %6272  ;;  %v3663_v18 = vmul.f32 0.044715, %v8665_v53  ;;  %v8670_v49 = vadd.f32 %v8604_v56, %v3607_v22  ;;  %v3708_v7 = vadd.f32 %v3692_v10, %v8654_v17  ;;  %v3725_v35 = vmul.f32 0.7978846, %v3709_v43 }
 0x728   : > { %v3753_v40 = vadd.f32 1.0, %v6273_v38  ;;  %v6275_v34 = vpop.eup %6274 }
 0x729   : > { %v3679_v42 = vmul.f32 %v3663_v18, %v8665_v53  ;;  %v3662_v63 = vmul.f32 0.044715, %v8670_v49  ;;  %v3724_v6 = vmul.f32 0.7978846, %v3708_v7  ;;  %6280 = vtanh.f32 %v3725_v35 }
 0x72a   : > { %v3752_v52 = vadd.f32 1.0, %v6275_v34  ;;  %v3769_v47 = vmul.f32 %v3753_v40, %v3641_v12  ;;  %v3646_v17 = vmul.f32 0.5, %v8670_v49 }
 0x72b   : > { %v3695_v62 = vmul.f32 %v3679_v42, %v8665_v53  ;;  %v3678_v45 = vmul.f32 %v3662_v63, %v8670_v49  ;;  %6282 = vtanh.f32 %v3724_v6 }
 0x72c   : > { %v5714_v2 = vpop.f32.mrf.mxu0  ;;  %v3768_v50 = vmul.f32 %v3752_v52, %v3640_v8  ;;  %v3647_v8 = vmul.f32 0.5, %v8665_v53 }
 0x72d   : > { %v3711_v33 = vadd.f32 %v3695_v62, %v8665_v53  ;;  %v8681_v29 = vadd.f32 %v5714_v2, %v8604_v56  ;;  %v3694_v9 = vmul.f32 %v3678_v45, %v8670_v49 }
 0x72e   : > { %5756 = vmatprep.mubr.f32.mxu1 %v3768_v50  ;;  %v3617_v55 = vpop.f32.mrf.mxu0 }
 0x72f   : > { %v6277_v16 = vpop.eup %6276  ;;  %v3665_v54 = vmul.f32 0.044715, %v8681_v29  ;;  %v8686_v51 = vadd.f32 %v8604_v56, %v3617_v55  ;;  %5757 = vmatmul.mubr.f32.gmra.mxu1 %v3769_v47  ;;  %v3710_v26 = vadd.f32 %v3694_v9, %v8670_v49  ;;  %v3727_v11 = vmul.f32 0.7978846, %v3711_v33 }
 0x730   : > { %v3755_v28 = vadd.f32 1.0, %v6277_v16  ;;  %v6279_v61 = vpop.eup %6278  ;;  %v3649_v47 = vmul.f32 0.5, %v8681_v29 }
 0x731   : > { %v3681_v32 = vmul.f32 %v3665_v54, %v8681_v29  ;;  %v3664_v60 = vmul.f32 0.044715, %v8686_v51  ;;  %v3726_v41 = vmul.f32 0.7978846, %v3710_v26  ;;  %6284 = vtanh.f32 %v3727_v11 }
 0x732   : > { %v3754_v24 = vadd.f32 1.0, %v6279_v61  ;;  %v3771_v39 = vmul.f32 %v3755_v28, %v3643_v27  ;;  %v3648_v50 = vmul.f32 0.5, %v8686_v51 }
 0x733   : > { %v3697_v20 = vmul.f32 %v3681_v32, %v8681_v29  ;;  %v3680_v4 = vmul.f32 %v3664_v60, %v8686_v51  ;;  %6286 = vtanh.f32 %v3726_v41 }
 0x734   : > { %v5717_v5 = vpop.f32.mrf.mxu0  ;;  %v3770_v13 = vmul.f32 %v3754_v24, %v3642_v0 }
 0x735   : > { %v3713_v46 = vadd.f32 %v3697_v20, %v8681_v29  ;;  %v3633_v3 = vadd.f32 %v5717_v5, %v8604_v56  ;;  %v3696_v25 = vmul.f32 %v3680_v4, %v8686_v51 }
 0x736   : > { %v6281_v57 = vpop.eup %6280  ;;  %5759 = vmatprep.mubr.f32.mxu1 %v3770_v13  ;;  %v3627_v30 = vpop.f32.mrf.mxu0 }
 0x737   : > { %v3667_v23 = vmul.f32 0.044715, %v3633_v3  ;;  %v3628_v15 = vadd.f32 %v8604_v56, %v3627_v30  ;;  %5760 = vmatmul.mubr.f32.gmra.mxu1 %v3771_v39  ;;  %v3712_v31 = vadd.f32 %v3696_v25, %v8686_v51  ;;  %v3757_v19 = vadd.f32 1.0, %v6281_v57 }
 0x738   : > { %v6283_v44 = vpop.eup %6282  ;;  %v3729_v48 = vmul.f32 0.7978846, %v3713_v46  ;;  %v3651_v11 = vmul.f32 0.5, %v3633_v3  ;;  %v8721_v46 = vld [vmem:[%s9025_s3 + $0x3] ss:$0 sm:$0xff] }
 0x739   : > { %v3683_v59 = vmul.f32 %v3667_v23, %v3633_v3  ;;  %v3666_v58 = vmul.f32 0.044715, %v3628_v15  ;;  %v3756_v14 = vadd.f32 1.0, %v6283_v44  ;;  %v3728_v43 = vmul.f32 0.7978846, %v3712_v31 }
 0x73a   : > { %6288 = vtanh.f32 %v3729_v48  ;;  %v3773_v18 = vmul.f32 %v3757_v19, %v3645_v37  ;;  %v3650_v54 = vmul.f32 0.5, %v3628_v15 }
 0x73b   : > { %v3699_v10 = vmul.f32 %v3683_v59, %v3633_v3  ;;  %v3682_v22 = vmul.f32 %v3666_v58, %v3628_v15  ;;  %v3772_v38 = vmul.f32 %v3756_v14, %v3644_v1  ;;  %6290 = vtanh.f32 %v3728_v43 }
 0x73d   : > { %v3715_v56 = vadd.f32 %v3699_v10, %v3633_v3  ;;  %5762 = vmatprep.mubr.f32.mxu1 %v3772_v38  ;;  %v3698_v7 = vmul.f32 %v3682_v22, %v3628_v15 }
 0x73e   : > { %v6285_v35 = vpop.eup %6284  ;;  %5763 = vmatmul.mubr.f32.gmra.mxu1 %v3773_v18 }
 0x73f   : > { %v3714_v40 = vadd.f32 %v3698_v7, %v3628_v15  ;;  %v3731_v34 = vmul.f32 0.7978846, %v3715_v56  ;;  %v3759_v63 = vadd.f32 1.0, %v6285_v35 }
 0x740   : > { %v6287_v42 = vpop.eup %6286 }
 0x741   : > { %v3758_v6 = vadd.f32 1.0, %v6287_v42  ;;  %v3730_v21 = vmul.f32 0.7978846, %v3714_v40  ;;  %6292 = vtanh.f32 %v3731_v34  ;;  %v3775_v62 = vmul.f32 %v3759_v63, %v3647_v8 }
 0x743   : > { %v3774_v52 = vmul.f32 %v3758_v6, %v3646_v17  ;;  %6294 = vtanh.f32 %v3730_v21 }
 0x745   : > { %5765 = vmatprep.mubr.f32.mxu1 %v3774_v52 }
 0x746   : > { %5766 = vmatmul.mubr.f32.gmra.mxu1 %v3775_v62 }
 0x747   : > { %v6289_v45 = vpop.eup %6288 }
 0x748   : > { %v6291_v12 = vpop.eup %6290  ;;  %v3761_v2 = vadd.f32 1.0, %v6289_v45 }
 0x749   : > { %v3760_v33 = vadd.f32 1.0, %v6291_v12 }
 0x74a   : > { %v3777_v49 = vmul.f32 %v3761_v2, %v3649_v47 }
 0x74b   : > { %v3776_v9 = vmul.f32 %v3760_v33, %v3648_v50 }
 0x74d   : > { %5768 = vmatprep.mubr.f32.mxu1 %v3776_v9 }
 0x74e   : > { %v6293_v55 = vpop.eup %6292  ;;  %5769 = vmatmul.mubr.f32.gmra.mxu1 %v3777_v49 }
 0x74f   : > { %v3763_v53 = vadd.f32 1.0, %v6293_v55 }
 0x750   : > { %v6295_v16 = vpop.eup %6294 }
 0x751   : > { %v3762_v26 = vadd.f32 1.0, %v6295_v16  ;;  %v3779_v61 = vmul.f32 %v3763_v53, %v3651_v11 }
 0x753   : > { %v3778_v28 = vmul.f32 %v3762_v26, %v3650_v54 }
 0x755   : > { %5771 = vmatprep.mubr.f32.mxu1 %v3778_v28 }
 0x756   : > { %5772 = vmatmul.mubr.f32.gmra.mxu1 %v3779_v61 }
 0x757   : > { %5841 = vmatprep.mubr.msk.f32.mxu1 %vm6435_vm11, %v9411_v36 }
 0x7de   : > { %v8706_v32 = vpop.f32.mrf.mxu1 }
 0x7e0   : > { %v8708_v51 = vpop.f32.mrf.mxu1 }
 0x7e6   : > { %v8710_v60 = vpop.f32.mrf.mxu1 }
 0x7e8   : > { %v8714_v29 = vpop.f32.mrf.mxu1 }
 0x7ef   : > { %v5758_v41 = vpop.f32.mrf.mxu1 }
 0x7f0   : > { %v8778_v61 = vadd.f32 %v5758_v41, %v8721_v46 }
 0x7f1   : > { %v8716_v0 = vpop.f32.mrf.mxu1 }
 0x7f2   : > { %v8787_v41 = vadd.f32 %v8721_v46, %v8716_v0 }
 0x7f7   : > { %v5761_v24 = vpop.f32.mrf.mxu1 }
 0x7f8   : > { %v8764_v50 = vadd.f32 %v5761_v24, %v8721_v46 }
 0x7f9   : > { %v3898_v20 = vpop.f32.mrf.mxu1 }
 0x7fa   : > { %v3970_v16 = vmul.f32 0.044715, %v8764_v50  ;;  %v8772_v53 = vadd.f32 %v8721_v46, %v3898_v20 }
 0x7fc   : > { %v3986_v24 = vmul.f32 %v3970_v16, %v8764_v50 }
 0x7fe   : > { %v5764_v4 = vpop.f32.mrf.mxu1 }
 0x7ff   : > { %v8748_v56 = vadd.f32 %v5764_v4, %v8721_v46  ;;  %v3969_v4 = vmul.f32 0.044715, %v8772_v53 }
 0x800   : > { %v3908_v27 = vpop.f32.mrf.mxu1 }
 0x801   : > { %v3972_v21 = vmul.f32 0.044715, %v8748_v56  ;;  %v8758_v8 = vadd.f32 %v8721_v46, %v3908_v27 }
 0x803   : > { %v3988_v33 = vmul.f32 %v3972_v21, %v8748_v56  ;;  %v3971_v47 = vmul.f32 0.044715, %v8758_v8 }
 0x805   : > { %v3987_v54 = vmul.f32 %v3971_v47, %v8758_v8  ;;  %v4004_v26 = vmul.f32 %v3988_v33, %v8748_v56 }
 0x806   : > { %v5767_v5 = vpop.f32.mrf.mxu1 }
 0x807   : > { %v8731_v23 = vadd.f32 %v5767_v5, %v8721_v46  ;;  %v4003_v27 = vmul.f32 %v3987_v54, %v8758_v8  ;;  %v4020_v20 = vadd.f32 %v4004_v26, %v8748_v56 }
 0x808   : > { %v3918_v13 = vpop.f32.mrf.mxu1 }
 0x809   : > { %v3974_v1 = vmul.f32 0.044715, %v8731_v23  ;;  %v8741_v14 = vadd.f32 %v8721_v46, %v3918_v13  ;;  %v3958_v16 = vmul.f32 0.5, %v8731_v23 }
 0x80b   : > { %v3990_v7 = vmul.f32 %v3974_v1, %v8731_v23  ;;  %v3973_v35 = vmul.f32 0.044715, %v8741_v14 }
 0x80d   : > { %v4006_v52 = vmul.f32 %v3990_v7, %v8731_v23  ;;  %v3989_v62 = vmul.f32 %v3973_v35, %v8741_v14 }
 0x80e   : > { %v5770_v3 = vpop.f32.mrf.mxu1 }
 0x80f   : > { %v8724_v39 = vadd.f32 %v5770_v3, %v8721_v46  ;;  %v4022_v9 = vadd.f32 %v4006_v52, %v8731_v23  ;;  %v4005_v49 = vmul.f32 %v3989_v62, %v8741_v14  ;;  %v3968_v3 = vmul.f32 0.044715, %v8778_v61 }
 0x810   : > { %v3928_v25 = vpop.f32.mrf.mxu1  ;;  %v3957_v23 = vmul.f32 0.5, %v8741_v14 }
 0x811   : > { %v3976_v57 = vmul.f32 0.044715, %v8724_v39  ;;  %v8728_v30 = vadd.f32 %v8721_v46, %v3928_v25  ;;  %v4021_v11 = vadd.f32 %v4005_v49, %v8741_v14  ;;  %v4038_v28 = vmul.f32 0.7978846, %v4022_v9 }
 0x812   : > { %v3956_v14 = vmul.f32 0.5, %v8748_v56 }
 0x813   : > { %v3992_v31 = vmul.f32 %v3976_v57, %v8724_v39  ;;  %v3975_v44 = vmul.f32 0.044715, %v8728_v30  ;;  %v4037_v5 = vmul.f32 0.7978846, %v4021_v11 }
 0x815   : > { %v4008_v37 = vmul.f32 %v3992_v31, %v8724_v39  ;;  %v3991_v43 = vmul.f32 %v3975_v44, %v8728_v30  ;;  %v4002_v31 = vmul.f32 %v3986_v24, %v8764_v50  ;;  %v3985_v44 = vmul.f32 %v3969_v4, %v8772_v53 }
 0x816   : > { %v5773_v15 = vpop.f32.mrf.mxu1 }
 0x817   : > { %v3944_v19 = vadd.f32 %v5773_v15, %v8721_v46  ;;  %v4024_v40 = vadd.f32 %v4008_v37, %v8724_v39  ;;  %v4007_v34 = vmul.f32 %v3991_v43, %v8728_v30  ;;  %v4036_v37 = vmul.f32 0.7978846, %v4020_v20 }
 0x818   : > { %v3938_v48 = vpop.f32.mrf.mxu1 }
 0x819   : > { %v3978_v59 = vmul.f32 0.044715, %v3944_v19  ;;  %v8737_v58 = vadd.f32 %v8721_v46, %v3938_v48  ;;  %v4023_v45 = vadd.f32 %v4007_v34, %v8728_v30  ;;  %v4040_v2 = vmul.f32 0.7978846, %v4024_v40 }
 0x81a   : > { %v3962_v25 = vmul.f32 0.5, %v3944_v19  ;;  %v4019_v48 = vadd.f32 %v4003_v27, %v8758_v8  ;;  %v3960_v34 = vmul.f32 0.5, %v8724_v39  ;;  %v8816_v39 = vadd.f32 %v8706_v32, %v8721_v46 }
 0x81b   : > { %v3994_v10 = vmul.f32 %v3978_v59, %v3944_v19  ;;  %v3977_v22 = vmul.f32 0.044715, %v8737_v58  ;;  %v4039_v55 = vmul.f32 0.7978846, %v4023_v45  ;;  %v3961_v0 = vmul.f32 0.5, %v8737_v58 }
 0x81c   : > { %v3959_v45 = vmul.f32 0.5, %v8728_v30  ;;  %v8827_v30 = vadd.f32 %v8721_v46, %v8708_v51  ;;  %v3964_v54 = vmul.f32 0.044715, %v8816_v39 }
 0x81d   : > { %v4010_v38 = vmul.f32 %v3994_v10, %v3944_v19  ;;  %v3993_v18 = vmul.f32 %v3977_v22, %v8737_v58  ;;  %v3984_v10 = vmul.f32 %v3968_v3, %v8778_v61  ;;  %v3967_v22 = vmul.f32 0.044715, %v8787_v41 }
 0x81e   : > { %v3980_v27 = vmul.f32 %v3964_v54, %v8816_v39  ;;  %v3963_v20 = vmul.f32 0.044715, %v8827_v30 }
 0x81f   : > { %v4026_v42 = vadd.f32 %v4010_v38, %v3944_v19  ;;  %v4009_v63 = vmul.f32 %v3993_v18, %v8737_v58  ;;  %v8794_v19 = vadd.f32 %v8710_v60, %v8721_v46  ;;  %v4018_v38 = vadd.f32 %v4002_v31, %v8764_v50 }
 0x820   : > { %v4001_v18 = vmul.f32 %v3985_v44, %v8772_v53  ;;  %v4035_v60 = vmul.f32 0.7978846, %v4019_v48  ;;  %v3996_v31 = vmul.f32 %v3980_v27, %v8816_v39  ;;  %v3979_v44 = vmul.f32 %v3963_v20, %v8827_v30  ;;  %v9420_v27 = vld [vmem:[#allocation22_spill] sm:$0xff]  ;;  %v9422_v20 = vld [vmem:[#allocation37_spill] sm:$0xff] }
 0x821   : > { %v4025_v17 = vadd.f32 %v4009_v63, %v8737_v58  ;;  %v4042_v6 = vmul.f32 0.7978846, %v4026_v42  ;;  %v8805_v58 = vadd.f32 %v8721_v46, %v8714_v29  ;;  %v3966_v42 = vmul.f32 0.044715, %v8794_v19 }
 0x822   : > { %v4000_v63 = vmul.f32 %v3984_v10, %v8778_v61  ;;  %v4034_v29 = vmul.f32 0.7978846, %v4018_v38  ;;  %v4012_v56 = vadd.f32 %v3996_v31, %v8816_v39  ;;  %v3995_v10 = vmul.f32 %v3979_v44, %v8827_v30  ;;  %v9438_v31 = vld [vmem:[#allocation33_spill] sm:$0xff] }
 0x823   : > { %6296 = vtanh.f32 %v4042_v6  ;;  %v4041_v12 = vmul.f32 0.7978846, %v4025_v17  ;;  %v3983_v17 = vmul.f32 %v3967_v22, %v8787_v41  ;;  %v4017_v6 = vadd.f32 %v4001_v18, %v8772_v53  ;;  %v9440_v44 = vld [vmem:[#allocation17_spill] sm:$0xff] }
 0x824   : > { %v4016_v33 = vadd.f32 %v4000_v63, %v8778_v61  ;;  %v3953_v63 = vmul.f32 0.5, %v8772_v53 }
 0x825   : > { %6298 = vtanh.f32 %v4041_v12  ;;  %v3982_v12 = vmul.f32 %v3966_v42, %v8794_v19  ;;  %v3999_v47 = vmul.f32 %v3983_v17, %v8787_v41  ;;  %v4033_v32 = vmul.f32 0.7978846, %v4017_v6 }
 0x826   : > { %6300 = vtanh.f32 %v4040_v2  ;;  %v3965_v2 = vmul.f32 0.044715, %v8805_v58  ;;  %v4032_v51 = vmul.f32 0.7978846, %v4016_v33 }
 0x827   : > { %6302 = vtanh.f32 %v4039_v55  ;;  %v3998_v26 = vmul.f32 %v3982_v12, %v8794_v19 }
 0x828   : > { %6304 = vtanh.f32 %v4038_v28  ;;  %v3981_v11 = vmul.f32 %v3965_v2, %v8805_v58  ;;  %v4015_v28 = vadd.f32 %v3999_v47, %v8787_v41 }
 0x829   : > { %6306 = vtanh.f32 %v4037_v5  ;;  %v4014_v5 = vadd.f32 %v3998_v26, %v8794_v19 }
 0x82a   : > { %6308 = vtanh.f32 %v4036_v37 }
 0x82b   : > { %6310 = vtanh.f32 %v4035_v60  ;;  %v4030_v37 = vmul.f32 0.7978846, %v4014_v5  ;;  %v4011_v60 = vadd.f32 %v3995_v10, %v8827_v30  ;;  %v9424_v5 = vld [vmem:[#allocation21_spill] sm:$0xff] }
 0x82c   : > { %6312 = vtanh.f32 %v4034_v29  ;;  %v9456_v10 = vld [vmem:[#allocation13_spill] sm:$0xff] }
 0x82d   : > { %6314 = vtanh.f32 %v4033_v32  ;;  %v4027_v6 = vmul.f32 0.7978846, %v4011_v60 }
 0x82e   : > { %6316 = vtanh.f32 %v4032_v51  ;;  %v9414_v51 = vld [vmem:[#allocation50_spill] sm:$0xff] }
 0x82f   : > { %vm9423_vm15 = vcmp.eq.s32.totalorder %v9422_v20, %v9414_v51 }
 0x830   : > { %v6297_v13 = vpop.eup %6296 }
 0x831   : > { %v4074_v57 = vadd.f32 1.0, %v6297_v13  ;;  %v3997_v13 = vmul.f32 %v3981_v11, %v8805_v58 }
 0x832   : > { %v6299_v15 = vpop.eup %6298 }
 0x833   : > { %v4090_v59 = vmul.f32 %v4074_v57, %v3962_v25  ;;  %v4073_v1 = vadd.f32 1.0, %v6299_v15  ;;  %v6301_v43 = vpop.eup %6300  ;;  %v4031_v57 = vmul.f32 0.7978846, %v4015_v28  ;;  %v4013_v48 = vadd.f32 %v3997_v13, %v8805_v58  ;;  %v4164_v28 = vld [vmem:[%s9025_s3 + $0x5] sm:$0x1] }
 0x834   : > { %v4072_v35 = vadd.f32 1.0, %v6301_v43  ;;  %v6303_v40 = vpop.eup %6302  ;;  %v9426_v13 = vld [vmem:[#allocation36_spill] sm:$0xff] }
 0x835   : > { %5775 = vmatpush3.xpose.msra.mxu0 %v4090_v59  ;;  %5810 = vmatpush3.xpose.msra.mxu1 %v4090_v59  ;;  %v4089_v7 = vmul.f32 %v4073_v1, %v3961_v0  ;;  %v4071_v52 = vadd.f32 1.0, %v6303_v40  ;;  %v6305_v62 = vpop.eup %6304  ;;  %6318 = vtanh.f32 %v4031_v57  ;;  %v3955_v0 = vmul.f32 0.5, %v8758_v8  ;;  %v9432_v57 = vld [vmem:[#allocation19_spill] sm:$0xff] }
 0x836   : > { %5776 = vmatprep.subr.mxu0 %v9411_v36  ;;  %5811 = vmatprep.subr.mxu1 %v9411_v36  ;;  %v4088_v21 = vmul.f32 %v4072_v35, %v3960_v34  ;;  %v4070_v49 = vadd.f32 1.0, %v6305_v62  ;;  %v6307_v55 = vpop.eup %6306  ;;  %6320 = vtanh.f32 %v4030_v37  ;;  %v4029_v18 = vmul.f32 0.7978846, %v4013_v48  ;;  %v9442_v48 = vld [vmem:[#allocation32_spill] sm:$0xff]  ;;  %v9448_v37 = vld [vmem:[#allocation15_spill] sm:$0xff] }
 0x837   : > { %v4087_v9 = vmul.f32 %v4071_v52, %v3959_v45  ;;  %v4069_v4 = vadd.f32 1.0, %v6307_v55  ;;  %v6309_v46 = vpop.eup %6308  ;;  %v3954_v35 = vmul.f32 0.5, %v8764_v50  ;;  %v4028_v34 = vmul.f32 0.7978846, %v4012_v56  ;;  %v9454_v56 = vld [vmem:[#allocation29_spill] sm:$0xff] }
 0x838   : > { %v4086_v24 = vmul.f32 %v4070_v49, %v3958_v16  ;;  %v4068_v25 = vadd.f32 1.0, %v6309_v46  ;;  %v6311_v15 = vpop.eup %6310  ;;  %6322 = vtanh.f32 %v4029_v18  ;;  %v3952_v52 = vmul.f32 0.5, %v8778_v61 }
 0x839   : > { %5777 = vmatpush3.xpose.msra.mxu0 %v4089_v7  ;;  %5812 = vmatpush3.xpose.msra.mxu1 %v4089_v7  ;;  %v4085_v3 = vmul.f32 %v4069_v4, %v3957_v23  ;;  %v4067_v1 = vadd.f32 1.0, %v6311_v15  ;;  %v6313_v43 = vpop.eup %6312  ;;  %6324 = vtanh.f32 %v4028_v34  ;;  %v3951_v45 = vmul.f32 0.5, %v8787_v41  ;;  %v9434_v15 = vld [vmem:[#allocation34_spill] sm:$0xff] }
 0x83a   : > { %5778 = vmatprep.subr.mxu0 %v9411_v36  ;;  %5813 = vmatprep.subr.mxu1 %v9411_v36  ;;  %v4084_v59 = vmul.f32 %v4068_v25, %v3956_v14  ;;  %v4066_v38 = vadd.f32 1.0, %v6313_v43  ;;  %v6315_v7 = vpop.eup %6314  ;;  %6326 = vtanh.f32 %v4027_v6  ;;  %v3950_v61 = vmul.f32 0.5, %v8794_v19  ;;  %v9430_v25 = vld [vmem:[#allocation35_spill] sm:$0xff]  ;;  %v9436_v14 = vld [vmem:[#allocation18_spill] sm:$0xff] }
 0x83b   : > { %v4083_v22 = vmul.f32 %v4067_v1, %v3955_v0  ;;  %v4065_v40 = vadd.f32 1.0, %v6315_v7  ;;  %v6317_v42 = vpop.eup %6316  ;;  %v3949_v41 = vmul.f32 0.5, %v8805_v58  ;;  %v3948_v19 = vmul.f32 0.5, %v8816_v39  ;;  %v4091_v39 = vld [vmem:[%s9025_s3 + $0x6] sm:$0x1]  ;;  %v9446_v1 = vld [vmem:[#allocation31_spill] sm:$0xff] }
 0x83c   : > { %v4082_v8 = vmul.f32 %v4066_v38, %v3954_v35  ;;  %v4064_v17 = vadd.f32 1.0, %v6317_v42  ;;  %v3947_v58 = vmul.f32 0.5, %v8827_v30  ;;  %vm9427_vm14 = vcmp.eq.s32.totalorder %v9426_v13, %v9414_v51  ;;  %v9450_v43 = vld [vmem:[#allocation30_spill] sm:$0xff] }
 0x83d   : > { %5779 = vmatpush3.xpose.msra.mxu0 %v4088_v21  ;;  %5814 = vmatpush3.xpose.msra.mxu1 %v4088_v21  ;;  %v4081_v50 = vmul.f32 %v4065_v40, %v3953_v63  ;;  %vm9431_vm11 = vcmp.eq.s32.totalorder %v9430_v25, %v9414_v51  ;;  %v9452_v0 = vld [vmem:[#allocation14_spill] sm:$0xff]  ;;  %v4093_v34 = vstv %s4717_s14  ;;  %v4166_v42 = vstv %s4718_s15 }
 0x83e   : > { %5780 = vmatprep.subr.mxu0 %v9411_v36  ;;  %5815 = vmatprep.subr.mxu1 %v9411_v36  ;;  %v4080_v29 = vmul.f32 %v4064_v17, %v3952_v52 }
 0x841   : > { %5781 = vmatpush3.xpose.msra.mxu0 %v4087_v9  ;;  %5816 = vmatpush3.xpose.msra.mxu1 %v4087_v9 }
 0x842   : > { %5782 = vmatprep.subr.mxu0 %v9411_v36  ;;  %5817 = vmatprep.subr.mxu1 %v9411_v36  ;;  %v6319_v21 = vpop.eup %6318 }
 0x843   : > { %v4063_v62 = vadd.f32 1.0, %v6319_v21  ;;  %v6321_v53 = vpop.eup %6320 }
 0x844   : > { %v4062_v2 = vadd.f32 1.0, %v6321_v53 }
 0x845   : > { %5783 = vmatpush3.xpose.msra.mxu0 %v4086_v24  ;;  %5818 = vmatpush3.xpose.msra.mxu1 %v4086_v24  ;;  %v4079_v12 = vmul.f32 %v4063_v62, %v3951_v45  ;;  %v6323_v33 = vpop.eup %6322  ;;  %v9412_v24 = vmov 1.0  }
 0x846   : > { %5784 = vmatprep.subr.mxu0 %v9411_v36  ;;  %5819 = vmatprep.subr.mxu1 %v9411_v36  ;;  %v4078_v47 = vmul.f32 %v4062_v2, %v3950_v61  ;;  %v4061_v9 = vadd.f32 1.0, %v6323_v33  ;;  %v6325_v49 = vpop.eup %6324 }
 0x847   : > { %v4060_v55 = vadd.f32 1.0, %v6325_v49  ;;  %v6327_v16 = vpop.eup %6326 }
 0x848   : > { %v4077_v32 = vmul.f32 %v4061_v9, %v3949_v41  ;;  %v4059_v26 = vadd.f32 1.0, %v6327_v16 }
 0x849   : > { %5785 = vmatpush3.xpose.msra.mxu0 %v4085_v3  ;;  %5820 = vmatpush3.xpose.msra.mxu1 %v4085_v3  ;;  %v4076_v54 = vmul.f32 %v4060_v55, %v3948_v19  ;;  %v9428_v3 = vld [vmem:[#allocation20_spill] sm:$0xff] }
 0x84a   : > { %5786 = vmatprep.subr.mxu0 %v9411_v36  ;;  %5821 = vmatprep.subr.mxu1 %v9411_v36  ;;  %v4075_v11 = vmul.f32 %v4059_v26, %v3947_v58 }
 0x84d   : > { %5787 = vmatpush3.xpose.msra.mxu0 %v4084_v59  ;;  %5822 = vmatpush3.xpose.msra.mxu1 %v4084_v59  ;;  %v9444_v59 = vld [vmem:[#allocation16_spill] sm:$0xff] }
 0x84e   : > { %5788 = vmatprep.subr.mxu0 %v9411_v36  ;;  %5823 = vmatprep.subr.mxu1 %v9411_v36 }
 0x851   : > { %5789 = vmatpush3.xpose.msra.mxu0 %v4083_v22  ;;  %5824 = vmatpush3.xpose.msra.mxu1 %v4083_v22  ;;  %v9458_v22 = vld [vmem:[#allocation28_spill] sm:$0xff] }
 0x852   : > { %5790 = vmatprep.subr.mxu0 %v9411_v36  ;;  %5825 = vmatprep.subr.mxu1 %v9411_v36 }
 0x855   : > { %5791 = vmatpush3.xpose.msra.mxu0 %v4082_v8  ;;  %5826 = vmatpush3.xpose.msra.mxu1 %v4082_v8 }
 0x856   : > { %5792 = vmatprep.subr.mxu0 %v9411_v36  ;;  %5827 = vmatprep.subr.mxu1 %v9411_v36 }
 0x859   : > { %5793 = vmatpush3.xpose.msra.mxu0 %v4081_v50  ;;  %5828 = vmatpush3.xpose.msra.mxu1 %v4081_v50 }
 0x85a   : > { %5794 = vmatprep.subr.mxu0 %v9411_v36  ;;  %5829 = vmatprep.subr.mxu1 %v9411_v36 }
 0x85d   : > { %5795 = vmatpush3.xpose.msra.mxu0 %v4080_v29  ;;  %5830 = vmatpush3.xpose.msra.mxu1 %v4080_v29 }
 0x85e   : > { %5796 = vmatprep.subr.mxu0 %v9411_v36  ;;  %5831 = vmatprep.subr.mxu1 %v9411_v36 }
 0x861   : > { %5797 = vmatpush3.xpose.msra.mxu0 %v4079_v12  ;;  %5832 = vmatpush3.xpose.msra.mxu1 %v4079_v12 }
 0x862   : > { %5798 = vmatprep.subr.mxu0 %v9411_v36  ;;  %5833 = vmatprep.subr.mxu1 %v9411_v36 }
 0x865   : > { %5799 = vmatpush3.xpose.msra.mxu0 %v4078_v47  ;;  %5834 = vmatpush3.xpose.msra.mxu1 %v4078_v47  ;;  %v9467_v47 = vld [vmem:[#allocation52_spill] sm:$0xff] }
 0x866   : > { %5800 = vmatprep.subr.mxu0 %v9411_v36  ;;  %5835 = vmatprep.subr.mxu1 %v9411_v36 }
 0x869   : > { %5801 = vmatpush3.xpose.msra.mxu0 %v4077_v32  ;;  %5836 = vmatpush3.xpose.msra.mxu1 %v4077_v32 }
 0x86a   : > { %5802 = vmatprep.subr.mxu0 %v9411_v36  ;;  %5837 = vmatprep.subr.mxu1 %v9411_v36 }
 0x86d   : > { %5803 = vmatpush3.xpose.msra.mxu0 %v4076_v54  ;;  %5838 = vmatpush3.xpose.msra.mxu1 %v4076_v54 }
 0x86e   : > { %5804 = vmatprep.subr.mxu0 %v9411_v36  ;;  %5839 = vmatprep.subr.mxu1 %v9411_v36 }
 0x871   : > { %5805 = vmatpush3.xpose.msra.mxu0 %v4075_v11  ;;  %5840 = vmatpush3.xpose.msra.mxu1 %v4075_v11 }
 0x872   : > { %5268 = vmatprep.subr.msk.mxu0 %vm1715_vm10, %v9412_v24  ;;  %vm9421_vm10 = vcmp.eq.s32.totalorder %v9420_v27, %v9414_v51 }
 0x874   : > { %5807 = vmatmul.mubr.f32.vlgmr.msra.gmra.mxu0 %v4091_v39  ;;  %5842 = vmatmul.mubr.f32.vlgmr.msra.gmra.mxu1 %v4164_v28 }
 0x875   : > { %5269 = vmatpush3.xpose.msk.msra.mxu0 %vm9416_vm0, %v9412_v24  ;;  %vm9433_vm0 = vcmp.eq.s32.totalorder %v9432_v57, %v9414_v51 }
 0x876   : > { %5270 = vmatprep.subr.msk.mxu0 %vm1714_vm8, %v9412_v24  ;;  %vm9425_vm8 = vcmp.eq.s32.totalorder %v9424_v5, %v9414_v51 }
 0x879   : > { %5271 = vmatpush3.xpose.msk.msra.mxu0 %vm9349_vm4, %v9412_v24  ;;  %vm9435_vm4 = vcmp.eq.s32.totalorder %v9434_v15, %v9414_v51 }
 0x87a   : > { %5272 = vmatprep.subr.msk.mxu0 %vm1713_vm5, %v9412_v24  ;;  %vm9429_vm5 = vcmp.eq.s32.totalorder %v9428_v3, %v9414_v51 }
 0x87d   : > { %5273 = vmatpush3.xpose.msk.msra.mxu0 %vm9421_vm10, %v9412_v24  ;;  %vm9437_vm10 = vcmp.eq.s32.totalorder %v9436_v14, %v9414_v51 }
 0x87e   : > { %5274 = vmatprep.subr.msk.mxu0 %vm9423_vm15, %v9412_v24  ;;  %vm9439_vm15 = vcmp.eq.s32.totalorder %v9438_v31, %v9414_v51 }
 0x881   : > { %5275 = vmatpush3.xpose.msk.msra.mxu0 %vm9425_vm8, %v9412_v24  ;;  %vm9441_vm8 = vcmp.eq.s32.totalorder %v9440_v44, %v9414_v51 }
 0x882   : > { %5276 = vmatprep.subr.msk.mxu0 %vm9427_vm14, %v9412_v24  ;;  %vm9443_vm14 = vcmp.eq.s32.totalorder %v9442_v48, %v9414_v51 }
 0x885   : > { %5277 = vmatpush3.xpose.msk.msra.mxu0 %vm9429_vm5, %v9412_v24  ;;  %vm9445_vm5 = vcmp.eq.s32.totalorder %v9444_v59, %v9414_v51 }
 0x886   : > { %5278 = vmatprep.subr.msk.mxu0 %vm9431_vm11, %v9412_v24  ;;  %vm9447_vm11 = vcmp.eq.s32.totalorder %v9446_v1, %v9414_v51 }
 0x889   : > { %5279 = vmatpush3.xpose.msk.msra.mxu0 %vm9433_vm0, %v9412_v24  ;;  %vm9449_vm0 = vcmp.eq.s32.totalorder %v9448_v37, %v9414_v51 }
 0x88a   : > { %5280 = vmatprep.subr.msk.mxu0 %vm9435_vm4, %v9412_v24  ;;  %vm9451_vm4 = vcmp.eq.s32.totalorder %v9450_v43, %v9414_v51 }
 0x88d   : > { %5281 = vmatpush3.xpose.msk.msra.mxu0 %vm9437_vm10, %v9412_v24  ;;  %vm9453_vm10 = vcmp.eq.s32.totalorder %v9452_v0, %v9414_v51 }
 0x88e   : > { %5282 = vmatprep.subr.msk.mxu0 %vm9439_vm15, %v9412_v24  ;;  %vm9455_vm15 = vcmp.eq.s32.totalorder %v9454_v56, %v9414_v51 }
 0x891   : > { %5283 = vmatpush3.xpose.msk.msra.mxu0 %vm9441_vm8, %v9412_v24  ;;  %vm9457_vm8 = vcmp.eq.s32.totalorder %v9456_v10, %v9414_v51 }
 0x892   : > { %5284 = vmatprep.subr.msk.mxu0 %vm9443_vm14, %v9412_v24  ;;  %vm9459_vm14 = vcmp.eq.s32.totalorder %v9458_v22, %v9414_v51 }
 0x895   : > { %5285 = vmatpush3.xpose.msk.msra.mxu0 %vm9445_vm5, %v9412_v24 }
 0x896   : > { %5286 = vmatprep.subr.msk.mxu0 %vm9447_vm11, %v9412_v24 }
 0x899   : > { %5287 = vmatpush3.xpose.msk.msra.mxu0 %vm9449_vm0, %v9412_v24 }
 0x89a   : > { %5288 = vmatprep.subr.msk.mxu0 %vm9451_vm4, %v9412_v24 }
 0x89d   : > { %5289 = vmatpush3.xpose.msk.msra.mxu0 %vm9453_vm10, %v9412_v24 }
 0x89e   : > { %5290 = vmatprep.subr.msk.mxu0 %vm9455_vm15, %v9412_v24 }
 0x8a1   : > { %5291 = vmatpush3.xpose.msk.msra.mxu0 %vm9457_vm8, %v9412_v24 }
 0x8a2   : > { %5292 = vmatprep.subr.msk.mxu0 %vm9459_vm14, %v9412_v24 }
 0x8a5   : > { %5293 = vmatpush3.xpose.msk.msra.mxu0 %vm1687_vm6, %v9412_v24 }
 0x8a6   : > { %5294 = vmatprep.subr.msk.mxu0 %vm1702_vm2, %v9412_v24 }
 0x8a9   : > { %5295 = vmatpush3.xpose.msk.msra.mxu0 %vm1686_vm3, %v9412_v24 }
 0x8aa   : > { %5296 = vmatprep.subr.msk.mxu0 %vm1701_vm12, %v9412_v24 }
 0x8ad   : > { %5297 = vmatpush3.xpose.msk.msra.mxu0 %vm1685_vm7, %v9412_v24 }
 0x8ae   : > { %5298 = vmatprep.subr.msk.mxu0 %vm1700_vm9, %v9412_v24 }
 0x8b1   : > { %5299 = vmatpush3.xpose.msk.msra.mxu0 %vm1684_vm1, %v9412_v24 }
 0x934   : > { %v4160_v63 = vpop.f32.mrf.mxu0  ;;  %v4233_v50 = vpop.f32.mrf.mxu1 }
 0x935   : > { %v4161_v17 = vadd.f32 %v4160_v63, %v4093_v34  ;;  %v4234_v6 = vadd.f32 %v4233_v50, %v4166_v42 }
 0x936   : > { %v5808_v21 = vpop.f32.mrf.mxu0  ;;  %v5843_v52 = vpop.f32.mrf.mxu1 }
 0x937   : > { %5300 = vmatprep.mubr.f32.mxu0 %v4161_v17  ;;  %v4237_v29 = vsub.f32 0.0, %v4234_v6 }
 0x938   : > { %5301 = vmatmul.mubr.f32.vlgmr.msra.gmra.mxu0 %v4161_v17 }
 0x939   : > { %v4238_v62 = vmul.f32 1.442695, %v4237_v29 }
 0x93b   : > { %6328 = vpow2.f32 %v4238_v62 }
 0x948   : > { %v6329_v53 = vpop.eup %6328 }
 0x949   : > { %v4240_v45 = vadd.f32 1.0, %v6329_v53 }
 0x94b   : > { %6330 = vrcp.f32 %v4240_v45 }
 0x958   : > { %v6331_v12 = vpop.eup %6330 }
 0x959   : > { %4243 = vst [vmem:[%s7762_s26 + $0x2] sm:$0x1] %v6331_v12 }
 0x9f8   : > { %v4311_v2 = vpop.f32.mrf.mxu0 }
 0x9fa   : > { %v4313_v33 = vpop.f32.mrf.mxu0 }
 0x9fb   : > { %v4318_v61 = vcombine.low %v4311_v2, %v4313_v33 }
 0x9fd   : > { %v4325_v9 = vrot.slane %v4318_v61, %v9467_v47 }
 0x9ff   : > { %v4332_v49 = vrot.slane %v4325_v9, %v9467_v47 }
 0xa01   : > { %4751 = vst.msk [vmem:[%s7762_s26 + $0x1] ss:$4 sm:$0x3] %vm7787_vm13, %v4332_v49 }
 0xa02 PF: > { %s17_s18 = sadd.s32 1, %s6425_s18  }
 0xa03   : > { %p14_p2 = scmp.ge.s32.totalorder %s17_s18, 4  }
 0xa05   :  { %16 = sbr.rel (!%p14_p2) target bundleno = 2 (0x2), region = 88 }
 0xa0a   :  { %4357 = vsyncpa [#allocation3], 1 }
 0xa0b   :  { %4359 = vsyncpa [#allocation3 + $0x1], 1 }
 0xa0c   :  { %4360 = vsyncpa [#allocation4], 1 }
 0xa0d   :  { %4362 = vsyncpa [#allocation4 + $0x1], 1 }

</bundles_post_ra>
